<compile_context>
chip_gen: v5e
topology: v5e:2x2
jax: 0.10.0
libtpu: 0.0.40
codegen_flags: <defaults>
</compile_context>

<pallas_src>
import functools

import jax
import jax.numpy as jnp
from jax.experimental import pallas as pl
from jax.experimental.pallas import tpu as pltpu

# Small shapes consistent with the module
INPUT_SIZE = 28
HIDDEN_SIZE = 32
NUM_LAYERS = 2
NUM_CLASSES = 10
SEQ_LEN = 8
BATCH = 2


# ----------------------------------------------------------------------------
# Fused Pallas kernel
# ----------------------------------------------------------------------------
def _brnn_fused_kernel(x_ref, w0ih_ref, b0_ref, w0blk_ref,
                       w1a_ref, w1b_ref, b1_ref, w1hh_ref,
                       fcw_ref, fcb_ref, out_ref,
                       gx_ref, l0f_ref, l0b_ref, *, T, Bp, H):
    """Whole BRNN forward in one kernel.

    x_ref    : (T*Bp, Din)  time-major, batch padded to Bp=8 rows per step
    w0ih_ref : (Din, 8H)    [wih0_fwd | wih0_bwd] column concat, f32
    b0_ref   : (1, 8H)      [b_fwd | b_bwd] (b_ih + b_hh), f32
    w0blk_ref: (2H, 8H)     block-diag [whh0_fwd ; whh0_bwd], bf16
    w1a_ref  : (H, 8H)      rows 0:H of [wih1_fwd | wih1_bwd], f32
    w1b_ref  : (H, 8H)      rows H:2H of [wih1_fwd | wih1_bwd], f32
    b1_ref   : (1, 8H)      layer-1 biases, f32
    w1hh_ref : (H, 4H)      layer-1 fwd recurrent weight, bf16
    fcw_ref  : (2H, C), fcb_ref : (1, C)
    out_ref  : (Bp, C)
    gx_ref   : (T*Bp, 8H)   scratch: hoisted gate projections (reused per layer)
    l0f_ref  : (T*Bp, H)    scratch: layer-0 fwd outputs, natural time order
    l0b_ref  : (T*Bp, H)    scratch: layer-0 bwd outputs, natural time order
    """
    G = 4 * H
    bf16 = jnp.bfloat16

    # ------------------------- layer 0 -------------------------
    # Hoisted dual-direction input projection (off the serial critical path):
    # (T*Bp, Din) @ (Din, 8H) fills both directions' gate pre-activations at once.
    gx_ref[...] = (jnp.dot(x_ref[...], w0ih_ref[...],
                           preferred_element_type=jnp.float32) + b0_ref[...])

    w0blk = w0blk_ref[...]                       # (2H, 8H) bf16, loaded once
    zeros_h = jnp.zeros((Bp, H), jnp.float32)
    h_cat = jnp.zeros((Bp, 2 * H), jnp.float32)  # [hf | hb]
    c_f = zeros_h
    c_b = zeros_h

    for s in range(T):                           # static unroll; fused fwd+bwd step
        sb = T - 1 - s                           # bwd chain's time index
        # ONE block-diagonal recurrent matmul per step (bf16 operands, f32 acc).
        hm = jnp.dot(h_cat.astype(bf16), w0blk,
                     preferred_element_type=jnp.float32)           # (Bp, 8H)
        gx_f = gx_ref[s * Bp:(s + 1) * Bp, 0:G]                    # aligned (8,128)
        gx_b = gx_ref[sb * Bp:(sb + 1) * Bp, G:2 * G]              # aligned (8,128)
        gates = jnp.concatenate([gx_f, gx_b], axis=1) + hm         # (Bp, 8H)
        sig = jax.nn.sigmoid(gates)
        # forward direction (gate order i,f,g,o in cols 0:4H)
        c_f = sig[:, H:2 * H] * c_f + sig[:, 0:H] * jnp.tanh(gates[:, 2 * H:3 * H])
        h_f = sig[:, 3 * H:4 * H] * jnp.tanh(c_f)
        # backward direction (cols 4H:8H)
        c_b = (sig[:, G + H:G + 2 * H] * c_b
               + sig[:, G:G + H] * jnp.tanh(gates[:, G + 2 * H:G + 3 * H]))
        h_b = sig[:, G + 3 * H:G + 4 * H] * jnp.tanh(c_b)
        h_cat = jnp.concatenate([h_f, h_b], axis=1)
        # natural-time, lane-offset-0 stores into the split layer-0 buffers
        l0f_ref[s * Bp:(s + 1) * Bp, :] = h_f
        l0b_ref[sb * Bp:(sb + 1) * Bp, :] = h_b

    # ------------------------- layer 1 -------------------------
    # Hoisted projection from the split layer-0 buffers (row-split wih1), reusing gx.
    gx_ref[...] = (jnp.dot(l0f_ref[...], w1a_ref[...], preferred_element_type=jnp.float32)
                   + jnp.dot(l0b_ref[...], w1b_ref[...], preferred_element_type=jnp.float32)
                   + b1_ref[...])

    w1hh = w1hh_ref[...]                         # (H, 4H) bf16, loaded once
    h1 = zeros_h
    c1 = zeros_h
    for s in range(T):                           # forward chain only
        gates = (gx_ref[s * Bp:(s + 1) * Bp, 0:G]
                 + jnp.dot(h1.astype(bf16), w1hh, preferred_element_type=jnp.float32))
        sig = jax.nn.sigmoid(gates)
        c1 = sig[:, H:2 * H] * c1 + sig[:, 0:H] * jnp.tanh(gates[:, 2 * H:3 * H])
        h1 = sig[:, 3 * H:4 * H] * jnp.tanh(c1)

    # Top-layer backward direction: only its first step (time T-1) reaches
    # out[:, -1, :]; with zero initial state it needs NO recurrent matmul.
    gates_b = gx_ref[(T - 1) * Bp:T * Bp, G:2 * G]
    sigb = jax.nn.sigmoid(gates_b)
    c1b = sigb[:, 0:H] * jnp.tanh(gates_b[:, 2 * H:3 * H])      # f * 0 + i * g
    h1b = sigb[:, 3 * H:4 * H] * jnp.tanh(c1b)

    # ------------------------- FC head -------------------------
    # Split fc_w rows instead of lane-concatenating (h1, h1b).
    out_ref[...] = (jnp.dot(h1, fcw_ref[0:H, :], preferred_element_type=jnp.float32)
                    + jnp.dot(h1b, fcw_ref[H:2 * H, :], preferred_element_type=jnp.float32)
                    + fcb_ref[...])


# ----------------------------------------------------------------------------
# Wrapper
# ----------------------------------------------------------------------------
def brnn_forward(x, params):
    """x: (B, T, input_size), batch_first like PyTorch. Returns (B, num_classes)."""
    B, T, Din = x.shape
    H = HIDDEN_SIZE
    Bp = ((B + 7) // 8) * 8
    Bp = max(Bp, 8)
    # Time-major, batch padded to a full sublane tile (8 rows per time step) so every
    # per-step block inside the kernel is an aligned (8, 128) tile access.
    x_tm = jnp.transpose(x, (1, 0, 2))                     # (T, B, Din)
    x_tm = jnp.pad(x_tm, ((0, 0), (0, Bp - B), (0, 0)))    # (T, Bp, Din)
    x_tm = x_tm.reshape(T * Bp, Din)

    vmem = pl.BlockSpec(memory_space=pltpu.MemorySpace.VMEM)
    kernel = functools.partial(_brnn_fused_kernel, T=T, Bp=Bp, H=H)
    out = pl.pallas_call(
        kernel,
        out_shape=jax.ShapeDtypeStruct((Bp, NUM_CLASSES), jnp.float32),
        in_specs=[vmem] * 10,
        out_specs=vmem,
        scratch_shapes=[pltpu.VMEM((T * Bp, 8 * H), jnp.float32),   # gate projections
                        pltpu.VMEM((T * Bp, H), jnp.float32),       # layer-0 fwd out
                        pltpu.VMEM((T * Bp, H), jnp.float32)],      # layer-0 bwd out
    )(x_tm,
      params['w0ih'], params['b0'], params['w0blk'],
      params['w1a'], params['w1b'], params['b1'], params['w1hh_f'],
      params['fc_w'], params['fc_b'])
    return out[:B]


# ----------------------------------------------------------------------------
# Deterministic parameter init (PyTorch-style uniform(-1/sqrt(H), 1/sqrt(H)))
# Returns (packed params for the fused kernel, raw per-direction params for the ref).
# ----------------------------------------------------------------------------
def init_params(key):
    H = HIDDEN_SIZE
    G = 4 * H
    k = 1.0 / jnp.sqrt(jnp.float32(H))

    def uni(key, shape, scale):
        return jax.random.uniform(key, shape, jnp.float32, -scale, scale)

    raw = {}
    for l in range(NUM_LAYERS):
        din = INPUT_SIZE if l == 0 else 2 * H
        layer = {}
        for d in ('fwd', 'bwd'):
            key, k1, k2, k3, k4 = jax.random.split(key, 5)
            wih = uni(k1, (din, G), k)           # x @ Wih  (pre-transposed vs PyTorch)
            whh = uni(k2, (H, G), k)             # h @ Whh
            b = uni(k3, (1, G), k) + uni(k4, (1, G), k)   # b_ih + b_hh
            layer[d] = (wih, whh, b)
        raw[f'layer{l}'] = layer
    key, k1, k2 = jax.random.split(key, 3)
    kf = 1.0 / jnp.sqrt(jnp.float32(2 * H))
    raw['fc_w'] = uni(k1, (2 * H, NUM_CLASSES), kf)
    raw['fc_b'] = uni(k2, (1, NUM_CLASSES), kf)

    w0f, h0f, b0f = raw['layer0']['fwd']
    w0b, h0b, b0b = raw['layer0']['bwd']
    w1f, h1f, b1f = raw['layer1']['fwd']
    w1bk, h1b, b1b = raw['layer1']['bwd']

    # Block-diagonal fused recurrent weight for layer 0: rows 0:H (hf) feed the fwd
    # gate columns, rows H:2H (hb) feed the bwd gate columns.
    w0blk = jnp.zeros((2 * H, 2 * G), jnp.float32)
    w0blk = w0blk.at[0:H, 0:G].set(h0f).at[H:2 * H, G:2 * G].set(h0b)

    packed = {
        'w0ih': jnp.concatenate([w0f, w0b], axis=1),                  # (Din, 8H)
        'b0':   jnp.concatenate([b0f, b0b], axis=1),                  # (1, 8H)
        'w0blk': w0blk.astype(jnp.bfloat16),                          # (2H, 8H) bf16
        'w1a': jnp.concatenate([w1f[0:H, :], w1bk[0:H, :]], axis=1),  # (H, 8H)
        'w1b': jnp.concatenate([w1f[H:2 * H, :], w1bk[H:2 * H, :]], axis=1),
        'b1':  jnp.concatenate([b1f, b1b], axis=1),                   # (1, 8H)
        'w1hh_f': h1f.astype(jnp.bfloat16),                           # (H, 4H) bf16
        'fc_w': raw['fc_w'],
        'fc_b': raw['fc_b'],
    }
    return packed, raw


# ----------------------------------------------------------------------------
# Pure-JAX reference (same math, f32, no Pallas) for a correctness check
# ----------------------------------------------------------------------------
def _ref_lstm_layer(x_tbd, wih, whh, b):
    T, B, _ = x_tbd.shape
    H = whh.shape[0]
    h = jnp.zeros((B, H), jnp.float32)
    c = jnp.zeros((B, H), jnp.float32)
    outs = []
    for t in range(T):
        gates = x_tbd[t] @ wih + h @ whh + b
        i = jax.nn.sigmoid(gates[:, 0 * H:1 * H])
        f = jax.nn.sigmoid(gates[:, 1 * H:2 * H])
        g = jnp.tanh(gates[:, 2 * H:3 * H])
        o = jax.nn.sigmoid(gates[:, 3 * H:4 * H])
        c = f * c + i * g
        h = o * jnp.tanh(c)
        outs.append(h)
    return jnp.stack(outs, axis=0)


def ref_forward(x, raw):
    layer_in = jnp.transpose(x, (1, 0, 2))
    for l in range(NUM_LAYERS):
        p = raw[f'layer{l}']
        out_f = _ref_lstm_layer(layer_in, *p['fwd'])
        out_b = _ref_lstm_layer(layer_in[::-1], *p['bwd'])[::-1]
        layer_in = jnp.concatenate([out_f, out_b], axis=-1)
    return layer_in[-1] @ raw['fc_w'] + raw['fc_b']


# ----------------------------------------------------------------------------
if __name__ == "__main__":
    key = jax.random.PRNGKey(0)
    key, xkey = jax.random.split(key)
    x = jax.random.normal(xkey, (BATCH, SEQ_LEN, INPUT_SIZE), jnp.float32)
    packed, raw = init_params(key)

    fwd = jax.jit(brnn_forward)
    logits = jax.block_until_ready(fwd(x, packed))
    assert logits.shape == (BATCH, NUM_CLASSES), logits.shape

    ref = jax.block_until_ready(ref_forward(x, raw))
    # Recurrent dots use bf16 MXU operands (f32 accumulation), so compare with a
    # tolerance appropriate for bf16 rather than exact-f32 parity.
    max_err = jnp.max(jnp.abs(logits - ref))
    assert jnp.allclose(logits, ref, rtol=2e-2, atol=2e-2), ("mismatch vs reference",
                                                             float(max_err))

    print("KERNEL_OK")
</pallas_src>

<mosaic_0001>
module attributes {stable_mosaic.version = 11 : i64} {
  func.func @_brnn_fused_kernel(%arg0: memref<64x28xf32, #tpu.memory_space<vmem>>, %arg1: memref<28x256xf32, #tpu.memory_space<vmem>>, %arg2: memref<1x256xf32, #tpu.memory_space<vmem>>, %arg3: memref<64x256xbf16, #tpu.memory_space<vmem>>, %arg4: memref<32x256xf32, #tpu.memory_space<vmem>>, %arg5: memref<32x256xf32, #tpu.memory_space<vmem>>, %arg6: memref<1x256xf32, #tpu.memory_space<vmem>>, %arg7: memref<32x128xbf16, #tpu.memory_space<vmem>>, %arg8: memref<64x10xf32, #tpu.memory_space<vmem>>, %arg9: memref<1x10xf32, #tpu.memory_space<vmem>>, %arg10: memref<8x10xf32, #tpu.memory_space<vmem>>, %arg11: memref<64x256xf32, #tpu.memory_space<vmem>>, %arg12: memref<64x32xf32, #tpu.memory_space<vmem>>, %arg13: memref<64x32xf32, #tpu.memory_space<vmem>>) attributes {dimension_semantics = [], scalar_prefetch = 0 : i64, scratch_operands = 3 : i64, tpu.core_type = #tpu.core_type<tc>} {
    %c0 = arith.constant 0 : index
    %c0_0 = arith.constant 0 : index
    %0 = vector.load %arg0[%c0, %c0_0] : memref<64x28xf32, #tpu.memory_space<vmem>>, vector<64x28xf32>
    %c0_1 = arith.constant 0 : index
    %c0_2 = arith.constant 0 : index
    %1 = vector.load %arg1[%c0_1, %c0_2] : memref<28x256xf32, #tpu.memory_space<vmem>>, vector<28x256xf32>
    %cst = arith.constant dense<0.000000e+00> : vector<64x256xf32>
    %2 = tpu.matmul %0, %1, %cst {dimension_numbers = #tpu.dot_dimension_numbers<[1], [0], [0], [1], [0, 0, 1, 1], [], []>} : vector<64x28xf32>, vector<28x256xf32>, vector<64x256xf32> -> vector<64x256xf32>
    %c0_3 = arith.constant 0 : index
    %c0_4 = arith.constant 0 : index
    %3 = vector.load %arg2[%c0_3, %c0_4] : memref<1x256xf32, #tpu.memory_space<vmem>>, vector<1x256xf32>
    %4 = vector.broadcast %3 : vector<1x256xf32> to vector<64x256xf32>
    %5 = arith.addf %2, %4 : vector<64x256xf32>
    %c0_5 = arith.constant 0 : index
    %c0_6 = arith.constant 0 : index
    %6 = vector.load %arg11[%c0_5, %c0_6] : memref<64x256xf32, #tpu.memory_space<vmem>>, vector<64x256xf32>
    tpu.vector_store %arg11[%c0_5, %c0_6], %5 {strides = array<i32>} : memref<64x256xf32, #tpu.memory_space<vmem>>, vector<64x256xf32>,
    %c0_7 = arith.constant 0 : index
    %c0_8 = arith.constant 0 : index
    %7 = vector.load %arg3[%c0_7, %c0_8] : memref<64x256xbf16, #tpu.memory_space<vmem>>, vector<64x256xbf16>
    %cst_9 = arith.constant 0.000000e+00 : f32
    %8 = vector.broadcast %cst_9 : f32 to vector<8x32xf32>
    %cst_10 = arith.constant 0.000000e+00 : f32
    %9 = vector.broadcast %cst_10 : f32 to vector<8x64xf32>
    %10 = arith.truncf %9 : vector<8x64xf32> to vector<8x64xbf16>
    %cst_11 = arith.constant dense<0.000000e+00> : vector<8x256xf32>
    %11 = tpu.matmul %10, %7, %cst_11 {dimension_numbers = #tpu.dot_dimension_numbers<[1], [0], [0], [1], [0, 0, 1, 1], [], []>} : vector<8x64xbf16>, vector<64x256xbf16>, vector<8x256xf32> -> vector<8x256xf32>
    %c0_12 = arith.constant 0 : index
    %c0_13 = arith.constant 0 : index
    %12 = vector.load %arg11[%c0_12, %c0_13] : memref<64x256xf32, #tpu.memory_space<vmem>>, vector<8x128xf32>
    %c56 = arith.constant 56 : index
    %c128 = arith.constant 128 : index
    %13 = vector.load %arg11[%c56, %c128] : memref<64x256xf32, #tpu.memory_space<vmem>>, vector<8x128xf32>
    %14 = tpu.concatenate %12, %13 in 1 : vector<8x128xf32>, vector<8x128xf32> -> vector<8x256xf32>
    %15 = arith.addf %14, %11 : vector<8x256xf32>
    %16 = arith.negf %15 : vector<8x256xf32>
    %17 = math.exp %16 : vector<8x256xf32>
    %cst_14 = arith.constant 1.000000e+00 : f32
    %18 = vector.broadcast %cst_14 : f32 to vector<8x256xf32>
    %19 = arith.addf %18, %17 : vector<8x256xf32>
    %20 = arith.divf %18, %19 : vector<8x256xf32>
    %21 = vector.extract_strided_slice %20 {offsets = [0, 32], sizes = [8, 32], strides = [1, 1]} : vector<8x256xf32> to vector<8x32xf32>
    %22 = arith.mulf %21, %8 : vector<8x32xf32>
    %23 = vector.extract_strided_slice %20 {offsets = [0, 0], sizes = [8, 32], strides = [1, 1]} : vector<8x256xf32> to vector<8x32xf32>
    %24 = vector.extract_strided_slice %15 {offsets = [0, 64], sizes = [8, 32], strides = [1, 1]} : vector<8x256xf32> to vector<8x32xf32>
    %25 = math.tanh %24 : vector<8x32xf32>
    %26 = arith.mulf %23, %25 : vector<8x32xf32>
    %27 = arith.addf %22, %26 : vector<8x32xf32>
    %28 = vector.extract_strided_slice %20 {offsets = [0, 96], sizes = [8, 32], strides = [1, 1]} : vector<8x256xf32> to vector<8x32xf32>
    %29 = math.tanh %27 : vector<8x32xf32>
    %30 = arith.mulf %28, %29 : vector<8x32xf32>
    %31 = vector.extract_strided_slice %20 {offsets = [0, 160], sizes = [8, 32], strides = [1, 1]} : vector<8x256xf32> to vector<8x32xf32>
    %32 = arith.mulf %31, %8 : vector<8x32xf32>
    %33 = vector.extract_strided_slice %20 {offsets = [0, 128], sizes = [8, 32], strides = [1, 1]} : vector<8x256xf32> to vector<8x32xf32>
    %34 = vector.extract_strided_slice %15 {offsets = [0, 192], sizes = [8, 32], strides = [1, 1]} : vector<8x256xf32> to vector<8x32xf32>
    %35 = math.tanh %34 : vector<8x32xf32>
    %36 = arith.mulf %33, %35 : vector<8x32xf32>
    %37 = arith.addf %32, %36 : vector<8x32xf32>
    %38 = vector.extract_strided_slice %20 {offsets = [0, 224], sizes = [8, 32], strides = [1, 1]} : vector<8x256xf32> to vector<8x32xf32>
    %39 = math.tanh %37 : vector<8x32xf32>
    %40 = arith.mulf %38, %39 : vector<8x32xf32>
    %41 = tpu.concatenate %30, %40 in 1 : vector<8x32xf32>, vector<8x32xf32> -> vector<8x64xf32>
    %c0_15 = arith.constant 0 : index
    %c0_16 = arith.constant 0 : index
    %42 = vector.load %arg12[%c0_15, %c0_16] : memref<64x32xf32, #tpu.memory_space<vmem>>, vector<8x32xf32>
    tpu.vector_store %arg12[%c0_15, %c0_16], %30 {strides = array<i32>} : memref<64x32xf32, #tpu.memory_space<vmem>>, vector<8x32xf32>,
    %c56_17 = arith.constant 56 : index
    %c0_18 = arith.constant 0 : index
    %43 = vector.load %arg13[%c56_17, %c0_18] : memref<64x32xf32, #tpu.memory_space<vmem>>, vector<8x32xf32>
    tpu.vector_store %arg13[%c56_17, %c0_18], %40 {strides = array<i32>} : memref<64x32xf32, #tpu.memory_space<vmem>>, vector<8x32xf32>,
    %44 = arith.truncf %41 : vector<8x64xf32> to vector<8x64xbf16>
    %cst_19 = arith.constant dense<0.000000e+00> : vector<8x256xf32>
    %45 = tpu.matmul %44, %7, %cst_19 {dimension_numbers = #tpu.dot_dimension_numbers<[1], [0], [0], [1], [0, 0, 1, 1], [], []>} : vector<8x64xbf16>, vector<64x256xbf16>, vector<8x256xf32> -> vector<8x256xf32>
    %c8 = arith.constant 8 : index
    %c0_20 = arith.constant 0 : index
    %46 = vector.load %arg11[%c8, %c0_20] : memref<64x256xf32, #tpu.memory_space<vmem>>, vector<8x128xf32>
    %c48 = arith.constant 48 : index
    %c128_21 = arith.constant 128 : index
    %47 = vector.load %arg11[%c48, %c128_21] : memref<64x256xf32, #tpu.memory_space<vmem>>, vector<8x128xf32>
    %48 = tpu.concatenate %46, %47 in 1 : vector<8x128xf32>, vector<8x128xf32> -> vector<8x256xf32>
    %49 = arith.addf %48, %45 : vector<8x256xf32>
    %50 = arith.negf %49 : vector<8x256xf32>
    %51 = math.exp %50 : vector<8x256xf32>
    %cst_22 = arith.constant 1.000000e+00 : f32
    %52 = vector.broadcast %cst_22 : f32 to vector<8x256xf32>
    %53 = arith.addf %52, %51 : vector<8x256xf32>
    %54 = arith.divf %52, %53 : vector<8x256xf32>
    %55 = vector.extract_strided_slice %54 {offsets = [0, 32], sizes = [8, 32], strides = [1, 1]} : vector<8x256xf32> to vector<8x32xf32>
    %56 = arith.mulf %55, %27 : vector<8x32xf32>
    %57 = vector.extract_strided_slice %54 {offsets = [0, 0], sizes = [8, 32], strides = [1, 1]} : vector<8x256xf32> to vector<8x32xf32>
    %58 = vector.extract_strided_slice %49 {offsets = [0, 64], sizes = [8, 32], strides = [1, 1]} : vector<8x256xf32> to vector<8x32xf32>
    %59 = math.tanh %58 : vector<8x32xf32>
    %60 = arith.mulf %57, %59 : vector<8x32xf32>
    %61 = arith.addf %56, %60 : vector<8x32xf32>
    %62 = vector.extract_strided_slice %54 {offsets = [0, 96], sizes = [8, 32], strides = [1, 1]} : vector<8x256xf32> to vector<8x32xf32>
    %63 = math.tanh %61 : vector<8x32xf32>
    %64 = arith.mulf %62, %63 : vector<8x32xf32>
    %65 = vector.extract_strided_slice %54 {offsets = [0, 160], sizes = [8, 32], strides = [1, 1]} : vector<8x256xf32> to vector<8x32xf32>
    %66 = arith.mulf %65, %37 : vector<8x32xf32>
    %67 = vector.extract_strided_slice %54 {offsets = [0, 128], sizes = [8, 32], strides = [1, 1]} : vector<8x256xf32> to vector<8x32xf32>
    %68 = vector.extract_strided_slice %49 {offsets = [0, 192], sizes = [8, 32], strides = [1, 1]} : vector<8x256xf32> to vector<8x32xf32>
    %69 = math.tanh %68 : vector<8x32xf32>
    %70 = arith.mulf %67, %69 : vector<8x32xf32>
    %71 = arith.addf %66, %70 : vector<8x32xf32>
    %72 = vector.extract_strided_slice %54 {offsets = [0, 224], sizes = [8, 32], strides = [1, 1]} : vector<8x256xf32> to vector<8x32xf32>
    %73 = math.tanh %71 : vector<8x32xf32>
    %74 = arith.mulf %72, %73 : vector<8x32xf32>
    %75 = tpu.concatenate %64, %74 in 1 : vector<8x32xf32>, vector<8x32xf32> -> vector<8x64xf32>
    %c8_23 = arith.constant 8 : index
    %c0_24 = arith.constant 0 : index
    %76 = vector.load %arg12[%c8_23, %c0_24] : memref<64x32xf32, #tpu.memory_space<vmem>>, vector<8x32xf32>
    tpu.vector_store %arg12[%c8_23, %c0_24], %64 {strides = array<i32>} : memref<64x32xf32, #tpu.memory_space<vmem>>, vector<8x32xf32>,
    %c48_25 = arith.constant 48 : index
    %c0_26 = arith.constant 0 : index
    %77 = vector.load %arg13[%c48_25, %c0_26] : memref<64x32xf32, #tpu.memory_space<vmem>>, vector<8x32xf32>
    tpu.vector_store %arg13[%c48_25, %c0_26], %74 {strides = array<i32>} : memref<64x32xf32, #tpu.memory_space<vmem>>, vector<8x32xf32>,
    %78 = arith.truncf %75 : vector<8x64xf32> to vector<8x64xbf16>
    %cst_27 = arith.constant dense<0.000000e+00> : vector<8x256xf32>
    %79 = tpu.matmul %78, %7, %cst_27 {dimension_numbers = #tpu.dot_dimension_numbers<[1], [0], [0], [1], [0, 0, 1, 1], [], []>} : vector<8x64xbf16>, vector<64x256xbf16>, vector<8x256xf32> -> vector<8x256xf32>
    %c16 = arith.constant 16 : index
    %c0_28 = arith.constant 0 : index
    %80 = vector.load %arg11[%c16, %c0_28] : memref<64x256xf32, #tpu.memory_space<vmem>>, vector<8x128xf32>
    %c40 = arith.constant 40 : index
    %c128_29 = arith.constant 128 : index
    %81 = vector.load %arg11[%c40, %c128_29] : memref<64x256xf32, #tpu.memory_space<vmem>>, vector<8x128xf32>
    %82 = tpu.concatenate %80, %81 in 1 : vector<8x128xf32>, vector<8x128xf32> -> vector<8x256xf32>
    %83 = arith.addf %82, %79 : vector<8x256xf32>
    %84 = arith.negf %83 : vector<8x256xf32>
    %85 = math.exp %84 : vector<8x256xf32>
    %cst_30 = arith.constant 1.000000e+00 : f32
    %86 = vector.broadcast %cst_30 : f32 to vector<8x256xf32>
    %87 = arith.addf %86, %85 : vector<8x256xf32>
    %88 = arith.divf %86, %87 : vector<8x256xf32>
    %89 = vector.extract_strided_slice %88 {offsets = [0, 32], sizes = [8, 32], strides = [1, 1]} : vector<8x256xf32> to vector<8x32xf32>
    %90 = arith.mulf %89, %61 : vector<8x32xf32>
    %91 = vector.extract_strided_slice %88 {offsets = [0, 0], sizes = [8, 32], strides = [1, 1]} : vector<8x256xf32> to vector<8x32xf32>
    %92 = vector.extract_strided_slice %83 {offsets = [0, 64], sizes = [8, 32], strides = [1, 1]} : vector<8x256xf32> to vector<8x32xf32>
    %93 = math.tanh %92 : vector<8x32xf32>
    %94 = arith.mulf %91, %93 : vector<8x32xf32>
    %95 = arith.addf %90, %94 : vector<8x32xf32>
    %96 = vector.extract_strided_slice %88 {offsets = [0, 96], sizes = [8, 32], strides = [1, 1]} : vector<8x256xf32> to vector<8x32xf32>
    %97 = math.tanh %95 : vector<8x32xf32>
    %98 = arith.mulf %96, %97 : vector<8x32xf32>
    %99 = vector.extract_strided_slice %88 {offsets = [0, 160], sizes = [8, 32], strides = [1, 1]} : vector<8x256xf32> to vector<8x32xf32>
    %100 = arith.mulf %99, %71 : vector<8x32xf32>
    %101 = vector.extract_strided_slice %88 {offsets = [0, 128], sizes = [8, 32], strides = [1, 1]} : vector<8x256xf32> to vector<8x32xf32>
    %102 = vector.extract_strided_slice %83 {offsets = [0, 192], sizes = [8, 32], strides = [1, 1]} : vector<8x256xf32> to vector<8x32xf32>
    %103 = math.tanh %102 : vector<8x32xf32>
    %104 = arith.mulf %101, %103 : vector<8x32xf32>
    %105 = arith.addf %100, %104 : vector<8x32xf32>
    %106 = vector.extract_strided_slice %88 {offsets = [0, 224], sizes = [8, 32], strides = [1, 1]} : vector<8x256xf32> to vector<8x32xf32>
    %107 = math.tanh %105 : vector<8x32xf32>
    %108 = arith.mulf %106, %107 : vector<8x32xf32>
    %109 = tpu.concatenate %98, %108 in 1 : vector<8x32xf32>, vector<8x32xf32> -> vector<8x64xf32>
    %c16_31 = arith.constant 16 : index
    %c0_32 = arith.constant 0 : index
    %110 = vector.load %arg12[%c16_31, %c0_32] : memref<64x32xf32, #tpu.memory_space<vmem>>, vector<8x32xf32>
    tpu.vector_store %arg12[%c16_31, %c0_32], %98 {strides = array<i32>} : memref<64x32xf32, #tpu.memory_space<vmem>>, vector<8x32xf32>,
    %c40_33 = arith.constant 40 : index
    %c0_34 = arith.constant 0 : index
    %111 = vector.load %arg13[%c40_33, %c0_34] : memref<64x32xf32, #tpu.memory_space<vmem>>, vector<8x32xf32>
    tpu.vector_store %arg13[%c40_33, %c0_34], %108 {strides = array<i32>} : memref<64x32xf32, #tpu.memory_space<vmem>>, vector<8x32xf32>,
    %112 = arith.truncf %109 : vector<8x64xf32> to vector<8x64xbf16>
    %cst_35 = arith.constant dense<0.000000e+00> : vector<8x256xf32>
    %113 = tpu.matmul %112, %7, %cst_35 {dimension_numbers = #tpu.dot_dimension_numbers<[1], [0], [0], [1], [0, 0, 1, 1], [], []>} : vector<8x64xbf16>, vector<64x256xbf16>, vector<8x256xf32> -> vector<8x256xf32>
    %c24 = arith.constant 24 : index
    %c0_36 = arith.constant 0 : index
    %114 = vector.load %arg11[%c24, %c0_36] : memref<64x256xf32, #tpu.memory_space<vmem>>, vector<8x128xf32>
    %c32 = arith.constant 32 : index
    %c128_37 = arith.constant 128 : index
    %115 = vector.load %arg11[%c32, %c128_37] : memref<64x256xf32, #tpu.memory_space<vmem>>, vector<8x128xf32>
    %116 = tpu.concatenate %114, %115 in 1 : vector<8x128xf32>, vector<8x128xf32> -> vector<8x256xf32>
    %117 = arith.addf %116, %113 : vector<8x256xf32>
    %118 = arith.negf %117 : vector<8x256xf32>
    %119 = math.exp %118 : vector<8x256xf32>
    %cst_38 = arith.constant 1.000000e+00 : f32
    %120 = vector.broadcast %cst_38 : f32 to vector<8x256xf32>
    %121 = arith.addf %120, %119 : vector<8x256xf32>
    %122 = arith.divf %120, %121 : vector<8x256xf32>
    %123 = vector.extract_strided_slice %122 {offsets = [0, 32], sizes = [8, 32], strides = [1, 1]} : vector<8x256xf32> to vector<8x32xf32>
    %124 = arith.mulf %123, %95 : vector<8x32xf32>
    %125 = vector.extract_strided_slice %122 {offsets = [0, 0], sizes = [8, 32], strides = [1, 1]} : vector<8x256xf32> to vector<8x32xf32>
    %126 = vector.extract_strided_slice %117 {offsets = [0, 64], sizes = [8, 32], strides = [1, 1]} : vector<8x256xf32> to vector<8x32xf32>
    %127 = math.tanh %126 : vector<8x32xf32>
    %128 = arith.mulf %125, %127 : vector<8x32xf32>
    %129 = arith.addf %124, %128 : vector<8x32xf32>
    %130 = vector.extract_strided_slice %122 {offsets = [0, 96], sizes = [8, 32], strides = [1, 1]} : vector<8x256xf32> to vector<8x32xf32>
    %131 = math.tanh %129 : vector<8x32xf32>
    %132 = arith.mulf %130, %131 : vector<8x32xf32>
    %133 = vector.extract_strided_slice %122 {offsets = [0, 160], sizes = [8, 32], strides = [1, 1]} : vector<8x256xf32> to vector<8x32xf32>
    %134 = arith.mulf %133, %105 : vector<8x32xf32>
    %135 = vector.extract_strided_slice %122 {offsets = [0, 128], sizes = [8, 32], strides = [1, 1]} : vector<8x256xf32> to vector<8x32xf32>
    %136 = vector.extract_strided_slice %117 {offsets = [0, 192], sizes = [8, 32], strides = [1, 1]} : vector<8x256xf32> to vector<8x32xf32>
    %137 = math.tanh %136 : vector<8x32xf32>
    %138 = arith.mulf %135, %137 : vector<8x32xf32>
    %139 = arith.addf %134, %138 : vector<8x32xf32>
    %140 = vector.extract_strided_slice %122 {offsets = [0, 224], sizes = [8, 32], strides = [1, 1]} : vector<8x256xf32> to vector<8x32xf32>
    %141 = math.tanh %139 : vector<8x32xf32>
    %142 = arith.mulf %140, %141 : vector<8x32xf32>
    %143 = tpu.concatenate %132, %142 in 1 : vector<8x32xf32>, vector<8x32xf32> -> vector<8x64xf32>
    %c24_39 = arith.constant 24 : index
    %c0_40 = arith.constant 0 : index
    %144 = vector.load %arg12[%c24_39, %c0_40] : memref<64x32xf32, #tpu.memory_space<vmem>>, vector<8x32xf32>
    tpu.vector_store %arg12[%c24_39, %c0_40], %132 {strides = array<i32>} : memref<64x32xf32, #tpu.memory_space<vmem>>, vector<8x32xf32>,
    %c32_41 = arith.constant 32 : index
    %c0_42 = arith.constant 0 : index
    %145 = vector.load %arg13[%c32_41, %c0_42] : memref<64x32xf32, #tpu.memory_space<vmem>>, vector<8x32xf32>
    tpu.vector_store %arg13[%c32_41, %c0_42], %142 {strides = array<i32>} : memref<64x32xf32, #tpu.memory_space<vmem>>, vector<8x32xf32>,
    %146 = arith.truncf %143 : vector<8x64xf32> to vector<8x64xbf16>
    %cst_43 = arith.constant dense<0.000000e+00> : vector<8x256xf32>
    %147 = tpu.matmul %146, %7, %cst_43 {dimension_numbers = #tpu.dot_dimension_numbers<[1], [0], [0], [1], [0, 0, 1, 1], [], []>} : vector<8x64xbf16>, vector<64x256xbf16>, vector<8x256xf32> -> vector<8x256xf32>
    %c32_44 = arith.constant 32 : index
    %c0_45 = arith.constant 0 : index
    %148 = vector.load %arg11[%c32_44, %c0_45] : memref<64x256xf32, #tpu.memory_space<vmem>>, vector<8x128xf32>
    %c24_46 = arith.constant 24 : index
    %c128_47 = arith.constant 128 : index
    %149 = vector.load %arg11[%c24_46, %c128_47] : memref<64x256xf32, #tpu.memory_space<vmem>>, vector<8x128xf32>
    %150 = tpu.concatenate %148, %149 in 1 : vector<8x128xf32>, vector<8x128xf32> -> vector<8x256xf32>
    %151 = arith.addf %150, %147 : vector<8x256xf32>
    %152 = arith.negf %151 : vector<8x256xf32>
    %153 = math.exp %152 : vector<8x256xf32>
    %cst_48 = arith.constant 1.000000e+00 : f32
    %154 = vector.broadcast %cst_48 : f32 to vector<8x256xf32>
    %155 = arith.addf %154, %153 : vector<8x256xf32>
    %156 = arith.divf %154, %155 : vector<8x256xf32>
    %157 = vector.extract_strided_slice %156 {offsets = [0, 32], sizes = [8, 32], strides = [1, 1]} : vector<8x256xf32> to vector<8x32xf32>
    %158 = arith.mulf %157, %129 : vector<8x32xf32>
    %159 = vector.extract_strided_slice %156 {offsets = [0, 0], sizes = [8, 32], strides = [1, 1]} : vector<8x256xf32> to vector<8x32xf32>
    %160 = vector.extract_strided_slice %151 {offsets = [0, 64], sizes = [8, 32], strides = [1, 1]} : vector<8x256xf32> to vector<8x32xf32>
    %161 = math.tanh %160 : vector<8x32xf32>
    %162 = arith.mulf %159, %161 : vector<8x32xf32>
    %163 = arith.addf %158, %162 : vector<8x32xf32>
    %164 = vector.extract_strided_slice %156 {offsets = [0, 96], sizes = [8, 32], strides = [1, 1]} : vector<8x256xf32> to vector<8x32xf32>
    %165 = math.tanh %163 : vector<8x32xf32>
    %166 = arith.mulf %164, %165 : vector<8x32xf32>
    %167 = vector.extract_strided_slice %156 {offsets = [0, 160], sizes = [8, 32], strides = [1, 1]} : vector<8x256xf32> to vector<8x32xf32>
    %168 = arith.mulf %167, %139 : vector<8x32xf32>
    %169 = vector.extract_strided_slice %156 {offsets = [0, 128], sizes = [8, 32], strides = [1, 1]} : vector<8x256xf32> to vector<8x32xf32>
    %170 = vector.extract_strided_slice %151 {offsets = [0, 192], sizes = [8, 32], strides = [1, 1]} : vector<8x256xf32> to vector<8x32xf32>
    %171 = math.tanh %170 : vector<8x32xf32>
    %172 = arith.mulf %169, %171 : vector<8x32xf32>
    %173 = arith.addf %168, %172 : vector<8x32xf32>
    %174 = vector.extract_strided_slice %156 {offsets = [0, 224], sizes = [8, 32], strides = [1, 1]} : vector<8x256xf32> to vector<8x32xf32>
    %175 = math.tanh %173 : vector<8x32xf32>
    %176 = arith.mulf %174, %175 : vector<8x32xf32>
    %177 = tpu.concatenate %166, %176 in 1 : vector<8x32xf32>, vector<8x32xf32> -> vector<8x64xf32>
    %c32_49 = arith.constant 32 : index
    %c0_50 = arith.constant 0 : index
    %178 = vector.load %arg12[%c32_49, %c0_50] : memref<64x32xf32, #tpu.memory_space<vmem>>, vector<8x32xf32>
    tpu.vector_store %arg12[%c32_49, %c0_50], %166 {strides = array<i32>} : memref<64x32xf32, #tpu.memory_space<vmem>>, vector<8x32xf32>,
    %c24_51 = arith.constant 24 : index
    %c0_52 = arith.constant 0 : index
    %179 = vector.load %arg13[%c24_51, %c0_52] : memref<64x32xf32, #tpu.memory_space<vmem>>, vector<8x32xf32>
    tpu.vector_store %arg13[%c24_51, %c0_52], %176 {strides = array<i32>} : memref<64x32xf32, #tpu.memory_space<vmem>>, vector<8x32xf32>,
    %180 = arith.truncf %177 : vector<8x64xf32> to vector<8x64xbf16>
    %cst_53 = arith.constant dense<0.000000e+00> : vector<8x256xf32>
    %181 = tpu.matmul %180, %7, %cst_53 {dimension_numbers = #tpu.dot_dimension_numbers<[1], [0], [0], [1], [0, 0, 1, 1], [], []>} : vector<8x64xbf16>, vector<64x256xbf16>, vector<8x256xf32> -> vector<8x256xf32>
    %c40_54 = arith.constant 40 : index
    %c0_55 = arith.constant 0 : index
    %182 = vector.load %arg11[%c40_54, %c0_55] : memref<64x256xf32, #tpu.memory_space<vmem>>, vector<8x128xf32>
    %c16_56 = arith.constant 16 : index
    %c128_57 = arith.constant 128 : index
    %183 = vector.load %arg11[%c16_56, %c128_57] : memref<64x256xf32, #tpu.memory_space<vmem>>, vector<8x128xf32>
    %184 = tpu.concatenate %182, %183 in 1 : vector<8x128xf32>, vector<8x128xf32> -> vector<8x256xf32>
    %185 = arith.addf %184, %181 : vector<8x256xf32>
    %186 = arith.negf %185 : vector<8x256xf32>
    %187 = math.exp %186 : vector<8x256xf32>
    %cst_58 = arith.constant 1.000000e+00 : f32
    %188 = vector.broadcast %cst_58 : f32 to vector<8x256xf32>
    %189 = arith.addf %188, %187 : vector<8x256xf32>
    %190 = arith.divf %188, %189 : vector<8x256xf32>
    %191 = vector.extract_strided_slice %190 {offsets = [0, 32], sizes = [8, 32], strides = [1, 1]} : vector<8x256xf32> to vector<8x32xf32>
    %192 = arith.mulf %191, %163 : vector<8x32xf32>
    %193 = vector.extract_strided_slice %190 {offsets = [0, 0], sizes = [8, 32], strides = [1, 1]} : vector<8x256xf32> to vector<8x32xf32>
    %194 = vector.extract_strided_slice %185 {offsets = [0, 64], sizes = [8, 32], strides = [1, 1]} : vector<8x256xf32> to vector<8x32xf32>
    %195 = math.tanh %194 : vector<8x32xf32>
    %196 = arith.mulf %193, %195 : vector<8x32xf32>
    %197 = arith.addf %192, %196 : vector<8x32xf32>
    %198 = vector.extract_strided_slice %190 {offsets = [0, 96], sizes = [8, 32], strides = [1, 1]} : vector<8x256xf32> to vector<8x32xf32>
    %199 = math.tanh %197 : vector<8x32xf32>
    %200 = arith.mulf %198, %199 : vector<8x32xf32>
    %201 = vector.extract_strided_slice %190 {offsets = [0, 160], sizes = [8, 32], strides = [1, 1]} : vector<8x256xf32> to vector<8x32xf32>
    %202 = arith.mulf %201, %173 : vector<8x32xf32>
    %203 = vector.extract_strided_slice %190 {offsets = [0, 128], sizes = [8, 32], strides = [1, 1]} : vector<8x256xf32> to vector<8x32xf32>
    %204 = vector.extract_strided_slice %185 {offsets = [0, 192], sizes = [8, 32], strides = [1, 1]} : vector<8x256xf32> to vector<8x32xf32>
    %205 = math.tanh %204 : vector<8x32xf32>
    %206 = arith.mulf %203, %205 : vector<8x32xf32>
    %207 = arith.addf %202, %206 : vector<8x32xf32>
    %208 = vector.extract_strided_slice %190 {offsets = [0, 224], sizes = [8, 32], strides = [1, 1]} : vector<8x256xf32> to vector<8x32xf32>
    %209 = math.tanh %207 : vector<8x32xf32>
    %210 = arith.mulf %208, %209 : vector<8x32xf32>
    %211 = tpu.concatenate %200, %210 in 1 : vector<8x32xf32>, vector<8x32xf32> -> vector<8x64xf32>
    %c40_59 = arith.constant 40 : index
    %c0_60 = arith.constant 0 : index
    %212 = vector.load %arg12[%c40_59, %c0_60] : memref<64x32xf32, #tpu.memory_space<vmem>>, vector<8x32xf32>
    tpu.vector_store %arg12[%c40_59, %c0_60], %200 {strides = array<i32>} : memref<64x32xf32, #tpu.memory_space<vmem>>, vector<8x32xf32>,
    %c16_61 = arith.constant 16 : index
    %c0_62 = arith.constant 0 : index
    %213 = vector.load %arg13[%c16_61, %c0_62] : memref<64x32xf32, #tpu.memory_space<vmem>>, vector<8x32xf32>
    tpu.vector_store %arg13[%c16_61, %c0_62], %210 {strides = array<i32>} : memref<64x32xf32, #tpu.memory_space<vmem>>, vector<8x32xf32>,
    %214 = arith.truncf %211 : vector<8x64xf32> to vector<8x64xbf16>
    %cst_63 = arith.constant dense<0.000000e+00> : vector<8x256xf32>
    %215 = tpu.matmul %214, %7, %cst_63 {dimension_numbers = #tpu.dot_dimension_numbers<[1], [0], [0], [1], [0, 0, 1, 1], [], []>} : vector<8x64xbf16>, vector<64x256xbf16>, vector<8x256xf32> -> vector<8x256xf32>
    %c48_64 = arith.constant 48 : index
    %c0_65 = arith.constant 0 : index
    %216 = vector.load %arg11[%c48_64, %c0_65] : memref<64x256xf32, #tpu.memory_space<vmem>>, vector<8x128xf32>
    %c8_66 = arith.constant 8 : index
    %c128_67 = arith.constant 128 : index
    %217 = vector.load %arg11[%c8_66, %c128_67] : memref<64x256xf32, #tpu.memory_space<vmem>>, vector<8x128xf32>
    %218 = tpu.concatenate %216, %217 in 1 : vector<8x128xf32>, vector<8x128xf32> -> vector<8x256xf32>
    %219 = arith.addf %218, %215 : vector<8x256xf32>
    %220 = arith.negf %219 : vector<8x256xf32>
    %221 = math.exp %220 : vector<8x256xf32>
    %cst_68 = arith.constant 1.000000e+00 : f32
    %222 = vector.broadcast %cst_68 : f32 to vector<8x256xf32>
    %223 = arith.addf %222, %221 : vector<8x256xf32>
    %224 = arith.divf %222, %223 : vector<8x256xf32>
    %225 = vector.extract_strided_slice %224 {offsets = [0, 32], sizes = [8, 32], strides = [1, 1]} : vector<8x256xf32> to vector<8x32xf32>
    %226 = arith.mulf %225, %197 : vector<8x32xf32>
    %227 = vector.extract_strided_slice %224 {offsets = [0, 0], sizes = [8, 32], strides = [1, 1]} : vector<8x256xf32> to vector<8x32xf32>
    %228 = vector.extract_strided_slice %219 {offsets = [0, 64], sizes = [8, 32], strides = [1, 1]} : vector<8x256xf32> to vector<8x32xf32>
    %229 = math.tanh %228 : vector<8x32xf32>
    %230 = arith.mulf %227, %229 : vector<8x32xf32>
    %231 = arith.addf %226, %230 : vector<8x32xf32>
    %232 = vector.extract_strided_slice %224 {offsets = [0, 96], sizes = [8, 32], strides = [1, 1]} : vector<8x256xf32> to vector<8x32xf32>
    %233 = math.tanh %231 : vector<8x32xf32>
    %234 = arith.mulf %232, %233 : vector<8x32xf32>
    %235 = vector.extract_strided_slice %224 {offsets = [0, 160], sizes = [8, 32], strides = [1, 1]} : vector<8x256xf32> to vector<8x32xf32>
    %236 = arith.mulf %235, %207 : vector<8x32xf32>
    %237 = vector.extract_strided_slice %224 {offsets = [0, 128], sizes = [8, 32], strides = [1, 1]} : vector<8x256xf32> to vector<8x32xf32>
    %238 = vector.extract_strided_slice %219 {offsets = [0, 192], sizes = [8, 32], strides = [1, 1]} : vector<8x256xf32> to vector<8x32xf32>
    %239 = math.tanh %238 : vector<8x32xf32>
    %240 = arith.mulf %237, %239 : vector<8x32xf32>
    %241 = arith.addf %236, %240 : vector<8x32xf32>
    %242 = vector.extract_strided_slice %224 {offsets = [0, 224], sizes = [8, 32], strides = [1, 1]} : vector<8x256xf32> to vector<8x32xf32>
    %243 = math.tanh %241 : vector<8x32xf32>
    %244 = arith.mulf %242, %243 : vector<8x32xf32>
    %245 = tpu.concatenate %234, %244 in 1 : vector<8x32xf32>, vector<8x32xf32> -> vector<8x64xf32>
    %c48_69 = arith.constant 48 : index
    %c0_70 = arith.constant 0 : index
    %246 = vector.load %arg12[%c48_69, %c0_70] : memref<64x32xf32, #tpu.memory_space<vmem>>, vector<8x32xf32>
    tpu.vector_store %arg12[%c48_69, %c0_70], %234 {strides = array<i32>} : memref<64x32xf32, #tpu.memory_space<vmem>>, vector<8x32xf32>,
    %c8_71 = arith.constant 8 : index
    %c0_72 = arith.constant 0 : index
    %247 = vector.load %arg13[%c8_71, %c0_72] : memref<64x32xf32, #tpu.memory_space<vmem>>, vector<8x32xf32>
    tpu.vector_store %arg13[%c8_71, %c0_72], %244 {strides = array<i32>} : memref<64x32xf32, #tpu.memory_space<vmem>>, vector<8x32xf32>,
    %248 = arith.truncf %245 : vector<8x64xf32> to vector<8x64xbf16>
    %cst_73 = arith.constant dense<0.000000e+00> : vector<8x256xf32>
    %249 = tpu.matmul %248, %7, %cst_73 {dimension_numbers = #tpu.dot_dimension_numbers<[1], [0], [0], [1], [0, 0, 1, 1], [], []>} : vector<8x64xbf16>, vector<64x256xbf16>, vector<8x256xf32> -> vector<8x256xf32>
    %c56_74 = arith.constant 56 : index
    %c0_75 = arith.constant 0 : index
    %250 = vector.load %arg11[%c56_74, %c0_75] : memref<64x256xf32, #tpu.memory_space<vmem>>, vector<8x128xf32>
    %c0_76 = arith.constant 0 : index
    %c128_77 = arith.constant 128 : index
    %251 = vector.load %arg11[%c0_76, %c128_77] : memref<64x256xf32, #tpu.memory_space<vmem>>, vector<8x128xf32>
    %252 = tpu.concatenate %250, %251 in 1 : vector<8x128xf32>, vector<8x128xf32> -> vector<8x256xf32>
    %253 = arith.addf %252, %249 : vector<8x256xf32>
    %254 = arith.negf %253 : vector<8x256xf32>
    %255 = math.exp %254 : vector<8x256xf32>
    %cst_78 = arith.constant 1.000000e+00 : f32
    %256 = vector.broadcast %cst_78 : f32 to vector<8x256xf32>
    %257 = arith.addf %256, %255 : vector<8x256xf32>
    %258 = arith.divf %256, %257 : vector<8x256xf32>
    %259 = vector.extract_strided_slice %258 {offsets = [0, 32], sizes = [8, 32], strides = [1, 1]} : vector<8x256xf32> to vector<8x32xf32>
    %260 = arith.mulf %259, %231 : vector<8x32xf32>
    %261 = vector.extract_strided_slice %258 {offsets = [0, 0], sizes = [8, 32], strides = [1, 1]} : vector<8x256xf32> to vector<8x32xf32>
    %262 = vector.extract_strided_slice %253 {offsets = [0, 64], sizes = [8, 32], strides = [1, 1]} : vector<8x256xf32> to vector<8x32xf32>
    %263 = math.tanh %262 : vector<8x32xf32>
    %264 = arith.mulf %261, %263 : vector<8x32xf32>
    %265 = arith.addf %260, %264 : vector<8x32xf32>
    %266 = vector.extract_strided_slice %258 {offsets = [0, 96], sizes = [8, 32], strides = [1, 1]} : vector<8x256xf32> to vector<8x32xf32>
    %267 = math.tanh %265 : vector<8x32xf32>
    %268 = arith.mulf %266, %267 : vector<8x32xf32>
    %269 = vector.extract_strided_slice %258 {offsets = [0, 160], sizes = [8, 32], strides = [1, 1]} : vector<8x256xf32> to vector<8x32xf32>
    %270 = arith.mulf %269, %241 : vector<8x32xf32>
    %271 = vector.extract_strided_slice %258 {offsets = [0, 128], sizes = [8, 32], strides = [1, 1]} : vector<8x256xf32> to vector<8x32xf32>
    %272 = vector.extract_strided_slice %253 {offsets = [0, 192], sizes = [8, 32], strides = [1, 1]} : vector<8x256xf32> to vector<8x32xf32>
    %273 = math.tanh %272 : vector<8x32xf32>
    %274 = arith.mulf %271, %273 : vector<8x32xf32>
    %275 = arith.addf %270, %274 : vector<8x32xf32>
    %276 = vector.extract_strided_slice %258 {offsets = [0, 224], sizes = [8, 32], strides = [1, 1]} : vector<8x256xf32> to vector<8x32xf32>
    %277 = math.tanh %275 : vector<8x32xf32>
    %278 = arith.mulf %276, %277 : vector<8x32xf32>
    %c56_79 = arith.constant 56 : index
    %c0_80 = arith.constant 0 : index
    %279 = vector.load %arg12[%c56_79, %c0_80] : memref<64x32xf32, #tpu.memory_space<vmem>>, vector<8x32xf32>
    tpu.vector_store %arg12[%c56_79, %c0_80], %268 {strides = array<i32>} : memref<64x32xf32, #tpu.memory_space<vmem>>, vector<8x32xf32>,
    %c0_81 = arith.constant 0 : index
    %c0_82 = arith.constant 0 : index
    %280 = vector.load %arg13[%c0_81, %c0_82] : memref<64x32xf32, #tpu.memory_space<vmem>>, vector<8x32xf32>
    tpu.vector_store %arg13[%c0_81, %c0_82], %278 {strides = array<i32>} : memref<64x32xf32, #tpu.memory_space<vmem>>, vector<8x32xf32>,
    %c0_83 = arith.constant 0 : index
    %c0_84 = arith.constant 0 : index
    %281 = vector.load %arg12[%c0_83, %c0_84] : memref<64x32xf32, #tpu.memory_space<vmem>>, vector<64x32xf32>
    %c0_85 = arith.constant 0 : index
    %c0_86 = arith.constant 0 : index
    %282 = vector.load %arg4[%c0_85, %c0_86] : memref<32x256xf32, #tpu.memory_space<vmem>>, vector<32x256xf32>
    %cst_87 = arith.constant dense<0.000000e+00> : vector<64x256xf32>
    %283 = tpu.matmul %281, %282, %cst_87 {dimension_numbers = #tpu.dot_dimension_numbers<[1], [0], [0], [1], [0, 0, 1, 1], [], []>} : vector<64x32xf32>, vector<32x256xf32>, vector<64x256xf32> -> vector<64x256xf32>
    %c0_88 = arith.constant 0 : index
    %c0_89 = arith.constant 0 : index
    %284 = vector.load %arg13[%c0_88, %c0_89] : memref<64x32xf32, #tpu.memory_space<vmem>>, vector<64x32xf32>
    %c0_90 = arith.constant 0 : index
    %c0_91 = arith.constant 0 : index
    %285 = vector.load %arg5[%c0_90, %c0_91] : memref<32x256xf32, #tpu.memory_space<vmem>>, vector<32x256xf32>
    %cst_92 = arith.constant dense<0.000000e+00> : vector<64x256xf32>
    %286 = tpu.matmul %284, %285, %cst_92 {dimension_numbers = #tpu.dot_dimension_numbers<[1], [0], [0], [1], [0, 0, 1, 1], [], []>} : vector<64x32xf32>, vector<32x256xf32>, vector<64x256xf32> -> vector<64x256xf32>
    %287 = arith.addf %283, %286 : vector<64x256xf32>
    %c0_93 = arith.constant 0 : index
    %c0_94 = arith.constant 0 : index
    %288 = vector.load %arg6[%c0_93, %c0_94] : memref<1x256xf32, #tpu.memory_space<vmem>>, vector<1x256xf32>
    %289 = vector.broadcast %288 : vector<1x256xf32> to vector<64x256xf32>
    %290 = arith.addf %287, %289 : vector<64x256xf32>
    %c0_95 = arith.constant 0 : index
    %c0_96 = arith.constant 0 : index
    %291 = vector.load %arg11[%c0_95, %c0_96] : memref<64x256xf32, #tpu.memory_space<vmem>>, vector<64x256xf32>
    tpu.vector_store %arg11[%c0_95, %c0_96], %290 {strides = array<i32>} : memref<64x256xf32, #tpu.memory_space<vmem>>, vector<64x256xf32>,
    %c0_97 = arith.constant 0 : index
    %c0_98 = arith.constant 0 : index
    %292 = vector.load %arg7[%c0_97, %c0_98] : memref<32x128xbf16, #tpu.memory_space<vmem>>, vector<32x128xbf16>
    %c0_99 = arith.constant 0 : index
    %c0_100 = arith.constant 0 : index
    %293 = vector.load %arg11[%c0_99, %c0_100] : memref<64x256xf32, #tpu.memory_space<vmem>>, vector<8x128xf32>
    %294 = arith.truncf %8 : vector<8x32xf32> to vector<8x32xbf16>
    %cst_101 = arith.constant dense<0.000000e+00> : vector<8x128xf32>
    %295 = tpu.matmul %294, %292, %cst_101 {dimension_numbers = #tpu.dot_dimension_numbers<[1], [0], [0], [1], [0, 0, 1, 1], [], []>} : vector<8x32xbf16>, vector<32x128xbf16>, vector<8x128xf32> -> vector<8x128xf32>
    %296 = arith.addf %293, %295 : vector<8x128xf32>
    %297 = arith.negf %296 : vector<8x128xf32>
    %298 = math.exp %297 : vector<8x128xf32>
    %cst_102 = arith.constant 1.000000e+00 : f32
    %299 = vector.broadcast %cst_102 : f32 to vector<8x128xf32>
    %300 = arith.addf %299, %298 : vector<8x128xf32>
    %301 = arith.divf %299, %300 : vector<8x128xf32>
    %302 = vector.extract_strided_slice %301 {offsets = [0, 32], sizes = [8, 32], strides = [1, 1]} : vector<8x128xf32> to vector<8x32xf32>
    %303 = arith.mulf %302, %8 : vector<8x32xf32>
    %304 = vector.extract_strided_slice %301 {offsets = [0, 0], sizes = [8, 32], strides = [1, 1]} : vector<8x128xf32> to vector<8x32xf32>
    %305 = vector.extract_strided_slice %296 {offsets = [0, 64], sizes = [8, 32], strides = [1, 1]} : vector<8x128xf32> to vector<8x32xf32>
    %306 = math.tanh %305 : vector<8x32xf32>
    %307 = arith.mulf %304, %306 : vector<8x32xf32>
    %308 = arith.addf %303, %307 : vector<8x32xf32>
    %309 = vector.extract_strided_slice %301 {offsets = [0, 96], sizes = [8, 32], strides = [1, 1]} : vector<8x128xf32> to vector<8x32xf32>
    %310 = math.tanh %308 : vector<8x32xf32>
    %311 = arith.mulf %309, %310 : vector<8x32xf32>
    %c8_103 = arith.constant 8 : index
    %c0_104 = arith.constant 0 : index
    %312 = vector.load %arg11[%c8_103, %c0_104] : memref<64x256xf32, #tpu.memory_space<vmem>>, vector<8x128xf32>
    %313 = arith.truncf %311 : vector<8x32xf32> to vector<8x32xbf16>
    %cst_105 = arith.constant dense<0.000000e+00> : vector<8x128xf32>
    %314 = tpu.matmul %313, %292, %cst_105 {dimension_numbers = #tpu.dot_dimension_numbers<[1], [0], [0], [1], [0, 0, 1, 1], [], []>} : vector<8x32xbf16>, vector<32x128xbf16>, vector<8x128xf32> -> vector<8x128xf32>
    %315 = arith.addf %312, %314 : vector<8x128xf32>
    %316 = arith.negf %315 : vector<8x128xf32>
    %317 = math.exp %316 : vector<8x128xf32>
    %cst_106 = arith.constant 1.000000e+00 : f32
    %318 = vector.broadcast %cst_106 : f32 to vector<8x128xf32>
    %319 = arith.addf %318, %317 : vector<8x128xf32>
    %320 = arith.divf %318, %319 : vector<8x128xf32>
    %321 = vector.extract_strided_slice %320 {offsets = [0, 32], sizes = [8, 32], strides = [1, 1]} : vector<8x128xf32> to vector<8x32xf32>
    %322 = arith.mulf %321, %308 : vector<8x32xf32>
    %323 = vector.extract_strided_slice %320 {offsets = [0, 0], sizes = [8, 32], strides = [1, 1]} : vector<8x128xf32> to vector<8x32xf32>
    %324 = vector.extract_strided_slice %315 {offsets = [0, 64], sizes = [8, 32], strides = [1, 1]} : vector<8x128xf32> to vector<8x32xf32>
    %325 = math.tanh %324 : vector<8x32xf32>
    %326 = arith.mulf %323, %325 : vector<8x32xf32>
    %327 = arith.addf %322, %326 : vector<8x32xf32>
    %328 = vector.extract_strided_slice %320 {offsets = [0, 96], sizes = [8, 32], strides = [1, 1]} : vector<8x128xf32> to vector<8x32xf32>
    %329 = math.tanh %327 : vector<8x32xf32>
    %330 = arith.mulf %328, %329 : vector<8x32xf32>
    %c16_107 = arith.constant 16 : index
    %c0_108 = arith.constant 0 : index
    %331 = vector.load %arg11[%c16_107, %c0_108] : memref<64x256xf32, #tpu.memory_space<vmem>>, vector<8x128xf32>
    %332 = arith.truncf %330 : vector<8x32xf32> to vector<8x32xbf16>
    %cst_109 = arith.constant dense<0.000000e+00> : vector<8x128xf32>
    %333 = tpu.matmul %332, %292, %cst_109 {dimension_numbers = #tpu.dot_dimension_numbers<[1], [0], [0], [1], [0, 0, 1, 1], [], []>} : vector<8x32xbf16>, vector<32x128xbf16>, vector<8x128xf32> -> vector<8x128xf32>
    %334 = arith.addf %331, %333 : vector<8x128xf32>
    %335 = arith.negf %334 : vector<8x128xf32>
    %336 = math.exp %335 : vector<8x128xf32>
    %cst_110 = arith.constant 1.000000e+00 : f32
    %337 = vector.broadcast %cst_110 : f32 to vector<8x128xf32>
    %338 = arith.addf %337, %336 : vector<8x128xf32>
    %339 = arith.divf %337, %338 : vector<8x128xf32>
    %340 = vector.extract_strided_slice %339 {offsets = [0, 32], sizes = [8, 32], strides = [1, 1]} : vector<8x128xf32> to vector<8x32xf32>
    %341 = arith.mulf %340, %327 : vector<8x32xf32>
    %342 = vector.extract_strided_slice %339 {offsets = [0, 0], sizes = [8, 32], strides = [1, 1]} : vector<8x128xf32> to vector<8x32xf32>
    %343 = vector.extract_strided_slice %334 {offsets = [0, 64], sizes = [8, 32], strides = [1, 1]} : vector<8x128xf32> to vector<8x32xf32>
    %344 = math.tanh %343 : vector<8x32xf32>
    %345 = arith.mulf %342, %344 : vector<8x32xf32>
    %346 = arith.addf %341, %345 : vector<8x32xf32>
    %347 = vector.extract_strided_slice %339 {offsets = [0, 96], sizes = [8, 32], strides = [1, 1]} : vector<8x128xf32> to vector<8x32xf32>
    %348 = math.tanh %346 : vector<8x32xf32>
    %349 = arith.mulf %347, %348 : vector<8x32xf32>
    %c24_111 = arith.constant 24 : index
    %c0_112 = arith.constant 0 : index
    %350 = vector.load %arg11[%c24_111, %c0_112] : memref<64x256xf32, #tpu.memory_space<vmem>>, vector<8x128xf32>
    %351 = arith.truncf %349 : vector<8x32xf32> to vector<8x32xbf16>
    %cst_113 = arith.constant dense<0.000000e+00> : vector<8x128xf32>
    %352 = tpu.matmul %351, %292, %cst_113 {dimension_numbers = #tpu.dot_dimension_numbers<[1], [0], [0], [1], [0, 0, 1, 1], [], []>} : vector<8x32xbf16>, vector<32x128xbf16>, vector<8x128xf32> -> vector<8x128xf32>
    %353 = arith.addf %350, %352 : vector<8x128xf32>
    %354 = arith.negf %353 : vector<8x128xf32>
    %355 = math.exp %354 : vector<8x128xf32>
    %cst_114 = arith.constant 1.000000e+00 : f32
    %356 = vector.broadcast %cst_114 : f32 to vector<8x128xf32>
    %357 = arith.addf %356, %355 : vector<8x128xf32>
    %358 = arith.divf %356, %357 : vector<8x128xf32>
    %359 = vector.extract_strided_slice %358 {offsets = [0, 32], sizes = [8, 32], strides = [1, 1]} : vector<8x128xf32> to vector<8x32xf32>
    %360 = arith.mulf %359, %346 : vector<8x32xf32>
    %361 = vector.extract_strided_slice %358 {offsets = [0, 0], sizes = [8, 32], strides = [1, 1]} : vector<8x128xf32> to vector<8x32xf32>
    %362 = vector.extract_strided_slice %353 {offsets = [0, 64], sizes = [8, 32], strides = [1, 1]} : vector<8x128xf32> to vector<8x32xf32>
    %363 = math.tanh %362 : vector<8x32xf32>
    %364 = arith.mulf %361, %363 : vector<8x32xf32>
    %365 = arith.addf %360, %364 : vector<8x32xf32>
    %366 = vector.extract_strided_slice %358 {offsets = [0, 96], sizes = [8, 32], strides = [1, 1]} : vector<8x128xf32> to vector<8x32xf32>
    %367 = math.tanh %365 : vector<8x32xf32>
    %368 = arith.mulf %366, %367 : vector<8x32xf32>
    %c32_115 = arith.constant 32 : index
    %c0_116 = arith.constant 0 : index
    %369 = vector.load %arg11[%c32_115, %c0_116] : memref<64x256xf32, #tpu.memory_space<vmem>>, vector<8x128xf32>
    %370 = arith.truncf %368 : vector<8x32xf32> to vector<8x32xbf16>
    %cst_117 = arith.constant dense<0.000000e+00> : vector<8x128xf32>
    %371 = tpu.matmul %370, %292, %cst_117 {dimension_numbers = #tpu.dot_dimension_numbers<[1], [0], [0], [1], [0, 0, 1, 1], [], []>} : vector<8x32xbf16>, vector<32x128xbf16>, vector<8x128xf32> -> vector<8x128xf32>
    %372 = arith.addf %369, %371 : vector<8x128xf32>
    %373 = arith.negf %372 : vector<8x128xf32>
    %374 = math.exp %373 : vector<8x128xf32>
    %cst_118 = arith.constant 1.000000e+00 : f32
    %375 = vector.broadcast %cst_118 : f32 to vector<8x128xf32>
    %376 = arith.addf %375, %374 : vector<8x128xf32>
    %377 = arith.divf %375, %376 : vector<8x128xf32>
    %378 = vector.extract_strided_slice %377 {offsets = [0, 32], sizes = [8, 32], strides = [1, 1]} : vector<8x128xf32> to vector<8x32xf32>
    %379 = arith.mulf %378, %365 : vector<8x32xf32>
    %380 = vector.extract_strided_slice %377 {offsets = [0, 0], sizes = [8, 32], strides = [1, 1]} : vector<8x128xf32> to vector<8x32xf32>
    %381 = vector.extract_strided_slice %372 {offsets = [0, 64], sizes = [8, 32], strides = [1, 1]} : vector<8x128xf32> to vector<8x32xf32>
    %382 = math.tanh %381 : vector<8x32xf32>
    %383 = arith.mulf %380, %382 : vector<8x32xf32>
    %384 = arith.addf %379, %383 : vector<8x32xf32>
    %385 = vector.extract_strided_slice %377 {offsets = [0, 96], sizes = [8, 32], strides = [1, 1]} : vector<8x128xf32> to vector<8x32xf32>
    %386 = math.tanh %384 : vector<8x32xf32>
    %387 = arith.mulf %385, %386 : vector<8x32xf32>
    %c40_119 = arith.constant 40 : index
    %c0_120 = arith.constant 0 : index
    %388 = vector.load %arg11[%c40_119, %c0_120] : memref<64x256xf32, #tpu.memory_space<vmem>>, vector<8x128xf32>
    %389 = arith.truncf %387 : vector<8x32xf32> to vector<8x32xbf16>
    %cst_121 = arith.constant dense<0.000000e+00> : vector<8x128xf32>
    %390 = tpu.matmul %389, %292, %cst_121 {dimension_numbers = #tpu.dot_dimension_numbers<[1], [0], [0], [1], [0, 0, 1, 1], [], []>} : vector<8x32xbf16>, vector<32x128xbf16>, vector<8x128xf32> -> vector<8x128xf32>
    %391 = arith.addf %388, %390 : vector<8x128xf32>
    %392 = arith.negf %391 : vector<8x128xf32>
    %393 = math.exp %392 : vector<8x128xf32>
    %cst_122 = arith.constant 1.000000e+00 : f32
    %394 = vector.broadcast %cst_122 : f32 to vector<8x128xf32>
    %395 = arith.addf %394, %393 : vector<8x128xf32>
    %396 = arith.divf %394, %395 : vector<8x128xf32>
    %397 = vector.extract_strided_slice %396 {offsets = [0, 32], sizes = [8, 32], strides = [1, 1]} : vector<8x128xf32> to vector<8x32xf32>
    %398 = arith.mulf %397, %384 : vector<8x32xf32>
    %399 = vector.extract_strided_slice %396 {offsets = [0, 0], sizes = [8, 32], strides = [1, 1]} : vector<8x128xf32> to vector<8x32xf32>
    %400 = vector.extract_strided_slice %391 {offsets = [0, 64], sizes = [8, 32], strides = [1, 1]} : vector<8x128xf32> to vector<8x32xf32>
    %401 = math.tanh %400 : vector<8x32xf32>
    %402 = arith.mulf %399, %401 : vector<8x32xf32>
    %403 = arith.addf %398, %402 : vector<8x32xf32>
    %404 = vector.extract_strided_slice %396 {offsets = [0, 96], sizes = [8, 32], strides = [1, 1]} : vector<8x128xf32> to vector<8x32xf32>
    %405 = math.tanh %403 : vector<8x32xf32>
    %406 = arith.mulf %404, %405 : vector<8x32xf32>
    %c48_123 = arith.constant 48 : index
    %c0_124 = arith.constant 0 : index
    %407 = vector.load %arg11[%c48_123, %c0_124] : memref<64x256xf32, #tpu.memory_space<vmem>>, vector<8x128xf32>
    %408 = arith.truncf %406 : vector<8x32xf32> to vector<8x32xbf16>
    %cst_125 = arith.constant dense<0.000000e+00> : vector<8x128xf32>
    %409 = tpu.matmul %408, %292, %cst_125 {dimension_numbers = #tpu.dot_dimension_numbers<[1], [0], [0], [1], [0, 0, 1, 1], [], []>} : vector<8x32xbf16>, vector<32x128xbf16>, vector<8x128xf32> -> vector<8x128xf32>
    %410 = arith.addf %407, %409 : vector<8x128xf32>
    %411 = arith.negf %410 : vector<8x128xf32>
    %412 = math.exp %411 : vector<8x128xf32>
    %cst_126 = arith.constant 1.000000e+00 : f32
    %413 = vector.broadcast %cst_126 : f32 to vector<8x128xf32>
    %414 = arith.addf %413, %412 : vector<8x128xf32>
    %415 = arith.divf %413, %414 : vector<8x128xf32>
    %416 = vector.extract_strided_slice %415 {offsets = [0, 32], sizes = [8, 32], strides = [1, 1]} : vector<8x128xf32> to vector<8x32xf32>
    %417 = arith.mulf %416, %403 : vector<8x32xf32>
    %418 = vector.extract_strided_slice %415 {offsets = [0, 0], sizes = [8, 32], strides = [1, 1]} : vector<8x128xf32> to vector<8x32xf32>
    %419 = vector.extract_strided_slice %410 {offsets = [0, 64], sizes = [8, 32], strides = [1, 1]} : vector<8x128xf32> to vector<8x32xf32>
    %420 = math.tanh %419 : vector<8x32xf32>
    %421 = arith.mulf %418, %420 : vector<8x32xf32>
    %422 = arith.addf %417, %421 : vector<8x32xf32>
    %423 = vector.extract_strided_slice %415 {offsets = [0, 96], sizes = [8, 32], strides = [1, 1]} : vector<8x128xf32> to vector<8x32xf32>
    %424 = math.tanh %422 : vector<8x32xf32>
    %425 = arith.mulf %423, %424 : vector<8x32xf32>
    %c56_127 = arith.constant 56 : index
    %c0_128 = arith.constant 0 : index
    %426 = vector.load %arg11[%c56_127, %c0_128] : memref<64x256xf32, #tpu.memory_space<vmem>>, vector<8x128xf32>
    %427 = arith.truncf %425 : vector<8x32xf32> to vector<8x32xbf16>
    %cst_129 = arith.constant dense<0.000000e+00> : vector<8x128xf32>
    %428 = tpu.matmul %427, %292, %cst_129 {dimension_numbers = #tpu.dot_dimension_numbers<[1], [0], [0], [1], [0, 0, 1, 1], [], []>} : vector<8x32xbf16>, vector<32x128xbf16>, vector<8x128xf32> -> vector<8x128xf32>
    %429 = arith.addf %426, %428 : vector<8x128xf32>
    %430 = arith.negf %429 : vector<8x128xf32>
    %431 = math.exp %430 : vector<8x128xf32>
    %cst_130 = arith.constant 1.000000e+00 : f32
    %432 = vector.broadcast %cst_130 : f32 to vector<8x128xf32>
    %433 = arith.addf %432, %431 : vector<8x128xf32>
    %434 = arith.divf %432, %433 : vector<8x128xf32>
    %435 = vector.extract_strided_slice %434 {offsets = [0, 32], sizes = [8, 32], strides = [1, 1]} : vector<8x128xf32> to vector<8x32xf32>
    %436 = arith.mulf %435, %422 : vector<8x32xf32>
    %437 = vector.extract_strided_slice %434 {offsets = [0, 0], sizes = [8, 32], strides = [1, 1]} : vector<8x128xf32> to vector<8x32xf32>
    %438 = vector.extract_strided_slice %429 {offsets = [0, 64], sizes = [8, 32], strides = [1, 1]} : vector<8x128xf32> to vector<8x32xf32>
    %439 = math.tanh %438 : vector<8x32xf32>
    %440 = arith.mulf %437, %439 : vector<8x32xf32>
    %441 = arith.addf %436, %440 : vector<8x32xf32>
    %442 = vector.extract_strided_slice %434 {offsets = [0, 96], sizes = [8, 32], strides = [1, 1]} : vector<8x128xf32> to vector<8x32xf32>
    %443 = math.tanh %441 : vector<8x32xf32>
    %444 = arith.mulf %442, %443 : vector<8x32xf32>
    %c56_131 = arith.constant 56 : index
    %c128_132 = arith.constant 128 : index
    %445 = vector.load %arg11[%c56_131, %c128_132] : memref<64x256xf32, #tpu.memory_space<vmem>>, vector<8x128xf32>
    %446 = arith.negf %445 : vector<8x128xf32>
    %447 = math.exp %446 : vector<8x128xf32>
    %cst_133 = arith.constant 1.000000e+00 : f32
    %448 = vector.broadcast %cst_133 : f32 to vector<8x128xf32>
    %449 = arith.addf %448, %447 : vector<8x128xf32>
    %450 = arith.divf %448, %449 : vector<8x128xf32>
    %451 = vector.extract_strided_slice %450 {offsets = [0, 0], sizes = [8, 32], strides = [1, 1]} : vector<8x128xf32> to vector<8x32xf32>
    %452 = vector.extract_strided_slice %445 {offsets = [0, 64], sizes = [8, 32], strides = [1, 1]} : vector<8x128xf32> to vector<8x32xf32>
    %453 = math.tanh %452 : vector<8x32xf32>
    %454 = arith.mulf %451, %453 : vector<8x32xf32>
    %455 = vector.extract_strided_slice %450 {offsets = [0, 96], sizes = [8, 32], strides = [1, 1]} : vector<8x128xf32> to vector<8x32xf32>
    %456 = math.tanh %454 : vector<8x32xf32>
    %457 = arith.mulf %455, %456 : vector<8x32xf32>
    %c0_134 = arith.constant 0 : index
    %c0_135 = arith.constant 0 : index
    %458 = vector.load %arg8[%c0_134, %c0_135] : memref<64x10xf32, #tpu.memory_space<vmem>>, vector<32x10xf32>
    %cst_136 = arith.constant dense<0.000000e+00> : vector<8x10xf32>
    %459 = tpu.matmul %444, %458, %cst_136 {dimension_numbers = #tpu.dot_dimension_numbers<[1], [0], [0], [1], [0, 0, 1, 1], [], []>} : vector<8x32xf32>, vector<32x10xf32>, vector<8x10xf32> -> vector<8x10xf32>
    %c32_137 = arith.constant 32 : index
    %c0_138 = arith.constant 0 : index
    %460 = vector.load %arg8[%c32_137, %c0_138] : memref<64x10xf32, #tpu.memory_space<vmem>>, vector<32x10xf32>
    %cst_139 = arith.constant dense<0.000000e+00> : vector<8x10xf32>
    %461 = tpu.matmul %457, %460, %cst_139 {dimension_numbers = #tpu.dot_dimension_numbers<[1], [0], [0], [1], [0, 0, 1, 1], [], []>} : vector<8x32xf32>, vector<32x10xf32>, vector<8x10xf32> -> vector<8x10xf32>
    %462 = arith.addf %459, %461 : vector<8x10xf32>
    %c0_140 = arith.constant 0 : index
    %c0_141 = arith.constant 0 : index
    %463 = vector.load %arg9[%c0_140, %c0_141] : memref<1x10xf32, #tpu.memory_space<vmem>>, vector<1x10xf32>
    %464 = vector.broadcast %463 : vector<1x10xf32> to vector<8x10xf32>
    %465 = arith.addf %462, %464 : vector<8x10xf32>
    %c0_142 = arith.constant 0 : index
    %c0_143 = arith.constant 0 : index
    %466 = vector.load %arg10[%c0_142, %c0_143] : memref<8x10xf32, #tpu.memory_space<vmem>>, vector<8x10xf32>
    tpu.vector_store %arg10[%c0_142, %c0_143], %465 {strides = array<i32>} : memref<8x10xf32, #tpu.memory_space<vmem>>, vector<8x10xf32>,
    return
  }
}

</mosaic_0001>

<bundles_post_ra>
// kernel: brnn_forward.1
= control target key start
LH: loop header
LB: loop body
LE: loop exit
PB: predicated region body
PF: predicated region fallthrough
CT: control target
= control target key end

     0   :  { %15 = vsyncpa [#allocation6], 0  ;;  %s3207_s0 = inlined_call_operand.vmem [shape: f32[64,28], index: 0, kind: input, shape index: {}]   ;;  %s3208_s1 = inlined_call_operand.vmem [shape: f32[28,256], index: 1, kind: input, shape index: {}]   ;;  %s3209_s2 = inlined_call_operand.vmem [shape: f32[1,256], index: 2, kind: input, shape index: {}]   ;;  %s3210_s3 = inlined_call_operand.vmem [shape: bf16[64,256], index: 3, kind: input, shape index: {}]   ;;  %s3211_s4 = inlined_call_operand.hbm [shape: f32[32,256], index: 4, kind: input, shape index: {}]   ;;  %s3212_s5 = inlined_call_operand.hbm [shape: f32[32,256], index: 5, kind: input, shape index: {}]   ;;  %s3213_s6 = inlined_call_operand.vmem [shape: f32[1,256], index: 6, kind: input, shape index: {}]   ;;  %s3214_s7 = inlined_call_operand.vmem [shape: bf16[32,128], index: 7, kind: input, shape index: {}]   ;;  %s3215_s8 = inlined_call_operand.vmem [shape: f32[64,10], index: 8, kind: input, shape index: {}]   ;;  %s3216_s9 = inlined_call_operand.vmem [shape: f32[1,10], index: 9, kind: input, shape index: {}]   ;;  %s3217_s10 = inlined_call_operand.vmem [shape: f32[8,10], index: 10, kind: output, shape index: {}]  }
   0x1   :  { %s29_s15 = sshll.u32 %s3211_s4, 4  ;;  %s30_s15 = int_to_ptr.hbm [resolvable:$true] %s29_s15 }
   0x2   :  { %16 = vsyncpa [#allocation8], 0  ;;  %s2518_s16 = smov [#allocation5]   ;;  %s42_s20 = sshll.u32 %s3212_s5, 4  ;;  %s43_s20 = int_to_ptr.hbm [resolvable:$true] %s42_s20 }
   0x3   :  { %s31_s17 = sshll.u32 %s2518_s16, 4  ;;  %s2519_s21 = smov 256   ;;  %s32_s17 = int_to_ptr.vmem [resolvable:$true] %s31_s17 }
   0x4   :  { %s2520_s22 = smov 16   ;;  %s2521_s23 = smov [#allocation7]  }
   0x5   :  { %37 = dma.hbm_to_vmem [thread:$0]  %s30_s15, 1024, %s32_s17, [#allocation6], %s2519_s21, %s2519_s21, %s2520_s22  }
   0x6   :  { %s44_s24 = sshll.u32 %s2521_s23, 4  ;;  %s45_s24 = int_to_ptr.vmem [resolvable:$true] %s44_s24 }
   0x7   :  { %50 = dma.hbm_to_vmem [thread:$0]  %s43_s20, 1024, %s45_s24, [#allocation8], %s2519_s21, %s2519_s21, %s2520_s22  }
   0x8   :  { %2514 = dma.done.wait [#allocation6], 1024  }
   0x9   :  { %2515 = vsyncadd [#allocation6], 4294966272 }
   0xa   :  { %2516 = dma.done.wait [#allocation8], 1024  }
   0xb   :  { %2517 = vsyncadd [#allocation8], 4294966272  ;;  %vm115_vm0 = vcmask 1043456   ;;  %v83_v0 = vld [vmem:[%s3208_s1 + $0x38] sm:$0xf]  ;;  %v81_v1 = vld [vmem:[%s3208_s1 + $0x28] sm:$0xff] }
   0xc   :  { %v2153_v2 = vld [vmem:[%s3210_s3 + $0x30] sm:$0xf]  ;;  %2118 = vmatpush.msk.msra.mxu1 %vm115_vm0, %v83_v0  ;;  %v2254_v3 = vld [vmem:[%s3210_s3 + $0x34] sm:$0xf0]  ;;  %v2145_v6 = vld [vmem:[%s3210_s3 + $0x20] sm:$0xf] }
   0xd   :  { %v2600_v4 = vor.u32 %v2254_v3, %v2153_v2  ;;  %v79_v5 = vld [vmem:[%s3208_s1 + $0x18] sm:$0xff]  ;;  %v2252_v7 = vld [vmem:[%s3210_s3 + $0x24] sm:$0xf0]  ;;  %v82_v8 = vld [vmem:[%s3208_s1 + $0x30] sm:$0xf]  ;;  %vm90_vm1 = vcmask 228352  }
   0xe   :  { %176 = vmatpush.msra.mxu1 %v81_v1  ;;  %v77_v9 = vld [vmem:[%s3208_s1 + $0x8] sm:$0xff]  ;;  %v2618_v10 = vor.u32 %v2252_v7, %v2145_v6  ;;  %v68_v11 = vld [vmem:[%s3207_s0] sm:$0xff]  ;;  %2109 = vmatpush.msk.msra.mxu0 %vm115_vm0, %v82_v8  ;;  %v2137_v12 = vld [vmem:[%s3210_s3 + $0x10] sm:$0xf]  ;;  %v2522_v34 = vmov 0   ;;  %vm384_vm10 = vcmask 261120  }
   0xf   :  { %276 = vmatpush.bf16.msra.mxu2 %v2600_v4  ;;  %v2250_v13 = vld [vmem:[%s3210_s3 + $0x14] sm:$0xf0]  ;;  %v80_v14 = vld [vmem:[%s3208_s1 + $0x20] sm:$0xff]  ;;  %v78_v15 = vld [vmem:[%s3208_s1 + $0x10] sm:$0xff]  ;;  %vm268_vm11 = vcmask 523264  }
  0x10   :  { %177 = vmatpush.msra.mxu1 %v79_v5  ;;  %135 = vmatpush.msra.mxu0 %v80_v14  ;;  %v2253_v16 = vld [vmem:[%s3210_s3 + $0x34] sm:$0xf]  ;;  %v2155_v17 = vld [vmem:[%s3210_s3 + $0x38] sm:$0xf0]  ;;  %v2251_v18 = vld [vmem:[%s3210_s3 + $0x24] sm:$0xf]  ;;  %v2647_v19 = vor.u32 %v2250_v13, %v2137_v12 }
  0x11   :  { %v76_v20 = vld [vmem:[%s3208_s1] sm:$0xff]  ;;  %v2652_v21 = vor.u32 %v2253_v16, %v2155_v17  ;;  %v2147_v22 = vld [vmem:[%s3210_s3 + $0x28] sm:$0xf0]  ;;  %v2248_v24 = vld [vmem:[%s3210_s3 + $0x4] sm:$0xf0] }
  0x12   :  { %178 = vmatpush.msra.mxu1 %v77_v9  ;;  %v2129_v23 = vld [vmem:[%s3210_s3] sm:$0xf]  ;;  %136 = vmatpush.msra.mxu0 %v78_v15  ;;  %v2664_v25 = vor.u32 %v2251_v18, %v2147_v22  ;;  %v2249_v26 = vld [vmem:[%s3210_s3 + $0x14] sm:$0xf]  ;;  %v2139_v27 = vld [vmem:[%s3210_s3 + $0x18] sm:$0xf0] }
  0x13   :  { %277 = vmatpush.bf16.msra.mxu2 %v2618_v10  ;;  %2119 = vmatmul.msk.f32.vlgmr.msra.gmra.mxu1 %vm90_vm1, %v68_v11  ;;  %v2674_v28 = vor.u32 %v2248_v24, %v2129_v23  ;;  %v69_v29 = vld [vmem:[%s3207_s0 + $0x8] sm:$0xff]  ;;  %v2682_v30 = vor.u32 %v2249_v26, %v2139_v27  ;;  %v2247_v31 = vld [vmem:[%s3210_s3 + $0x4] sm:$0xf]  ;;  %v70_v35 = vld [vmem:[%s3207_s0 + $0x10] sm:$0xff] }
  0x14   :  { %289 = vmatpush.bf16.msra.mxu3 %v2652_v21  ;;  %778 = vmatpush.bf16.msrb.mxu1 %v2652_v21  ;;  %v2131_v32 = vld [vmem:[%s3210_s3 + $0x8] sm:$0xf0]  ;;  %v71_v36 = vld [vmem:[%s3207_s0 + $0x18] sm:$0xff]  ;;  %v72_v37 = vld [vmem:[%s3207_s0 + $0x20] sm:$0xff] }
  0x15   :  { %137 = vmatpush.msra.mxu0 %v76_v20  ;;  %v2696_v33 = vor.u32 %v2247_v31, %v2131_v32  ;;  %v73_v38 = vld [vmem:[%s3207_s0 + $0x28] sm:$0xff]  ;;  %v74_v39 = vld [vmem:[%s3207_s0 + $0x30] sm:$0xff]  ;;  %v75_v40 = vld [vmem:[%s3207_s0 + $0x38] sm:$0xff]  ;;  %s2523_s0 = smov 64  }
  0x16   :  { %2110 = vmatmul.msk.f32.vlgmr.msra.gmra.mxu0 %vm90_vm1, %v68_v11  ;;  %v84_v42 = vld [vmem:[%s3209_s2] sm:$0x3]  ;;  %s2524_s2 = smov 32  }
  0x17   :  { %278 = vmatpush.bf16.msra.mxu2 %v2647_v19  ;;  %765 = vmatpush.bf16.msrb.mxu0 %v2600_v4  ;;  %v2764_v43 = vperm.slane %v84_v42, 1  ;;  %v2769_v46 = vperm.slane %v84_v42, 0 }
  0x18   :  { %290 = vmatpush.bf16.msra.mxu3 %v2664_v25  ;;  %779 = vmatpush.bf16.msrb.mxu1 %v2664_v25 }
  0x1b   :  { %279 = vmatpush.bf16.msra.mxu2 %v2674_v28  ;;  %2120 = vmatmul.msk.f32.gmra.mxu1 %vm90_vm1, %v69_v29 }
  0x1c   :  { %766 = vmatpush.bf16.msrb.mxu0 %v2618_v10  ;;  %291 = vmatpush.bf16.msra.mxu3 %v2682_v30 }
  0x1d   :  { %780 = vmatpush.bf16.msrb.mxu1 %v2682_v30 }
  0x1e   :  { %280 = vmatmul.bf16.vlgmr.msra.gmra.mxu2 %v2522_v34  ;;  %2111 = vmatmul.msk.f32.gmra.mxu0 %vm90_vm1, %v69_v29 }
  0x1f   :  { %399 = vmatpush.bf16.msrb.mxu2 %v2600_v4 }
  0x20   :  { %767 = vmatpush.bf16.msrb.mxu0 %v2647_v19  ;;  %292 = vmatpush.bf16.msra.mxu3 %v2696_v33 }
  0x21   :  { %781 = vmatpush.bf16.msrb.mxu1 %v2696_v33 }
  0x23   :  { %400 = vmatpush.bf16.msrb.mxu2 %v2618_v10  ;;  %2121 = vmatmul.msk.f32.gmra.mxu1 %vm90_vm1, %v70_v35 }
  0x24   :  { %412 = vmatpush.bf16.msrb.mxu3 %v2652_v21  ;;  %768 = vmatpush.bf16.msrb.mxu0 %v2674_v28 }
  0x25   :  { %1022 = vmatpush.bf16.msra.mxu1 %v2652_v21  ;;  %293 = vmatmul.bf16.vlgmr.msra.gmra.mxu3 %v2522_v34 }
  0x26   :  { %2112 = vmatmul.msk.f32.gmra.mxu0 %vm90_vm1, %v70_v35 }
  0x27   :  { %401 = vmatpush.bf16.msrb.mxu2 %v2647_v19 }
  0x28   :  { %413 = vmatpush.bf16.msrb.mxu3 %v2664_v25  ;;  %1009 = vmatpush.bf16.msra.mxu0 %v2600_v4 }
  0x29   :  { %1023 = vmatpush.bf16.msra.mxu1 %v2664_v25 }
  0x2b   :  { %402 = vmatpush.bf16.msrb.mxu2 %v2674_v28  ;;  %2122 = vmatmul.msk.f32.gmra.mxu1 %vm90_vm1, %v71_v36 }
  0x2c   :  { %414 = vmatpush.bf16.msrb.mxu3 %v2682_v30  ;;  %1010 = vmatpush.bf16.msra.mxu0 %v2618_v10 }
  0x2d   :  { %1024 = vmatpush.bf16.msra.mxu1 %v2682_v30 }
  0x2e   :  { %2113 = vmatmul.msk.f32.gmra.mxu0 %vm90_vm1, %v71_v36 }
  0x2f   :  { %521 = vmatpush.bf16.msra.mxu2 %v2600_v4 }
  0x30   :  { %415 = vmatpush.bf16.msrb.mxu3 %v2696_v33  ;;  %1011 = vmatpush.bf16.msra.mxu0 %v2647_v19 }
  0x31   :  { %1025 = vmatpush.bf16.msra.mxu1 %v2696_v33 }
  0x33   :  { %522 = vmatpush.bf16.msra.mxu2 %v2618_v10  ;;  %2123 = vmatmul.msk.f32.gmra.mxu1 %vm90_vm1, %v72_v37 }
  0x34   :  { %534 = vmatpush.bf16.msra.mxu3 %v2652_v21  ;;  %1012 = vmatpush.bf16.msra.mxu0 %v2674_v28 }
  0x36   :  { %2114 = vmatmul.msk.f32.gmra.mxu0 %vm90_vm1, %v72_v37 }
  0x37   :  { %523 = vmatpush.bf16.msra.mxu2 %v2647_v19 }
  0x38   :  { %535 = vmatpush.bf16.msra.mxu3 %v2664_v25 }
  0x3b   :  { %524 = vmatpush.bf16.msra.mxu2 %v2674_v28  ;;  %2124 = vmatmul.msk.f32.gmra.mxu1 %vm90_vm1, %v73_v38 }
  0x3c   :  { %536 = vmatpush.bf16.msra.mxu3 %v2682_v30 }
  0x3e   :  { %2115 = vmatmul.msk.f32.gmra.mxu0 %vm90_vm1, %v73_v38 }
  0x40   :  { %537 = vmatpush.bf16.msra.mxu3 %v2696_v33 }
  0x43   :  { %2125 = vmatmul.msk.f32.gmra.mxu1 %vm90_vm1, %v74_v39 }
  0x46   :  { %2116 = vmatmul.msk.f32.gmra.mxu0 %vm90_vm1, %v74_v39 }
  0x4b   :  { %2126 = vmatmul.msk.f32.gmra.mxu1 %vm90_vm1, %v75_v40 }
  0x4e   :  { %2117 = vmatmul.msk.f32.gmra.mxu0 %vm90_vm1, %v75_v40 }
  0x90   :  { %v2759_v41 = vpop.f32.mrf.mxu1 }
  0x93   :  { %v139_v47 = vpop.f32.mrf.mxu0 }
  0x94   :  { %v140_v48 = vadd.f32 %v139_v47, %v2769_v46 }
  0x98   :  { %v183_v44 = vpop.f32.mrf.mxu1 }
  0x99   :  { %v2767_v45 = vadd.f32 %v183_v44, %v2764_v43 }
  0xa0   :  { %v186_v49 = vpop.f32.mrf.mxu1 }
  0xa1   :  { %v2773_v50 = vadd.f32 %v186_v49, %v2764_v43  ;;  %v281_v51 = vpop.f32.mrf.mxu2 }
  0xa2   :  { %v300_v52 = vadd.f32 %v281_v51, %v140_v48 }
  0xa4   :  { %2266 = vtanh.f32 %v300_v52  ;;  %v2159_v6 = vmul.f32 -1.442695, %v300_v52 }
  0xa8   :  { %v294_v53 = vpop.f32.mrf.mxu3  ;;  %v189_v54 = vpop.f32.mrf.mxu1 }
  0xa9   :  { %v2776_v55 = vadd.f32 %v189_v54, %v2764_v43  ;;  %v283_v56 = vpop.f32.mrf.mxu2 }
  0xaa   :  { %v2267_v57 = vpop.eup %2266 }
  0xab   :  { %343 = vrot.lane.b32.xlu0 %v2267_v57, %s2523_s0 }
  0xb0   :  { %v296_v58 = vpop.f32.mrf.mxu3  ;;  %v192_v59 = vpop.f32.mrf.mxu1 }
  0xb1   :  { %v2780_v60 = vadd.f32 %v192_v59, %v2764_v43 }
  0xb8   :  { %v195_v61 = vpop.f32.mrf.mxu1 }
  0xb9   :  { %v2783_v62 = vadd.f32 %v195_v61, %v2764_v43 }
  0xc0   :  { %v198_v63 = vpop.f32.mrf.mxu1 }
  0xc1   :  { %v2786_v0 = vadd.f32 %v198_v63, %v2764_v43 }
  0xc8   :  { %v201_v1 = vpop.f32.mrf.mxu1 }
  0xc9   :  { %v202_v2 = vadd.f32 %v201_v1, %v2764_v43 }
  0xcb   :  { %v301_v3 = vadd.f32 %v294_v53, %v202_v2 }
  0xcd   :  { %2268 = vtanh.f32 %v301_v3  ;;  %v2160_v17 = vmul.f32 -1.442695, %v301_v3 }
  0xce   :  { %2270 = vpow2.f32 %v2159_v6  ;;  %v142_v6 = vpop.f32.mrf.mxu0 }
  0xd3   :  { %v2269_v5 = vpop.eup %2268 }
  0xd4   :  { %361 = vrot.lane.b32.xlu0 %v2269_v5, %s2523_s0  ;;  %v2271_v7 = vpop.eup %2270 }
  0xd5   :  { %v308_v8 = vadd.f32 1.0, %v2271_v7  ;;  %v143_v7 = vadd.f32 %v142_v6, %v2769_v46 }
  0xd7   :  { %2272 = vrcp.f32 %v308_v8  ;;  %vm315_vm2 = vweird.f32 %v308_v8  ;;  %v321_v14 = vand.u32 2147483648, %v308_v8  ;;  %v319_v16 = vand.u32 2147483647, %v308_v8 }
  0xd8   :  { %2274 = vpow2.f32 %v2160_v17 }
  0xd9   :  { %v322_v18 = vor.u32 1.1754944e-38, %v321_v14  ;;  %vm320_vm5 = vcmp.eq.f32.partialorder %v319_v16, 8.507059e+37 }
  0xdd   :  { %v2273_v9 = vpop.eup %2272 }
  0xde   :  { %v311_v11 = vmul.f32 %v2273_v9, %v308_v8  ;;  %vm316_vm3 = vweird.f32 %v2273_v9  ;;  %v2275_v26 = vpop.eup %2274 }
  0xdf   :  { %vm317_vm4 = vmor %vm315_vm2, %vm316_vm3  ;;  %v309_v27 = vadd.f32 1.0, %v2275_v26 }
  0xe0   :  { %v312_v12 = vsub.f32 1.0, %v311_v11 }
  0xe1   :  { %2276 = vrcp.f32 %v309_v27  ;;  %v336_v37 = vand.u32 2147483648, %v309_v27  ;;  %vm330_vm7 = vweird.f32 %v309_v27  ;;  %v334_v38 = vand.u32 2147483647, %v309_v27 }
  0xe2   :  { %v313_v13 = vmul.f32 %v2273_v9, %v312_v12 }
  0xe3   :  { %v337_v40 = vor.u32 1.1754944e-38, %v336_v37  ;;  %vm335_vm9 = vcmp.eq.f32.partialorder %v334_v38, 8.507059e+37 }
  0xe4   :  { %v314_v15 = vadd.f32 %v2273_v9, %v313_v13 }
  0xe6   :  { %v318_v20 = vsel %vm317_vm4, %v2273_v9, %v314_v15 }
  0xe7   :  { %v323_v23 = vsel %vm320_vm5, %v322_v18, %v318_v20  ;;  %v2277_v29 = vpop.eup %2276 }
  0xe8   :  { %v326_v31 = vmul.f32 %v2277_v29, %v309_v27  ;;  %vm331_vm6 = vweird.f32 %v2277_v29  ;;  %v340_v48 = vmul.f32 0.0, %v323_v23 }
  0xe9   :  { %vm332_vm8 = vmor %vm330_vm7, %vm331_vm6 }
  0xea   :  { %v327_v32 = vsub.f32 1.0, %v326_v31 }
  0xec   :  { %v328_v35 = vmul.f32 %v2277_v29, %v327_v32 }
  0xee   :  { %v329_v36 = vadd.f32 %v2277_v29, %v328_v35 }
  0xf0   :  { %v333_v39 = vsel %vm332_vm8, %v2277_v29, %v329_v36 }
  0xf1   :  { %v338_v42 = vsel %vm335_vm9, %v337_v40, %v333_v39 }
  0xf2   :  { %v358_v53 = vmul.f32 0.0, %v338_v42 }
 0x11d   :  { %v344_v22 = vpop.permute.xlu0 %343 }
 0x11e   :  { %v346_v24 = vmul.f32 %v344_v22, %v323_v23 }
 0x120   :  { %348 = vrot.lane.b32.xlu1 %v346_v24, %s2524_s2 }
 0x146   :  { %v362_v44 = vpop.permute.xlu0 %361 }
 0x147   :  { %v364_v47 = vmul.f32 %v362_v44, %v338_v42 }
 0x149   :  { %366 = vrot.lane.b32.xlu1 %v364_v47, %s2524_s2 }
 0x192   :  { %v349_v49 = vpop.permute.xlu1 %348 }
 0x193   :  { %v2792_v51 = vadd.f32 %v349_v49, %v340_v48 }
 0x195   :  { %2278 = vtanh.f32 %v2792_v51 }
 0x19b   :  { %v2279_v52 = vpop.eup %2278 }
 0x19c   :  { %354 = vrot.lane.b32.xlu2 %v2279_v52, %s2523_s0 }
 0x1bb   :  { %v367_v54 = vpop.permute.xlu1 %366 }
 0x1bc   :  { %v2796_v56 = vadd.f32 %v367_v54, %v358_v53 }
 0x1be   :  { %2280 = vtanh.f32 %v2796_v56 }
 0x1c4   :  { %v2281_v57 = vpop.eup %2280 }
 0x1c5   :  { %372 = vrot.lane.b32.xlu2 %v2281_v57, %s2523_s0 }
 0x1f6   :  { %v355_v58 = vpop.permute.xlu2 %354 }
 0x1f7   :  { %v357_v59 = vmul.f32 %v355_v58, %v323_v23 }
 0x1f9   :  { %377 = vrot.lane.b32.xlu0 %v357_v59, %s2524_s2 }
 0x21f   :  { %v373_v61 = vpop.permute.xlu2 %372 }
 0x220   :  { %v2801_v63 = vmul.f32 %v373_v61, %v338_v42 }
 0x222   :  { %381 = vrot.lane.b32.xlu1 %v2801_v63, %s2523_s0 }
 0x26b   :  { %v378_v1 = vpop.permute.xlu0 %377 }
 0x26c   :  { %386 = vst.msk [vmem:[#allocation3] sm:$0xff] %vm384_vm10, %v378_v1 }
 0x294   :  { %v382_v2 = vpop.permute.xlu1 %381 }
 0x295   :  { %v385_v3 = vsel %vm384_vm10, %v378_v1, %v382_v2 }
 0x296   :  { %v391_v5 = vpack.c.bf16 %v385_v3, %v385_v3 }
 0x298   :  { %2161 = vmatmul.msk.bf16.vlgmr.msrb.gmra.mxu2 %vm268_vm11, %v391_v5  ;;  %2162 = vmatmul.msk.bf16.vlgmr.msrb.gmra.mxu3 %vm268_vm11, %v391_v5 }
 0x299   :  { %643 = vmatpush.bf16.msrb.mxu2 %v2600_v4  ;;  %656 = vmatpush.bf16.msrb.mxu3 %v2652_v21 }
 0x29d   :  { %644 = vmatpush.bf16.msrb.mxu2 %v2618_v10  ;;  %657 = vmatpush.bf16.msrb.mxu3 %v2664_v25 }
 0x2a1   :  { %645 = vmatpush.bf16.msrb.mxu2 %v2647_v19  ;;  %658 = vmatpush.bf16.msrb.mxu3 %v2682_v30 }
 0x2a5   :  { %646 = vmatpush.bf16.msrb.mxu2 %v2674_v28  ;;  %659 = vmatpush.bf16.msrb.mxu3 %v2696_v33 }
 0x31b   :  { %v404_v8 = vpop.f32.mrf.mxu2  ;;  %v417_v9 = vpop.f32.mrf.mxu3 }
 0x31c   :  { %v423_v11 = vadd.f32 %v404_v8, %v143_v7  ;;  %v424_v12 = vadd.f32 %v417_v9, %v2786_v0 }
 0x31e   :  { %2282 = vtanh.f32 %v423_v11  ;;  %v2163_v17 = vmul.f32 -1.442695, %v423_v11  ;;  %v2164_v23 = vmul.f32 -1.442695, %v424_v12 }
 0x31f   :  { %2284 = vtanh.f32 %v424_v12 }
 0x320   :  { %2286 = vpow2.f32 %v2163_v17  ;;  %v145_v17 = vpop.f32.mrf.mxu0 }
 0x323   :  { %v406_v13 = vpop.f32.mrf.mxu2  ;;  %v419_v14 = vpop.f32.mrf.mxu3 }
 0x324   :  { %v2283_v15 = vpop.eup %2282 }
 0x325   :  { %v2285_v16 = vpop.eup %2284  ;;  %466 = vrot.lane.b32.xlu2 %v2283_v15, %s2523_s0 }
 0x326   :  { %484 = vrot.lane.b32.xlu0 %v2285_v16, %s2523_s0  ;;  %v2287_v18 = vpop.eup %2286 }
 0x327   :  { %v431_v20 = vadd.f32 1.0, %v2287_v18  ;;  %v146_v18 = vadd.f32 %v145_v17, %v2769_v46 }
 0x329   :  { %2288 = vrcp.f32 %v431_v20  ;;  %v444_v32 = vand.u32 2147483648, %v431_v20  ;;  %vm438_vm13 = vweird.f32 %v431_v20  ;;  %v442_v35 = vand.u32 2147483647, %v431_v20 }
 0x32a   :  { %2290 = vpow2.f32 %v2164_v23 }
 0x32b   :  { %v445_v37 = vor.u32 1.1754944e-38, %v444_v32  ;;  %vm443_vm15 = vcmp.eq.f32.partialorder %v442_v35, 8.507059e+37 }
 0x32f   :  { %v2289_v22 = vpop.eup %2288 }
 0x330   :  { %v434_v24 = vmul.f32 %v2289_v22, %v431_v20  ;;  %v2291_v27 = vpop.eup %2290  ;;  %vm439_vm12 = vweird.f32 %v2289_v22 }
 0x331   :  { %v432_v29 = vadd.f32 1.0, %v2291_v27  ;;  %vm440_vm14 = vmor %vm438_vm13, %vm439_vm12 }
 0x332   :  { %v435_v0 = vsub.f32 1.0, %v434_v24 }
 0x333   :  { %2292 = vrcp.f32 %v432_v29  ;;  %v459_v52 = vand.u32 2147483648, %v432_v29  ;;  %vm453_vm1 = vweird.f32 %v432_v29  ;;  %v457_v53 = vand.u32 2147483647, %v432_v29 }
 0x334   :  { %v436_v26 = vmul.f32 %v2289_v22, %v435_v0 }
 0x335   :  { %v460_v57 = vor.u32 1.1754944e-38, %v459_v52  ;;  %vm458_vm3 = vcmp.eq.f32.partialorder %v457_v53, 8.507059e+37 }
 0x336   :  { %v437_v31 = vadd.f32 %v2289_v22, %v436_v26 }
 0x338   :  { %v441_v36 = vsel %vm440_vm14, %v2289_v22, %v437_v31 }
 0x339   :  { %v446_v39 = vsel %vm443_vm15, %v445_v37, %v441_v36  ;;  %v2293_v42 = vpop.eup %2292 }
 0x33a   :  { %v449_v44 = vmul.f32 %v2293_v42, %v432_v29  ;;  %vm454_vm0 = vweird.f32 %v2293_v42  ;;  %v463_v1 = vmul.f32 %v446_v39, %v2792_v51 }
 0x33b   :  { %vm455_vm2 = vmor %vm453_vm1, %vm454_vm0 }
 0x33c   :  { %v450_v47 = vsub.f32 1.0, %v449_v44 }
 0x33e   :  { %v451_v48 = vmul.f32 %v2293_v42, %v450_v47 }
 0x340   :  { %v452_v49 = vadd.f32 %v2293_v42, %v451_v48 }
 0x342   :  { %v456_v54 = vsel %vm455_vm2, %v2293_v42, %v452_v49 }
 0x343   :  { %v461_v59 = vsel %vm458_vm3, %v460_v57, %v456_v54 }
 0x344   :  { %v481_v2 = vmul.f32 %v461_v59, %v2796_v56 }
 0x37f   :  { %v467_v38 = vpop.permute.xlu2 %466 }
 0x380   :  { %v469_v40 = vmul.f32 %v467_v38, %v446_v39 }
 0x382   :  { %471 = vrot.lane.b32.xlu1 %v469_v40, %s2524_s2 }
 0x398   :  { %v485_v58 = vpop.permute.xlu0 %484 }
 0x399   :  { %v487_v61 = vmul.f32 %v485_v58, %v461_v59 }
 0x39b   :  { %489 = vrot.lane.b32.xlu2 %v487_v61, %s2524_s2 }
 0x3f4   :  { %v472_v3 = vpop.permute.xlu1 %471 }
 0x3f5   :  { %v490_v5 = vpop.permute.xlu2 %489  ;;  %v2825_v6 = vadd.f32 %v472_v3, %v463_v1 }
 0x3f6   :  { %v2827_v7 = vadd.f32 %v490_v5, %v481_v2 }
 0x3f7   :  { %2294 = vtanh.f32 %v2825_v6 }
 0x3f8   :  { %2296 = vtanh.f32 %v2827_v7 }
 0x3fd   :  { %v2295_v8 = vpop.eup %2294 }
 0x3fe   :  { %v2297_v9 = vpop.eup %2296  ;;  %477 = vrot.lane.b32.xlu0 %v2295_v8, %s2523_s0 }
 0x3ff   :  { %495 = vrot.lane.b32.xlu1 %v2297_v9, %s2523_s0 }
 0x470   :  { %v478_v11 = vpop.permute.xlu0 %477 }
 0x471   :  { %v496_v51 = vpop.permute.xlu1 %495  ;;  %v480_v12 = vmul.f32 %v478_v11, %v446_v39 }
 0x472   :  { %v2833_v56 = vmul.f32 %v496_v51, %v461_v59 }
 0x473   :  { %500 = vrot.lane.b32.xlu2 %v480_v12, %s2524_s2 }
 0x474   :  { %504 = vrot.lane.b32.xlu0 %v2833_v56, %s2523_s0 }
 0x4cd   :  { %v501_v13 = vpop.permute.xlu2 %500 }
 0x4ce   :  { %508 = vst.msk [vmem:[#allocation3 + $0x8] sm:$0xff] %vm384_vm10, %v501_v13 }
 0x4e6   :  { %v505_v14 = vpop.permute.xlu0 %504 }
 0x4e7   :  { %v507_v15 = vsel %vm384_vm10, %v501_v13, %v505_v14 }
 0x4e8   :  { %v513_v16 = vpack.c.bf16 %v507_v15, %v507_v15 }
 0x4ea   :  { %2165 = vmatmul.msk.bf16.vlgmr.msra.gmra.mxu2 %vm268_vm11, %v513_v16  ;;  %2166 = vmatmul.msk.bf16.vlgmr.msra.gmra.mxu3 %vm268_vm11, %v513_v16 }
 0x4eb   :  { %887 = vmatpush.bf16.msra.mxu2 %v2600_v4  ;;  %900 = vmatpush.bf16.msra.mxu3 %v2652_v21 }
 0x4ef   :  { %888 = vmatpush.bf16.msra.mxu2 %v2618_v10  ;;  %901 = vmatpush.bf16.msra.mxu3 %v2664_v25 }
 0x4f3   :  { %889 = vmatpush.bf16.msra.mxu2 %v2647_v19  ;;  %902 = vmatpush.bf16.msra.mxu3 %v2682_v30 }
 0x4f7   :  { %890 = vmatpush.bf16.msra.mxu2 %v2674_v28  ;;  %903 = vmatpush.bf16.msra.mxu3 %v2696_v33 }
 0x56d   :  { %v526_v20 = vpop.f32.mrf.mxu2  ;;  %v539_v22 = vpop.f32.mrf.mxu3 }
 0x56e   :  { %v545_v23 = vadd.f32 %v526_v20, %v146_v18  ;;  %v546_v24 = vadd.f32 %v539_v22, %v2783_v62 }
 0x570   :  { %2298 = vtanh.f32 %v545_v23  ;;  %v2168_v31 = vmul.f32 -1.442695, %v546_v24  ;;  %v2167_v37 = vmul.f32 -1.442695, %v545_v23 }
 0x571   :  { %2300 = vtanh.f32 %v546_v24 }
 0x572   :  { %2302 = vpow2.f32 %v2168_v31  ;;  %v148_v31 = vpop.f32.mrf.mxu0 }
 0x575   :  { %v528_v0 = vpop.f32.mrf.mxu2  ;;  %v541_v26 = vpop.f32.mrf.mxu3 }
 0x576   :  { %v2299_v27 = vpop.eup %2298 }
 0x577   :  { %v2301_v29 = vpop.eup %2300  ;;  %588 = vrot.lane.b32.xlu1 %v2299_v27, %s2523_s0 }
 0x578   :  { %606 = vrot.lane.b32.xlu2 %v2301_v29, %s2523_s0  ;;  %v2303_v32 = vpop.eup %2302 }
 0x579   :  { %v554_v35 = vadd.f32 1.0, %v2303_v32  ;;  %v149_v32 = vadd.f32 %v148_v31, %v2769_v46 }
 0x57b   :  { %2304 = vrcp.f32 %v554_v35  ;;  %v581_v47 = vand.u32 2147483648, %v554_v35  ;;  %vm575_vm5 = vweird.f32 %v554_v35  ;;  %v579_v48 = vand.u32 2147483647, %v554_v35 }
 0x57c   :  { %2306 = vpow2.f32 %v2167_v37 }
 0x57d   :  { %v582_v52 = vor.u32 1.1754944e-38, %v581_v47  ;;  %vm580_vm7 = vcmp.eq.f32.partialorder %v579_v48, 8.507059e+37 }
 0x581   :  { %v2305_v36 = vpop.eup %2304 }
 0x582   :  { %v571_v38 = vmul.f32 %v2305_v36, %v554_v35  ;;  %v2307_v39 = vpop.eup %2306  ;;  %vm576_vm4 = vweird.f32 %v2305_v36 }
 0x583   :  { %v553_v42 = vadd.f32 1.0, %v2307_v39  ;;  %vm577_vm6 = vmor %vm575_vm5, %vm576_vm4 }
 0x584   :  { %v572_v62 = vsub.f32 1.0, %v571_v38 }
 0x585   :  { %2308 = vrcp.f32 %v553_v42  ;;  %v566_v3 = vand.u32 2147483648, %v553_v42  ;;  %vm560_vm9 = vweird.f32 %v553_v42  ;;  %v564_v5 = vand.u32 2147483647, %v553_v42 }
 0x586   :  { %v573_v40 = vmul.f32 %v2305_v36, %v572_v62 }
 0x587   :  { %v567_v9 = vor.u32 1.1754944e-38, %v566_v3  ;;  %vm565_vm13 = vcmp.eq.f32.partialorder %v564_v5, 8.507059e+37 }
 0x588   :  { %v574_v44 = vadd.f32 %v2305_v36, %v573_v40 }
 0x58a   :  { %v578_v49 = vsel %vm577_vm6, %v2305_v36, %v574_v44 }
 0x58b   :  { %v583_v54 = vsel %vm580_vm7, %v582_v52, %v578_v49  ;;  %v2309_v57 = vpop.eup %2308 }
 0x58c   :  { %v556_v59 = vmul.f32 %v2309_v57, %v553_v42  ;;  %vm561_vm8 = vweird.f32 %v2309_v57  ;;  %v603_v13 = vmul.f32 %v583_v54, %v2827_v7 }
 0x58d   :  { %vm562_vm12 = vmor %vm560_vm9, %vm561_vm8 }
 0x58e   :  { %v557_v61 = vsub.f32 1.0, %v556_v59 }
 0x590   :  { %v558_v1 = vmul.f32 %v2309_v57, %v557_v61 }
 0x592   :  { %v559_v2 = vadd.f32 %v2309_v57, %v558_v1 }
 0x594   :  { %v563_v8 = vsel %vm562_vm12, %v2309_v57, %v559_v2 }
 0x595   :  { %v568_v51 = vsel %vm565_vm13, %v567_v9, %v563_v8 }
 0x596   :  { %v585_v17 = vmul.f32 %v568_v51, %v2825_v6 }
 0x5d2   :  { %v607_v53 = vpop.permute.xlu2 %606 }
 0x5d3   :  { %v609_v58 = vmul.f32 %v607_v53, %v583_v54 }
 0x5d5   :  { %611 = vrot.lane.b32.xlu1 %v609_v58, %s2524_s2 }
 0x5e9   :  { %v589_v11 = vpop.permute.xlu1 %588 }
 0x5ea   :  { %v591_v12 = vmul.f32 %v589_v11, %v568_v51 }
 0x5ec   :  { %593 = vrot.lane.b32.xlu0 %v591_v12, %s2524_s2 }
 0x647   :  { %v612_v14 = vpop.permute.xlu1 %611 }
 0x648   :  { %v2857_v15 = vadd.f32 %v612_v14, %v603_v13 }
 0x64a   :  { %2310 = vtanh.f32 %v2857_v15 }
 0x650   :  { %v2311_v16 = vpop.eup %2310 }
 0x651   :  { %617 = vrot.lane.b32.xlu0 %v2311_v16, %s2523_s0 }
 0x65e   :  { %v594_v18 = vpop.permute.xlu0 %593 }
 0x65f   :  { %v2862_v20 = vadd.f32 %v594_v18, %v585_v17 }
 0x661   :  { %2312 = vtanh.f32 %v2862_v20 }
 0x667   :  { %v2313_v22 = vpop.eup %2312 }
 0x668   :  { %599 = vrot.lane.b32.xlu2 %v2313_v22, %s2523_s0 }
 0x6c2   :  { %v600_v23 = vpop.permute.xlu2 %599 }
 0x6c3   :  { %v618_v7 = vpop.permute.xlu0 %617  ;;  %v602_v24 = vmul.f32 %v600_v23, %v568_v51 }
 0x6c4   :  { %v2866_v0 = vmul.f32 %v618_v7, %v583_v54 }
 0x6c5   :  { %622 = vrot.lane.b32.xlu1 %v602_v24, %s2524_s2 }
 0x6c6   :  { %626 = vrot.lane.b32.xlu2 %v2866_v0, %s2523_s0 }
 0x720   :  { %v627_v26 = vpop.permute.xlu2 %626 }
 0x737   :  { %v623_v6 = vpop.permute.xlu1 %622 }
 0x738   :  { %v629_v27 = vsel %vm384_vm10, %v623_v6, %v627_v26  ;;  %630 = vst.msk [vmem:[#allocation3 + $0x10] sm:$0xff] %vm384_vm10, %v623_v6 }
 0x739   :  { %v635_v29 = vpack.c.bf16 %v629_v27, %v629_v27 }
 0x73b   :  { %2169 = vmatmul.msk.bf16.vlgmr.msrb.gmra.mxu2 %vm268_vm11, %v635_v29  ;;  %2170 = vmatmul.msk.bf16.vlgmr.msrb.gmra.mxu3 %vm268_vm11, %v635_v29 }
 0x73c   :  { %1144 = vmatpush.bf16.msrb.mxu3 %v2652_v21  ;;  %1131 = vmatpush.bf16.msrb.mxu2 %v2600_v4 }
 0x740   :  { %1145 = vmatpush.bf16.msrb.mxu3 %v2664_v25  ;;  %1132 = vmatpush.bf16.msrb.mxu2 %v2618_v10 }
 0x744   :  { %1146 = vmatpush.bf16.msrb.mxu3 %v2682_v30  ;;  %1133 = vmatpush.bf16.msrb.mxu2 %v2647_v19 }
 0x748   :  { %1147 = vmatpush.bf16.msrb.mxu3 %v2696_v33  ;;  %1134 = vmatpush.bf16.msrb.mxu2 %v2674_v28 }
 0x7be   :  { %v648_v35 = vpop.f32.mrf.mxu2  ;;  %v661_v36 = vpop.f32.mrf.mxu3 }
 0x7bf   :  { %v667_v21 = vadd.f32 %v648_v35, %v149_v32  ;;  %v668_v4 = vadd.f32 %v661_v36, %v2780_v60  ;;  %v151_v35 = vpop.f32.mrf.mxu0 }
 0x7c1   :  { %2314 = vtanh.f32 %v667_v21  ;;  %v2171_v19 = vmul.f32 -1.442695, %v667_v21  ;;  %v2172_v28 = vmul.f32 -1.442695, %v668_v4 }
 0x7c2   :  { %2316 = vtanh.f32 %v668_v4 }
 0x7c3   :  { %2318 = vpow2.f32 %v2171_v19 }
 0x7c4   :  { %2320 = vpow2.f32 %v2172_v28 }
 0x7c6   :  { %v650_v25 = vpop.f32.mrf.mxu2  ;;  %v663_v10 = vpop.f32.mrf.mxu3 }
 0x7c7   :  { %v2315_v37 = vpop.eup %2314  ;;  %v2908_v36 = vpop.f32.mrf.mxu0  ;;  %v152_v25 = vadd.f32 %v151_v35, %v2769_v46 }
 0x7c8   :  { %v2317_v30 = vpop.eup %2316  ;;  %710 = vrot.lane.b32.xlu0 %v2315_v37, %s2523_s0 }
 0x7c9   :  { %728 = vrot.lane.b32.xlu1 %v2317_v30, %s2523_s0  ;;  %v2319_v33 = vpop.eup %2318 }
 0x7ca   :  { %v2321_v38 = vpop.eup %2320  ;;  %v675_v62 = vadd.f32 1.0, %v2319_v33 }
 0x7cb   :  { %v676_v39 = vadd.f32 1.0, %v2321_v38 }
 0x7cc   :  { %2322 = vrcp.f32 %v675_v62  ;;  %v688_v57 = vand.u32 2147483648, %v675_v62  ;;  %vm682_vm0 = vweird.f32 %v675_v62  ;;  %v686_v59 = vand.u32 2147483647, %v675_v62 }
 0x7cd   :  { %2324 = vrcp.f32 %v676_v39  ;;  %v703_v58 = vand.u32 2147483648, %v676_v39  ;;  %vm697_vm1 = vweird.f32 %v676_v39  ;;  %v701_v61 = vand.u32 2147483647, %v676_v39 }
 0x7ce   :  { %v689_v3 = vor.u32 1.1754944e-38, %v688_v57  ;;  %vm687_vm4 = vcmp.eq.f32.partialorder %v686_v59, 8.507059e+37 }
 0x7cf   :  { %v704_v5 = vor.u32 1.1754944e-38, %v703_v58  ;;  %vm702_vm5 = vcmp.eq.f32.partialorder %v701_v61, 8.507059e+37  ;;  %v2910_v21 = vpop.f32.mrf.mxu0 }
 0x7d2   :  { %v2323_v60 = vpop.eup %2322 }
 0x7d3   :  { %v2325_v40 = vpop.eup %2324  ;;  %v678_v42 = vmul.f32 %v2323_v60, %v675_v62  ;;  %vm683_vm14 = vweird.f32 %v2323_v60 }
 0x7d4   :  { %v693_v44 = vmul.f32 %v2325_v40, %v676_v39  ;;  %vm698_vm15 = vweird.f32 %v2325_v40  ;;  %vm684_vm2 = vmor %vm682_vm0, %vm683_vm14 }
 0x7d5   :  { %v679_v47 = vsub.f32 1.0, %v678_v42  ;;  %vm699_vm3 = vmor %vm697_vm1, %vm698_vm15 }
 0x7d6   :  { %v694_v48 = vsub.f32 1.0, %v693_v44 }
 0x7d7   :  { %v680_v49 = vmul.f32 %v2323_v60, %v679_v47  ;;  %v2912_v4 = vpop.f32.mrf.mxu0 }
 0x7d8   :  { %v695_v52 = vmul.f32 %v2325_v40, %v694_v48 }
 0x7d9   :  { %v681_v53 = vadd.f32 %v2323_v60, %v680_v49 }
 0x7da   :  { %v696_v54 = vadd.f32 %v2325_v40, %v695_v52 }
 0x7db   :  { %v685_v1 = vsel %vm684_vm2, %v2323_v60, %v681_v53 }
 0x7dc   :  { %v700_v2 = vsel %vm699_vm3, %v2325_v40, %v696_v54  ;;  %v690_v9 = vsel %vm687_vm4, %v689_v3, %v685_v1 }
 0x7dd   :  { %v705_v51 = vsel %vm702_vm5, %v704_v5, %v700_v2  ;;  %v707_v14 = vmul.f32 %v690_v9, %v2862_v20 }
 0x7de   :  { %v725_v22 = vmul.f32 %v705_v51, %v2857_v15 }
 0x83a   :  { %v711_v8 = vpop.permute.xlu0 %710 }
 0x83b   :  { %v729_v11 = vpop.permute.xlu1 %728  ;;  %v713_v12 = vmul.f32 %v711_v8, %v690_v9 }
 0x83c   :  { %v731_v13 = vmul.f32 %v729_v11, %v705_v51 }
 0x83d   :  { %715 = vrot.lane.b32.xlu2 %v713_v12, %s2524_s2 }
 0x83e   :  { %733 = vrot.lane.b32.xlu0 %v731_v13, %s2524_s2 }
 0x897   :  { %v716_v16 = vpop.permute.xlu2 %715 }
 0x898   :  { %v2890_v17 = vadd.f32 %v716_v16, %v707_v14 }
 0x89a   :  { %2326 = vtanh.f32 %v2890_v17 }
 0x8a0   :  { %v2327_v18 = vpop.eup %2326 }
 0x8a1   :  { %721 = vrot.lane.b32.xlu1 %v2327_v18, %s2523_s0 }
 0x8b0   :  { %v734_v23 = vpop.permute.xlu0 %733 }
 0x8b1   :  { %v2895_v7 = vadd.f32 %v734_v23, %v725_v22 }
 0x8b3   :  { %2328 = vtanh.f32 %v2895_v7 }
 0x8b9   :  { %v2329_v24 = vpop.eup %2328 }
 0x8ba   :  { %739 = vrot.lane.b32.xlu2 %v2329_v24, %s2523_s0 }
 0x913   :  { %v722_v26 = vpop.permute.xlu1 %721 }
 0x914   :  { %v740_v20 = vpop.permute.xlu2 %739  ;;  %v724_v6 = vmul.f32 %v722_v26, %v690_v9 }
 0x915   :  { %v2899_v27 = vmul.f32 %v740_v20, %v705_v51 }
 0x916   :  { %744 = vrot.lane.b32.xlu0 %v724_v6, %s2524_s2 }
 0x917   :  { %748 = vrot.lane.b32.xlu1 %v2899_v27, %s2523_s0 }
 0x988   :  { %v745_v29 = vpop.permute.xlu0 %744 }
 0x989   :  { %752 = vst.msk [vmem:[#allocation3 + $0x18] sm:$0xff] %vm384_vm10, %v745_v29  ;;  %v749_v15 = vpop.permute.xlu1 %748 }
 0x98a   :  { %v751_v31 = vsel %vm384_vm10, %v745_v29, %v749_v15 }
 0x98b   :  { %v757_v32 = vpack.c.bf16 %v751_v31, %v751_v31 }
 0x98d   :  { %2173 = vmatmul.msk.bf16.vlgmr.msrb.gmra.mxu0 %vm268_vm11, %v757_v32  ;;  %2174 = vmatmul.msk.bf16.vlgmr.msrb.gmra.mxu1 %vm268_vm11, %v757_v32 }
 0xa0a   :  { %v770_v10 = vpop.f32.mrf.mxu0  ;;  %v783_v37 = vpop.f32.mrf.mxu1 }
 0xa0b   :  { %v789_v30 = vadd.f32 %v770_v10, %v152_v25  ;;  %v790_v19 = vadd.f32 %v783_v37, %v2776_v55 }
 0xa0d   :  { %2330 = vtanh.f32 %v789_v30  ;;  %v2175_v39 = vmul.f32 -1.442695, %v789_v30  ;;  %v2176_v44 = vmul.f32 -1.442695, %v790_v19 }
 0xa0e   :  { %2332 = vtanh.f32 %v790_v19  ;;  %v155_v19 = vadd.f32 %v2908_v36, %v2769_v46 }
 0xa0f   :  { %2334 = vpow2.f32 %v2175_v39 }
 0xa12   :  { %v772_v28 = vpop.f32.mrf.mxu0  ;;  %v785_v33 = vpop.f32.mrf.mxu1 }
 0xa13   :  { %v2331_v38 = vpop.eup %2330 }
 0xa14   :  { %v2333_v62 = vpop.eup %2332  ;;  %832 = vrot.lane.b32.xlu2 %v2331_v38, %s2523_s0 }
 0xa15   :  { %850 = vrot.lane.b32.xlu0 %v2333_v62, %s2523_s0  ;;  %v2335_v60 = vpop.eup %2334 }
 0xa16   :  { %v797_v40 = vadd.f32 1.0, %v2335_v60 }
 0xa18   :  { %2336 = vrcp.f32 %v797_v40  ;;  %v810_v54 = vand.u32 2147483648, %v797_v40  ;;  %vm804_vm7 = vweird.f32 %v797_v40  ;;  %v808_v57 = vand.u32 2147483647, %v797_v40 }
 0xa19   :  { %2338 = vpow2.f32 %v2176_v44 }
 0xa1a   :  { %v811_v59 = vor.u32 1.1754944e-38, %v810_v54  ;;  %vm809_vm9 = vcmp.eq.f32.partialorder %v808_v57, 8.507059e+37 }
 0xa1e   :  { %v2337_v42 = vpop.eup %2336 }
 0xa1f   :  { %v800_v47 = vmul.f32 %v2337_v42, %v797_v40  ;;  %v2339_v49 = vpop.eup %2338  ;;  %vm805_vm6 = vweird.f32 %v2337_v42 }
 0xa20   :  { %v798_v52 = vadd.f32 1.0, %v2339_v49  ;;  %vm806_vm8 = vmor %vm804_vm7, %vm805_vm6 }
 0xa21   :  { %v801_v55 = vsub.f32 1.0, %v800_v47 }
 0xa22   :  { %2340 = vrcp.f32 %v798_v52  ;;  %v825_v51 = vand.u32 2147483648, %v798_v52  ;;  %vm819_vm13 = vweird.f32 %v798_v52  ;;  %v823_v12 = vand.u32 2147483647, %v798_v52 }
 0xa23   :  { %v802_v48 = vmul.f32 %v2337_v42, %v801_v55 }
 0xa24   :  { %v826_v14 = vor.u32 1.1754944e-38, %v825_v51  ;;  %vm824_vm15 = vcmp.eq.f32.partialorder %v823_v12, 8.507059e+37 }
 0xa25   :  { %v803_v53 = vadd.f32 %v2337_v42, %v802_v48 }
 0xa27   :  { %v807_v58 = vsel %vm806_vm8, %v2337_v42, %v803_v53 }
 0xa28   :  { %v812_v1 = vsel %vm809_vm9, %v811_v59, %v807_v58  ;;  %v2341_v3 = vpop.eup %2340 }
 0xa29   :  { %v815_v5 = vmul.f32 %v2341_v3, %v798_v52  ;;  %vm820_vm12 = vweird.f32 %v2341_v3  ;;  %v829_v23 = vmul.f32 %v812_v1, %v2890_v17 }
 0xa2a   :  { %vm821_vm14 = vmor %vm819_vm13, %vm820_vm12 }
 0xa2b   :  { %v816_v8 = vsub.f32 1.0, %v815_v5 }
 0xa2d   :  { %v817_v9 = vmul.f32 %v2341_v3, %v816_v8 }
 0xa2f   :  { %v818_v11 = vadd.f32 %v2341_v3, %v817_v9 }
 0xa31   :  { %v822_v13 = vsel %vm821_vm14, %v2341_v3, %v818_v11 }
 0xa32   :  { %v827_v18 = vsel %vm824_vm15, %v826_v14, %v822_v13 }
 0xa33   :  { %v847_v24 = vmul.f32 %v827_v18, %v2895_v7 }
 0xa6e   :  { %v833_v61 = vpop.permute.xlu2 %832 }
 0xa6f   :  { %v835_v2 = vmul.f32 %v833_v61, %v812_v1 }
 0xa71   :  { %837 = vrot.lane.b32.xlu1 %v835_v2, %s2524_s2 }
 0xa87   :  { %v851_v16 = vpop.permute.xlu0 %850 }
 0xa88   :  { %v853_v22 = vmul.f32 %v851_v16, %v827_v18 }
 0xa8a   :  { %855 = vrot.lane.b32.xlu2 %v853_v22, %s2524_s2 }
 0xae3   :  { %v838_v26 = vpop.permute.xlu1 %837 }
 0xae4   :  { %v856_v20 = vpop.permute.xlu2 %855  ;;  %v2922_v6 = vadd.f32 %v838_v26, %v829_v23 }
 0xae5   :  { %v2924_v29 = vadd.f32 %v856_v20, %v847_v24 }
 0xae6   :  { %2342 = vtanh.f32 %v2922_v6 }
 0xae7   :  { %2344 = vtanh.f32 %v2924_v29 }
 0xaec   :  { %v2343_v15 = vpop.eup %2342 }
 0xaed   :  { %v2345_v31 = vpop.eup %2344  ;;  %843 = vrot.lane.b32.xlu0 %v2343_v15, %s2523_s0 }
 0xaee   :  { %861 = vrot.lane.b32.xlu1 %v2345_v31, %s2523_s0 }
 0xb5f   :  { %v844_v32 = vpop.permute.xlu0 %843 }
 0xb60   :  { %v862_v17 = vpop.permute.xlu1 %861  ;;  %v846_v35 = vmul.f32 %v844_v32, %v812_v1 }
 0xb61   :  { %v2930_v7 = vmul.f32 %v862_v17, %v827_v18 }
 0xb62   :  { %866 = vrot.lane.b32.xlu2 %v846_v35, %s2524_s2 }
 0xb63   :  { %870 = vrot.lane.b32.xlu0 %v2930_v7, %s2523_s0 }
 0xbbc   :  { %v867_v25 = vpop.permute.xlu2 %866 }
 0xbbd   :  { %874 = vst.msk [vmem:[#allocation3 + $0x20] sm:$0xff] %vm384_vm10, %v867_v25 }
 0xbd5   :  { %v871_v10 = vpop.permute.xlu0 %870 }
 0xbd6   :  { %v873_v37 = vsel %vm384_vm10, %v867_v25, %v871_v10 }
 0xbd7   :  { %v879_v30 = vpack.c.bf16 %v873_v37, %v873_v37 }
 0xbd9   :  { %2177 = vmatmul.msk.bf16.vlgmr.msra.gmra.mxu2 %vm268_vm11, %v879_v30  ;;  %2178 = vmatmul.msk.bf16.vlgmr.msra.gmra.mxu3 %vm268_vm11, %v879_v30 }
 0xc5c   :  { %v892_v28 = vpop.f32.mrf.mxu2  ;;  %v905_v33 = vpop.f32.mrf.mxu3 }
 0xc5d   :  { %v911_v38 = vadd.f32 %v892_v28, %v155_v19  ;;  %v912_v62 = vadd.f32 %v905_v33, %v2773_v50 }
 0xc5f   :  { %2346 = vtanh.f32 %v911_v38  ;;  %v2180_v44 = vmul.f32 -1.442695, %v912_v62  ;;  %v2179_v48 = vmul.f32 -1.442695, %v911_v38  ;;  %v158_v38 = vadd.f32 %v2910_v21, %v2769_v46 }
 0xc60   :  { %2348 = vtanh.f32 %v912_v62 }
 0xc61   :  { %2350 = vpow2.f32 %v2180_v44 }
 0xc64   :  { %v894_v39 = vpop.f32.mrf.mxu2  ;;  %v907_v60 = vpop.f32.mrf.mxu3 }
 0xc65   :  { %v2347_v40 = vpop.eup %2346 }
 0xc66   :  { %v2349_v42 = vpop.eup %2348  ;;  %954 = vrot.lane.b32.xlu1 %v2347_v40, %s2523_s0 }
 0xc67   :  { %972 = vrot.lane.b32.xlu2 %v2349_v42, %s2523_s0  ;;  %v2351_v47 = vpop.eup %2350 }
 0xc68   :  { %v920_v55 = vadd.f32 1.0, %v2351_v47 }
 0xc6a   :  { %2352 = vrcp.f32 %v920_v55  ;;  %v947_v58 = vand.u32 2147483648, %v920_v55  ;;  %vm941_vm1 = vweird.f32 %v920_v55  ;;  %v945_v59 = vand.u32 2147483647, %v920_v55 }
 0xc6b   :  { %2354 = vpow2.f32 %v2179_v48 }
 0xc6c   :  { %v948_v1 = vor.u32 1.1754944e-38, %v947_v58  ;;  %vm946_vm3 = vcmp.eq.f32.partialorder %v945_v59, 8.507059e+37 }
 0xc70   :  { %v2353_v36 = vpop.eup %2352 }
 0xc71   :  { %v937_v49 = vmul.f32 %v2353_v36, %v920_v55  ;;  %v2355_v52 = vpop.eup %2354  ;;  %vm942_vm0 = vweird.f32 %v2353_v36 }
 0xc72   :  { %v919_v54 = vadd.f32 1.0, %v2355_v52  ;;  %vm943_vm2 = vmor %vm941_vm1, %vm942_vm0 }
 0xc73   :  { %v938_v50 = vsub.f32 1.0, %v937_v49 }
 0xc74   :  { %2356 = vrcp.f32 %v919_v54  ;;  %v932_v13 = vand.u32 2147483648, %v919_v54  ;;  %vm926_vm5 = vweird.f32 %v919_v54  ;;  %v930_v14 = vand.u32 2147483647, %v919_v54 }
 0xc75   :  { %v939_v53 = vmul.f32 %v2353_v36, %v938_v50 }
 0xc76   :  { %v933_v18 = vor.u32 1.1754944e-38, %v932_v13  ;;  %vm931_vm7 = vcmp.eq.f32.partialorder %v930_v14, 8.507059e+37 }
 0xc77   :  { %v940_v57 = vadd.f32 %v2353_v36, %v939_v53 }
 0xc79   :  { %v944_v61 = vsel %vm943_vm2, %v2353_v36, %v940_v57 }
 0xc7a   :  { %v949_v3 = vsel %vm946_vm3, %v948_v1, %v944_v61  ;;  %v2357_v5 = vpop.eup %2356 }
 0xc7b   :  { %v922_v9 = vmul.f32 %v2357_v5, %v919_v54  ;;  %vm927_vm4 = vweird.f32 %v2357_v5  ;;  %v969_v26 = vmul.f32 %v949_v3, %v2924_v29 }
 0xc7c   :  { %vm928_vm6 = vmor %vm926_vm5, %vm927_vm4 }
 0xc7d   :  { %v923_v11 = vsub.f32 1.0, %v922_v9 }
 0xc7f   :  { %v924_v51 = vmul.f32 %v2357_v5, %v923_v11 }
 0xc81   :  { %v925_v12 = vadd.f32 %v2357_v5, %v924_v51 }
 0xc83   :  { %v929_v16 = vsel %vm928_vm6, %v2357_v5, %v925_v12 }
 0xc84   :  { %v934_v23 = vsel %vm931_vm7, %v933_v18, %v929_v16 }
 0xc85   :  { %v951_v32 = vmul.f32 %v934_v23, %v2922_v6 }
 0xcc1   :  { %v973_v2 = vpop.permute.xlu2 %972 }
 0xcc2   :  { %v975_v8 = vmul.f32 %v973_v2, %v949_v3 }
 0xcc4   :  { %977 = vrot.lane.b32.xlu1 %v975_v8, %s2524_s2 }
 0xcd8   :  { %v955_v22 = vpop.permute.xlu1 %954 }
 0xcd9   :  { %v957_v24 = vmul.f32 %v955_v22, %v934_v23 }
 0xcdb   :  { %959 = vrot.lane.b32.xlu0 %v957_v24, %s2524_s2 }
 0xd36   :  { %v978_v20 = vpop.permute.xlu1 %977 }
 0xd37   :  { %v2947_v15 = vadd.f32 %v978_v20, %v969_v26 }
 0xd39   :  { %2358 = vtanh.f32 %v2947_v15 }
 0xd3f   :  { %v2359_v31 = vpop.eup %2358 }
 0xd40   :  { %983 = vrot.lane.b32.xlu0 %v2359_v31, %s2523_s0 }
 0xd4d   :  { %v960_v17 = vpop.permute.xlu0 %959 }
 0xd4e   :  { %v2952_v35 = vadd.f32 %v960_v17, %v951_v32 }
 0xd50   :  { %2360 = vtanh.f32 %v2952_v35 }
 0xd56   :  { %v2361_v25 = vpop.eup %2360 }
 0xd57   :  { %965 = vrot.lane.b32.xlu2 %v2361_v25, %s2523_s0 }
 0xdb1   :  { %v966_v10 = vpop.permute.xlu2 %965 }
 0xdb2   :  { %v984_v29 = vpop.permute.xlu0 %983  ;;  %v968_v37 = vmul.f32 %v966_v10, %v934_v23 }
 0xdb3   :  { %v2956_v30 = vmul.f32 %v984_v29, %v949_v3 }
 0xdb4   :  { %988 = vrot.lane.b32.xlu1 %v968_v37, %s2524_s2 }
 0xdb5   :  { %992 = vrot.lane.b32.xlu2 %v2956_v30, %s2523_s0 }
 0xe0f   :  { %v993_v19 = vpop.permute.xlu2 %992 }
 0xe26   :  { %v989_v6 = vpop.permute.xlu1 %988 }
 0xe27   :  { %v995_v28 = vsel %vm384_vm10, %v989_v6, %v993_v19  ;;  %996 = vst.msk [vmem:[#allocation3 + $0x28] sm:$0xff] %vm384_vm10, %v989_v6 }
 0xe28   :  { %v1001_v33 = vpack.c.bf16 %v995_v28, %v995_v28 }
 0xe2a   :  { %2181 = vmatmul.msk.bf16.vlgmr.msra.gmra.mxu0 %vm268_vm11, %v1001_v33  ;;  %2182 = vmatmul.msk.bf16.vlgmr.msra.gmra.mxu1 %vm268_vm11, %v1001_v33  ;;  %v1255_v33 = vld [vmem:[#allocation5 + $0x30] sm:$0xff] }
 0xe2b   :  { %1415 = vmatpush.msra.mxu2 %v1255_v33 }
 0xea7   :  { %v1014_v62 = vpop.f32.mrf.mxu0  ;;  %v1027_v39 = vpop.f32.mrf.mxu1 }
 0xea8   :  { %v1033_v60 = vadd.f32 %v1014_v62, %v158_v38  ;;  %v1034_v40 = vadd.f32 %v1027_v39, %v2767_v45  ;;  %v1253_v38 = vld [vmem:[#allocation5 + $0x20] sm:$0xff]  ;;  %v1254_v62 = vld [vmem:[#allocation5 + $0x28] sm:$0xff]  ;;  %v1251_v39 = vld [vmem:[#allocation5 + $0x10] sm:$0xff] }
 0xea9   :  { %1416 = vmatpush.msra.mxu2 %v1253_v38 }
 0xeaa   :  { %2362 = vtanh.f32 %v1033_v60  ;;  %v2183_v36 = vmul.f32 -1.442695, %v1033_v60  ;;  %v2184_v48 = vmul.f32 -1.442695, %v1034_v40  ;;  %v1252_v60 = vld [vmem:[#allocation5 + $0x18] sm:$0xff] }
 0xeab   :  { %2364 = vtanh.f32 %v1034_v40  ;;  %v1249_v40 = vld [vmem:[#allocation5] sm:$0xff]  ;;  %1417 = vmatpush.msra.mxu2 %v1251_v39  ;;  %v1272_v39 = vld [vmem:[#allocation7 + $0x38] sm:$0xff] }
 0xeac   :  { %2366 = vpow2.f32 %v2183_v36  ;;  %1350 = vmatpush.msrb.mxu1 %v1272_v39 }
 0xead   :  { %2368 = vpow2.f32 %v2184_v48  ;;  %1418 = vmatpush.msra.mxu2 %v1249_v40  ;;  %v1241_v48 = vld [vmem:[#allocation3] sm:$0xff] }
 0xeae   :  { %v1265_v40 = vld [vmem:[#allocation7] sm:$0xff] }
 0xeaf   :  { %v1016_v42 = vpop.f32.mrf.mxu0  ;;  %v1029_v44 = vpop.f32.mrf.mxu1 }
 0xeb0   :  { %v2363_v47 = vpop.eup %2362  ;;  %v1250_v42 = vld [vmem:[#allocation5 + $0x8] sm:$0xff] }
 0xeb1   :  { %v2365_v55 = vpop.eup %2364  ;;  %1076 = vrot.lane.b32.xlu0 %v2363_v47, %s2523_s0 }
 0xeb2   :  { %1094 = vrot.lane.b32.xlu1 %v2365_v55, %s2523_s0  ;;  %v2367_v21 = vpop.eup %2366 }
 0xeb3   :  { %v2369_v49 = vpop.eup %2368  ;;  %v1041_v50 = vadd.f32 1.0, %v2367_v21  ;;  %v1242_v21 = vld [vmem:[#allocation3 + $0x8] sm:$0xff] }
 0xeb4   :  { %v1042_v52 = vadd.f32 1.0, %v2369_v49  ;;  %v1243_v49 = vld [vmem:[#allocation3 + $0x10] sm:$0xff] }
 0xeb5   :  { %2370 = vrcp.f32 %v1041_v50  ;;  %v1054_v5 = vand.u32 2147483648, %v1041_v50  ;;  %vm1048_vm12 = vweird.f32 %v1041_v50  ;;  %v1052_v9 = vand.u32 2147483647, %v1041_v50 }
 0xeb6   :  { %2372 = vrcp.f32 %v1042_v52  ;;  %v1069_v8 = vand.u32 2147483648, %v1042_v52  ;;  %vm1063_vm13 = vweird.f32 %v1042_v52  ;;  %v1067_v11 = vand.u32 2147483647, %v1042_v52 }
 0xeb7   :  { %v1055_v13 = vor.u32 1.1754944e-38, %v1054_v5  ;;  %vm1053_vm0 = vcmp.eq.f32.partialorder %v1052_v9, 8.507059e+37 }
 0xeb8   :  { %v1070_v14 = vor.u32 1.1754944e-38, %v1069_v8  ;;  %vm1068_vm1 = vcmp.eq.f32.partialorder %v1067_v11, 8.507059e+37 }
 0xebb   :  { %v2371_v45 = vpop.eup %2370 }
 0xebc   :  { %v2373_v53 = vpop.eup %2372  ;;  %v1044_v54 = vmul.f32 %v2371_v45, %v1041_v50  ;;  %vm1049_vm8 = vweird.f32 %v2371_v45  ;;  %v1244_v50 = vld [vmem:[#allocation3 + $0x18] sm:$0xff] }
 0xebd   :  { %v1059_v57 = vmul.f32 %v2373_v53, %v1042_v52  ;;  %vm1064_vm9 = vweird.f32 %v2373_v53  ;;  %vm1050_vm14 = vmor %vm1048_vm12, %vm1049_vm8  ;;  %v1245_v52 = vld [vmem:[#allocation3 + $0x20] sm:$0xff] }
 0xebe   :  { %v1045_v58 = vsub.f32 1.0, %v1044_v54  ;;  %vm1065_vm15 = vmor %vm1063_vm13, %vm1064_vm9  ;;  %v181_v54 = vadd.f32 %v2759_v41, %v2764_v43 }
 0xebf   :  { %v1060_v59 = vsub.f32 1.0, %v1059_v57 }
 0xec0   :  { %v1046_v61 = vmul.f32 %v2371_v45, %v1045_v58 }
 0xec1   :  { %v1061_v1 = vmul.f32 %v2373_v53, %v1060_v59 }
 0xec2   :  { %v1047_v2 = vadd.f32 %v2371_v45, %v1046_v61 }
 0xec3   :  { %v1062_v3 = vadd.f32 %v2373_v53, %v1061_v1 }
 0xec4   :  { %v1051_v51 = vsel %vm1050_vm14, %v2371_v45, %v1047_v2  ;;  %v1246_v45 = vld [vmem:[#allocation3 + $0x28] sm:$0xff] }
 0xec5   :  { %v1066_v12 = vsel %vm1065_vm15, %v2373_v53, %v1062_v3  ;;  %v1056_v18 = vsel %vm1053_vm0, %v1055_v13, %v1051_v51 }
 0xec6   :  { %v1071_v23 = vsel %vm1068_vm1, %v1070_v14, %v1066_v12  ;;  %v1073_v20 = vmul.f32 %v1056_v18, %v2952_v35 }
 0xec7   :  { %v1091_v25 = vmul.f32 %v1071_v23, %v2947_v15  ;;  %v1256_v15 = vld [vmem:[#allocation5 + $0x38] sm:$0xff] }
 0xec8   :  { %1456 = vmatpush.msra.mxu3 %v1256_v15 }
 0xeca   :  { %1457 = vmatpush.msra.mxu3 %v1254_v62 }
 0xecc   :  { %1458 = vmatpush.msra.mxu3 %v1252_v60  ;;  %v1270_v60 = vld [vmem:[#allocation7 + $0x28] sm:$0xff] }
 0xecd   :  { %1351 = vmatpush.msrb.mxu1 %v1270_v60 }
 0xece   :  { %1459 = vmatpush.msra.mxu3 %v1250_v42  ;;  %v1268_v42 = vld [vmem:[#allocation7 + $0x18] sm:$0xff] }
 0xecf   :  { %1352 = vmatpush.msrb.mxu1 %v1268_v42 }
 0xf23   :  { %v1077_v16 = vpop.permute.xlu0 %1076 }
 0xf24   :  { %v1095_v22 = vpop.permute.xlu1 %1094  ;;  %v1079_v24 = vmul.f32 %v1077_v16, %v1056_v18 }
 0xf25   :  { %v1097_v26 = vmul.f32 %v1095_v22, %v1071_v23 }
 0xf26   :  { %1081 = vrot.lane.b32.xlu2 %v1079_v24, %s2524_s2 }
 0xf27   :  { %1099 = vrot.lane.b32.xlu0 %v1097_v26, %s2524_s2 }
 0xf80   :  { %v1082_v31 = vpop.permute.xlu2 %1081 }
 0xf81   :  { %v2973_v32 = vadd.f32 %v1082_v31, %v1073_v20 }
 0xf83   :  { %2374 = vtanh.f32 %v2973_v32 }
 0xf89   :  { %v2375_v17 = vpop.eup %2374 }
 0xf8a   :  { %1087 = vrot.lane.b32.xlu1 %v2375_v17, %s2523_s0 }
 0xf99   :  { %v1100_v10 = vpop.permute.xlu0 %1099 }
 0xf9a   :  { %v2978_v29 = vadd.f32 %v1100_v10, %v1091_v25 }
 0xf9c   :  { %2376 = vtanh.f32 %v2978_v29 }
 0xfa2   :  { %v2377_v37 = vpop.eup %2376 }
 0xfa3   :  { %1105 = vrot.lane.b32.xlu2 %v2377_v37, %s2523_s0 }
 0xffc   :  { %v1088_v19 = vpop.permute.xlu1 %1087 }
 0xffd   :  { %v1106_v35 = vpop.permute.xlu2 %1105  ;;  %v1090_v6 = vmul.f32 %v1088_v19, %v1056_v18 }
 0xffe   :  { %v2982_v28 = vmul.f32 %v1106_v35, %v1071_v23 }
 0xfff   :  { %1110 = vrot.lane.b32.xlu0 %v1090_v6, %s2524_s2 }
0x1000   :  { %1114 = vrot.lane.b32.xlu1 %v2982_v28, %s2523_s0 }
0x1071   :  { %v1111_v44 = vpop.permute.xlu0 %1110 }
0x1072   :  { %1118 = vst.msk [vmem:[#allocation3 + $0x30] sm:$0xff] %vm384_vm10, %v1111_v44  ;;  %v1115_v47 = vpop.permute.xlu1 %1114 }
0x1073   :  { %v1117_v55 = vsel %vm384_vm10, %v1111_v44, %v1115_v47  ;;  %v1266_v44 = vld [vmem:[#allocation7 + $0x8] sm:$0xff] }
0x1074   :  { %v1123_v36 = vpack.c.bf16 %v1117_v55, %v1117_v55  ;;  %1353 = vmatpush.msrb.mxu1 %v1266_v44 }
0x1076   :  { %2185 = vmatmul.msk.bf16.vlgmr.msrb.gmra.mxu2 %vm268_vm11, %v1123_v36  ;;  %2186 = vmatmul.msk.bf16.vlgmr.msrb.gmra.mxu3 %vm268_vm11, %v1123_v36  ;;  %v2255_v36 = vld [vmem:[%s3214_s7] sm:$0xff] }
0x1079   :  { %v1247_v53 = vld [vmem:[#allocation3 + $0x30] sm:$0xff] }
0x1086   :  { %2205 = vmatmul.msk.f32.vlgmr.msra.gmra.mxu2 %vm384_vm10, %v1241_v48  ;;  %2213 = vmatmul.msk.f32.vlgmr.msra.gmra.mxu3 %vm384_vm10, %v1241_v48 }
0x108e   :  { %2206 = vmatmul.msk.f32.gmra.mxu2 %vm384_vm10, %v1242_v21  ;;  %2214 = vmatmul.msk.f32.gmra.mxu3 %vm384_vm10, %v1242_v21 }
0x1096   :  { %2207 = vmatmul.msk.f32.gmra.mxu2 %vm384_vm10, %v1243_v49  ;;  %2215 = vmatmul.msk.f32.gmra.mxu3 %vm384_vm10, %v1243_v49 }
0x109e   :  { %2208 = vmatmul.msk.f32.gmra.mxu2 %vm384_vm10, %v1244_v50  ;;  %2216 = vmatmul.msk.f32.gmra.mxu3 %vm384_vm10, %v1244_v50 }
0x10a6   :  { %2209 = vmatmul.msk.f32.gmra.mxu2 %vm384_vm10, %v1245_v52  ;;  %2217 = vmatmul.msk.f32.gmra.mxu3 %vm384_vm10, %v1245_v52 }
0x10ae   :  { %2210 = vmatmul.msk.f32.gmra.mxu2 %vm384_vm10, %v1246_v45  ;;  %2218 = vmatmul.msk.f32.gmra.mxu3 %vm384_vm10, %v1246_v45 }
0x10b6   :  { %2211 = vmatmul.msk.f32.gmra.mxu2 %vm384_vm10, %v1247_v53  ;;  %2219 = vmatmul.msk.f32.gmra.mxu3 %vm384_vm10, %v1247_v53 }
0x10f9   :  { %v3007_v57 = vpop.f32.mrf.mxu2  ;;  %v1149_v58 = vpop.f32.mrf.mxu3 }
0x10fa   :  { %v1156_v59 = vadd.f32 %v1149_v58, %v181_v54 }
0x10fc   :  { %2378 = vtanh.f32 %v1156_v59  ;;  %v2188_v51 = vmul.f32 -1.442695, %v1156_v59 }
0x10fe   :  { %2380 = vpow2.f32 %v2188_v51 }
0x1101   :  { %v1138_v61 = vpop.f32.mrf.mxu2  ;;  %v1151_v1 = vpop.f32.mrf.mxu3 }
0x1102   :  { %v2379_v2 = vpop.eup %2378 }
0x1103   :  { %1216 = vrot.lane.b32.xlu2 %v2379_v2, %s2523_s0 }
0x1104   :  { %v2381_v41 = vpop.eup %2380 }
0x1105   :  { %v1164_v43 = vadd.f32 1.0, %v2381_v41 }
0x1107   :  { %2382 = vrcp.f32 %v1164_v43  ;;  %v1191_v24 = vand.u32 2147483648, %v1164_v43  ;;  %vm1185_vm2 = vweird.f32 %v1164_v43  ;;  %v1189_v26 = vand.u32 2147483647, %v1164_v43 }
0x1109   :  { %v1461_v3 = vpop.f32.mrf.mxu3  ;;  %v1192_v31 = vor.u32 1.1754944e-38, %v1191_v24  ;;  %vm1190_vm4 = vcmp.eq.f32.partialorder %v1189_v26, 8.507059e+37 }
0x110d   :  { %v2383_v14 = vpop.eup %2382 }
0x110e   :  { %v1181_v16 = vmul.f32 %v2383_v14, %v1164_v43  ;;  %vm1186_vm11 = vweird.f32 %v2383_v14  ;;  %v3076_v43 = vld [vmem:[%s3213_s6] sm:$0x3]  ;;  %s2525_s6 = smov 96  }
0x110f   :  { %vm1187_vm3 = vmor %vm1185_vm2, %vm1186_vm11 }
0x1110   :  { %v1182_v18 = vsub.f32 1.0, %v1181_v16 }
0x1111   :  { %v1464_v5 = vpop.f32.mrf.mxu3 }
0x1112   :  { %v1183_v22 = vmul.f32 %v2383_v14, %v1182_v18  ;;  %v3079_v18 = vperm.slane %v3076_v43, 0 }
0x1114   :  { %v1184_v23 = vadd.f32 %v2383_v14, %v1183_v22 }
0x1116   :  { %v1188_v20 = vsel %vm1187_vm3, %v2383_v14, %v1184_v23  ;;  %v1420_v14 = vpop.f32.mrf.mxu2 }
0x1117   :  { %v1193_v25 = vsel %vm1190_vm4, %v1192_v31, %v1188_v20 }
0x1118   :  { %v1213_v37 = vmul.f32 %v1193_v25, %v2978_v29  ;;  %v1269_v29 = vld [vmem:[#allocation7 + $0x20] sm:$0xff] }
0x1119   :  { %v1467_v8 = vpop.f32.mrf.mxu3 }
0x1121   :  { %v1470_v9 = vpop.f32.mrf.mxu3 }
0x1129   :  { %v1473_v11 = vpop.f32.mrf.mxu3 }
0x1131   :  { %v1476_v12 = vpop.f32.mrf.mxu3 }
0x1139   :  { %v1479_v13 = vpop.f32.mrf.mxu3 }
0x115d   :  { %v1217_v17 = vpop.permute.xlu2 %1216 }
0x115e   :  { %v1219_v10 = vmul.f32 %v1217_v17, %v1193_v25 }
0x1160   :  { %1221 = vrot.lane.b32.xlu0 %v1219_v10, %s2524_s2 }
0x1168   :  { %1119 = vrot.lane.b32.xlu0 %v2982_v28, %s2524_s2 }
0x1170   :  { %753 = vrot.lane.b32.xlu0 %v2899_v27, %s2524_s2 }
0x1178   :  { %387 = vrot.lane.b32.xlu0 %v2801_v63, %s2524_s2  ;;  %v1271_v63 = vld [vmem:[#allocation7 + $0x30] sm:$0xff] }
0x1179   :  { %1309 = vmatpush.msrb.mxu0 %v1271_v63  ;;  %v161_v63 = vadd.f32 %v2912_v4, %v2769_v46 }
0x117b   :  { %1310 = vmatpush.msrb.mxu0 %v1269_v29 }
0x11d2   :  { %v1222_v19 = vpop.permute.xlu0 %1221 }
0x11d3   :  { %v1224_v35 = vadd.f32 %v1222_v19, %v1213_v37 }
0x11d5   :  { %2384 = vtanh.f32 %v1224_v35 }
0x11da   :  { %v1120_v6 = vpop.permute.xlu0 %1119 }
0x11db   :  { %v2385_v33 = vpop.eup %2384  ;;  %1122 = vst.msk [vmem:[#allocation4 + $0x8] sm:$0xff] %vm384_vm10, %v1120_v6 }
0x11dc   :  { %1227 = vrot.lane.b32.xlu1 %v2385_v33, %s2523_s0 }
0x11e2   :  { %v754_v15 = vpop.permute.xlu0 %753  ;;  %v1258_v21 = vld [vmem:[#allocation4 + $0x8] sm:$0xff] }
0x11e3   :  { %756 = vst.msk [vmem:[#allocation4 + $0x20] sm:$0xff] %vm384_vm10, %v754_v15 }
0x11e4   :  { %997 = vrot.lane.b32.xlu1 %v2956_v30, %s2524_s2 }
0x11ea   :  { %v388_v27 = vpop.permute.xlu0 %387  ;;  %v1261_v52 = vld [vmem:[#allocation4 + $0x20] sm:$0xff] }
0x11eb   :  { %390 = vst.msk [vmem:[#allocation4 + $0x38] sm:$0xff] %vm384_vm10, %v388_v27 }
0x11ec   :  { %631 = vrot.lane.b32.xlu1 %v2866_v0, %s2524_s2  ;;  %v1267_v0 = vld [vmem:[#allocation7 + $0x10] sm:$0xff] }
0x11ed   :  { %1311 = vmatpush.msrb.mxu0 %v1267_v0 }
0x11ef   :  { %1312 = vmatpush.msrb.mxu0 %v1265_v40 }
0x11f2   :  { %v1264_v54 = vld [vmem:[#allocation4 + $0x38] sm:$0xff] }
0x124e   :  { %v1228_v28 = vpop.permute.xlu1 %1227 }
0x124f   :  { %v1230_v38 = vmul.f32 %v1228_v28, %v1193_v25  ;;  %v1155_v28 = vadd.f32 %v3007_v57, %v161_v63 }
0x1251   :  { %1237 = vrot.lane.b32.xlu2 %v1230_v38, %s2524_s2  ;;  %v2187_v4 = vmul.f32 -1.442695, %v1155_v28 }
0x1256   :  { %v998_v62 = vpop.permute.xlu1 %997 }
0x1257   :  { %1000 = vst.msk [vmem:[#allocation4 + $0x10] sm:$0xff] %vm384_vm10, %v998_v62 }
0x1259   :  { %875 = vrot.lane.b32.xlu2 %v2930_v7, %s2524_s2  ;;  %v2256_v7 = vld [vmem:[%s3214_s7 + $0x8] sm:$0xff] }
0x125a   :  { %1548 = vmatpush.bf16.msra.mxu0 %v2256_v7  ;;  %1607 = vmatpush.bf16.msra.mxu1 %v2256_v7 }
0x125b   :  { %1666 = vmatpush.bf16.msrb.mxu2 %v2256_v7  ;;  %1725 = vmatpush.bf16.msrb.mxu3 %v2256_v7 }
0x125e   :  { %v632_v30 = vpop.permute.xlu1 %631  ;;  %1549 = vmatpush.bf16.msra.mxu0 %v2255_v36  ;;  %1608 = vmatpush.bf16.msra.mxu1 %v2255_v36  ;;  %v1259_v49 = vld [vmem:[#allocation4 + $0x10] sm:$0xff] }
0x125f   :  { %634 = vst.msk [vmem:[#allocation4 + $0x28] sm:$0xff] %vm384_vm10, %v632_v30  ;;  %1667 = vmatpush.bf16.msrb.mxu2 %v2255_v36  ;;  %1726 = vmatpush.bf16.msrb.mxu3 %v2255_v36 }
0x1261   :  { %509 = vrot.lane.b32.xlu2 %v2833_v56, %s2524_s2 }
0x1263   :  { %1902 = vmatpush.bf16.msra.mxu2 %v2256_v7  ;;  %1961 = vmatpush.bf16.msra.mxu3 %v2256_v7 }
0x1266   :  { %v1262_v45 = vld [vmem:[#allocation4 + $0x28] sm:$0xff] }
0x1267   :  { %1903 = vmatpush.bf16.msra.mxu2 %v2255_v36  ;;  %1962 = vmatpush.bf16.msra.mxu3 %v2255_v36 }
0x12ab   :  { %v1238_v56 = vpop.permute.xlu2 %1237 }
0x12ac   :  { %1240 = vst.msk [vmem:[#allocation4] sm:$0xff] %vm384_vm10, %v1238_v56 }
0x12b3   :  { %v876_v47 = vpop.permute.xlu2 %875  ;;  %v1257_v55 = vld [vmem:[#allocation4] sm:$0xff] }
0x12b4   :  { %878 = vst.msk [vmem:[#allocation4 + $0x18] sm:$0xff] %vm384_vm10, %v876_v47  ;;  %2189 = vmatmul.msk.f32.vlgmr.msrb.gmra.mxu0 %vm384_vm10, %v1257_v55  ;;  %2197 = vmatmul.msk.f32.vlgmr.msrb.gmra.mxu1 %vm384_vm10, %v1257_v55 }
0x12b5   :  { %1784 = vmatpush.bf16.msrb.mxu0 %v2256_v7  ;;  %1843 = vmatpush.bf16.msrb.mxu1 %v2256_v7 }
0x12b9   :  { %1785 = vmatpush.bf16.msrb.mxu0 %v2255_v36  ;;  %1844 = vmatpush.bf16.msrb.mxu1 %v2255_v36 }
0x12bb   :  { %v510_v48 = vpop.permute.xlu2 %509  ;;  %v1260_v50 = vld [vmem:[#allocation4 + $0x18] sm:$0xff] }
0x12bc   :  { %512 = vst.msk [vmem:[#allocation4 + $0x30] sm:$0xff] %vm384_vm10, %v510_v48  ;;  %2190 = vmatmul.msk.f32.gmra.mxu0 %vm384_vm10, %v1258_v21  ;;  %2198 = vmatmul.msk.f32.gmra.mxu1 %vm384_vm10, %v1258_v21 }
0x12c3   :  { %v1263_v53 = vld [vmem:[#allocation4 + $0x30] sm:$0xff] }
0x12c4   :  { %2191 = vmatmul.msk.f32.gmra.mxu0 %vm384_vm10, %v1259_v49  ;;  %2199 = vmatmul.msk.f32.gmra.mxu1 %vm384_vm10, %v1259_v49 }
0x12cc   :  { %2192 = vmatmul.msk.f32.gmra.mxu0 %vm384_vm10, %v1260_v50  ;;  %2200 = vmatmul.msk.f32.gmra.mxu1 %vm384_vm10, %v1260_v50 }
0x12d4   :  { %2193 = vmatmul.msk.f32.gmra.mxu0 %vm384_vm10, %v1261_v52  ;;  %2201 = vmatmul.msk.f32.gmra.mxu1 %vm384_vm10, %v1261_v52 }
0x12dc   :  { %2194 = vmatmul.msk.f32.gmra.mxu0 %vm384_vm10, %v1262_v45  ;;  %2202 = vmatmul.msk.f32.gmra.mxu1 %vm384_vm10, %v1262_v45 }
0x12e4   :  { %2195 = vmatmul.msk.f32.gmra.mxu0 %vm384_vm10, %v1263_v53  ;;  %2203 = vmatmul.msk.f32.gmra.mxu1 %vm384_vm10, %v1263_v53 }
0x12ec   :  { %2196 = vmatmul.msk.f32.gmra.mxu0 %vm384_vm10, %v1264_v54  ;;  %2204 = vmatmul.msk.f32.gmra.mxu1 %vm384_vm10, %v1264_v54 }
0x12f4   :  { %1550 = vmatmul.bf16.vlgmr.msra.gmra.mxu0 %v2522_v34 }
0x1331   :  { %v1314_v58 = vpop.f32.mrf.mxu0  ;;  %v1355_v59 = vpop.f32.mrf.mxu1 }
0x1332   :  { %v1421_v16 = vadd.f32 %v1420_v14, %v1314_v58 }
0x1334   :  { %v1491_v22 = vadd.f32 %v3079_v18, %v1421_v16 }
0x1339   :  { %v3059_v61 = vpop.f32.mrf.mxu0  ;;  %v1358_v1 = vpop.f32.mrf.mxu1 }
0x1341   :  { %v3061_v2 = vpop.f32.mrf.mxu0  ;;  %v1361_v3 = vpop.f32.mrf.mxu1 }
0x1342   :  { %v1423_v3 = vpop.f32.mrf.mxu2 }
0x1349   :  { %v3063_v5 = vpop.f32.mrf.mxu0  ;;  %v1364_v8 = vpop.f32.mrf.mxu1 }
0x134a   :  { %v1424_v8 = vadd.f32 %v1423_v3, %v3059_v61 }
0x1351   :  { %v3065_v9 = vpop.f32.mrf.mxu0  ;;  %v1367_v11 = vpop.f32.mrf.mxu1 }
0x1352   :  { %v1493_v11 = vadd.f32 %v3079_v18, %v1424_v8 }
0x1359   :  { %v3067_v51 = vpop.f32.mrf.mxu0  ;;  %v1370_v12 = vpop.f32.mrf.mxu1 }
0x1361   :  { %v3069_v13 = vpop.f32.mrf.mxu0  ;;  %v1373_v34 = vpop.f32.mrf.mxu1 }
0x1369   :  { %v3071_v41 = vpop.f32.mrf.mxu0  ;;  %v3095_v1 = vpop.f32.mrf.mxu1 }
0x1371   :  { %v1551_v23 = vpop.f32.mrf.mxu0 }
0x1372   :  { %v1555_v24 = vadd.f32 %v1551_v23, %v1491_v22 }
0x1374   :  { %2386 = vtanh.f32 %v1555_v24  ;;  %v2229_v31 = vmul.f32 -1.442695, %v1555_v24 }
0x1376   :  { %2388 = vpow2.f32 %v2229_v31 }
0x1379   :  { %v1553_v26 = vpop.f32.mrf.mxu0 }
0x137a   :  { %v2387_v20 = vpop.eup %2386 }
0x137b   :  { %1578 = vrot.lane.b32.xlu1 %v2387_v20, %s2523_s0 }
0x137c   :  { %v2389_v17 = vpop.eup %2388 }
0x137d   :  { %v1559_v25 = vadd.f32 1.0, %v2389_v17 }
0x137f   :  { %2390 = vrcp.f32 %v1559_v25  ;;  %v1571_v33 = vand.u32 2147483648, %v1559_v25  ;;  %vm1565_vm6 = vweird.f32 %v1559_v25  ;;  %v1569_v15 = vand.u32 2147483647, %v1559_v25 }
0x1380   :  { %2392 = vtanh.f32 %v1155_v28 }
0x1381   :  { %v1572_v29 = vor.u32 1.1754944e-38, %v1571_v33  ;;  %vm1570_vm8 = vcmp.eq.f32.partialorder %v1569_v15, 8.507059e+37 }
0x1385   :  { %v2391_v10 = vpop.eup %2390 }
0x1386   :  { %v1561_v37 = vmul.f32 %v2391_v10, %v1559_v25  ;;  %vm1566_vm5 = vweird.f32 %v2391_v10  ;;  %v2393_v0 = vpop.eup %2392 }
0x1387   :  { %vm1567_vm7 = vmor %vm1565_vm6, %vm1566_vm5 }
0x1388   :  { %v1562_v19 = vsub.f32 1.0, %v1561_v37 }
0x138a   :  { %v1563_v35 = vmul.f32 %v2391_v10, %v1562_v19 }
0x138c   :  { %v1564_v6 = vadd.f32 %v2391_v10, %v1563_v35 }
0x138e   :  { %v1568_v27 = vsel %vm1567_vm7, %v2391_v10, %v1564_v6 }
0x138f   :  { %v1573_v62 = vsel %vm1570_vm8, %v1572_v29, %v1568_v27 }
0x1390   :  { %v1575_v39 = vmul.f32 0.0, %v1573_v62 }
0x13ed   :  { %v1579_v38 = vpop.permute.xlu1 %1578 }
0x13ee   :  { %v1581_v30 = vmul.f32 %v1579_v38, %v1573_v62 }
0x13f0   :  { %1583 = vrot.lane.b32.xlu2 %v1581_v30, %s2524_s2 }
0x13f8   :  { %1198 = vrot.lane.b32.xlu2 %v2393_v0, %s2523_s0 }
0x144a   :  { %v1584_v60 = vpop.permute.xlu2 %1583 }
0x144b   :  { %v3088_v40 = vadd.f32 %v1584_v60, %v1575_v39 }
0x144d   :  { %2394 = vtanh.f32 %v3088_v40 }
0x144e   :  { %2396 = vpow2.f32 %v2187_v4 }
0x1452   :  { %v1199_v53 = vpop.permute.xlu2 %1198 }
0x1453   :  { %v2395_v46 = vpop.eup %2394 }
0x1454   :  { %1589 = vrot.lane.b32.xlu0 %v2395_v46, %s2523_s0  ;;  %v2397_v57 = vpop.eup %2396 }
0x1455   :  { %v1163_v42 = vadd.f32 1.0, %v2397_v57 }
0x1457   :  { %2398 = vrcp.f32 %v1163_v42  ;;  %v1176_v49 = vand.u32 2147483648, %v1163_v42  ;;  %vm1170_vm12 = vweird.f32 %v1163_v42  ;;  %v1174_v50 = vand.u32 2147483647, %v1163_v42 }
0x1459   :  { %v1177_v45 = vor.u32 1.1754944e-38, %v1176_v49  ;;  %vm1175_vm14 = vcmp.eq.f32.partialorder %v1174_v50, 8.507059e+37 }
0x145d   :  { %v2399_v44 = vpop.eup %2398 }
0x145e   :  { %v1166_v7 = vmul.f32 %v2399_v44, %v1163_v42  ;;  %vm1171_vm9 = vweird.f32 %v2399_v44  ;;  %v1426_v42 = vpop.f32.mrf.mxu2 }
0x145f   :  { %vm1172_vm13 = vmor %vm1170_vm12, %vm1171_vm9 }
0x1460   :  { %v1167_v56 = vsub.f32 1.0, %v1166_v7 }
0x1462   :  { %v1168_v47 = vmul.f32 %v2399_v44, %v1167_v56 }
0x1464   :  { %v1169_v48 = vadd.f32 %v2399_v44, %v1168_v47 }
0x1466   :  { %v1173_v52 = vsel %vm1172_vm13, %v2399_v44, %v1169_v48  ;;  %v1429_v44 = vpop.f32.mrf.mxu2 }
0x1467   :  { %v1178_v54 = vsel %vm1175_vm14, %v1177_v45, %v1173_v52 }
0x1468   :  { %v1201_v58 = vmul.f32 %v1199_v53, %v1178_v54  ;;  %v1195_v16 = vmul.f32 %v1178_v54, %v2973_v32 }
0x146e   :  { %v3111_v7 = vpop.f32.mrf.mxu2 }
0x1476   :  { %v3113_v56 = vpop.f32.mrf.mxu2 }
0x147e   :  { %v3115_v47 = vpop.f32.mrf.mxu2 }
0x14c6   :  { %v1590_v55 = vpop.permute.xlu0 %1589 }
0x14c7   :  { %v1592_v36 = vmul.f32 %v1590_v55, %v1573_v62 }
0x14c9   :  { %v1594_v21 = vpack.c.bf16 %v1592_v36, %v1592_v36  ;;  %v1427_v36 = vadd.f32 %v1426_v42, %v3061_v2 }
0x14cb   :  { %1596 = vrot.lane.b32.xlu1 %v1594_v21, %s2524_s2  ;;  %v1495_v48 = vadd.f32 %v3079_v18, %v1427_v36 }
0x14d3   :  { %1203 = vrot.lane.b32.xlu1 %v1201_v58, %s2524_s2 }
0x153d   :  { %v1597_v59 = vpop.permute.xlu1 %1596 }
0x153e   :  { %2230 = vmatmul.msk.bf16.vlgmr.msra.gmra.mxu1 %vm384_vm10, %v1597_v59 }
0x1545   :  { %v1204_v14 = vpop.permute.xlu1 %1203 }
0x1546   :  { %v1206_v22 = vadd.f32 %v1204_v14, %v1195_v16 }
0x15bb   :  { %v1610_v12 = vpop.f32.mrf.mxu1 }
0x15bc   :  { %v1614_v34 = vadd.f32 %v1610_v12, %v1493_v11 }
0x15be   :  { %2400 = vtanh.f32 %v1614_v34  ;;  %v2231_v20 = vmul.f32 -1.442695, %v1614_v34 }
0x15bf   :  { %2402 = vtanh.f32 %v1206_v22 }
0x15c0   :  { %2404 = vpow2.f32 %v2231_v20 }
0x15c3   :  { %v1612_v23 = vpop.f32.mrf.mxu1 }
0x15c4   :  { %v2401_v24 = vpop.eup %2400 }
0x15c5   :  { %1637 = vrot.lane.b32.xlu0 %v2401_v24, %s2523_s0  ;;  %v2403_v26 = vpop.eup %2402 }
0x15c6   :  { %v2405_v61 = vpop.eup %2404 }
0x15c7   :  { %v1618_v31 = vadd.f32 1.0, %v2405_v61 }
0x15c9   :  { %2406 = vrcp.f32 %v1618_v31  ;;  %v1630_v32 = vand.u32 2147483648, %v1618_v31  ;;  %vm1624_vm0 = vweird.f32 %v1618_v31  ;;  %v1628_v35 = vand.u32 2147483647, %v1618_v31 }
0x15cb   :  { %v1631_v33 = vor.u32 1.1754944e-38, %v1630_v32  ;;  %vm1629_vm11 = vcmp.eq.f32.partialorder %v1628_v35, 8.507059e+37 }
0x15cd   :  { %1209 = vrot.lane.b32.xlu0 %v2403_v26, %s2523_s0 }
0x15cf   :  { %v2407_v17 = vpop.eup %2406 }
0x15d0   :  { %v1620_v25 = vmul.f32 %v2407_v17, %v1618_v31  ;;  %vm1625_vm15 = vweird.f32 %v2407_v17 }
0x15d1   :  { %vm1626_vm1 = vmor %vm1624_vm0, %vm1625_vm15 }
0x15d2   :  { %v1621_v10 = vsub.f32 1.0, %v1620_v25 }
0x15d4   :  { %v1622_v37 = vmul.f32 %v2407_v17, %v1621_v10 }
0x15d6   :  { %v1623_v19 = vadd.f32 %v2407_v17, %v1622_v37 }
0x15d8   :  { %v1627_v6 = vsel %vm1626_vm1, %v2407_v17, %v1623_v19  ;;  %v1430_v19 = vadd.f32 %v1429_v44, %v3063_v5 }
0x15d9   :  { %v1632_v27 = vsel %vm1629_vm11, %v1631_v33, %v1627_v6 }
0x15da   :  { %v1634_v38 = vmul.f32 %v1632_v27, %v3088_v40  ;;  %v1497_v32 = vadd.f32 %v3079_v18, %v1430_v19 }
0x1637   :  { %v1638_v15 = vpop.permute.xlu0 %1637 }
0x1638   :  { %v1640_v63 = vmul.f32 %v1638_v15, %v1632_v27 }
0x163a   :  { %1642 = vrot.lane.b32.xlu2 %v1640_v63, %s2524_s2 }
0x163f   :  { %v1210_v29 = vpop.permute.xlu0 %1209 }
0x1640   :  { %v1212_v28 = vmul.f32 %v1210_v29, %v1178_v54 }
0x1642   :  { %1232 = vrot.lane.b32.xlu2 %v1212_v28, %s2524_s2 }
0x1694   :  { %v1643_v62 = vpop.permute.xlu2 %1642 }
0x1695   :  { %v1645_v30 = vadd.f32 %v1643_v62, %v1634_v38 }
0x1697   :  { %2408 = vtanh.f32 %v1645_v30 }
0x169c   :  { %v1233_v0 = vpop.permute.xlu2 %1232 }
0x169d   :  { %v2409_v39 = vpop.eup %2408  ;;  %1235 = vst.msk [vmem:[#allocation3 + $0x38] sm:$0xff] %vm384_vm10, %v1233_v0 }
0x169e   :  { %1648 = vrot.lane.b32.xlu1 %v2409_v39, %s2523_s0 }
0x16a4   :  { %v1248_v60 = vld [vmem:[#allocation3 + $0x38] sm:$0xff] }
0x16a5   :  { %2212 = vmatmul.msk.f32.gmra.mxu2 %vm384_vm10, %v1248_v60  ;;  %2220 = vmatmul.msk.f32.gmra.mxu3 %vm384_vm10, %v1248_v60 }
0x1710   :  { %v1649_v46 = vpop.permute.xlu1 %1648 }
0x1711   :  { %v1651_v4 = vmul.f32 %v1649_v46, %v1632_v27 }
0x1713   :  { %v1653_v57 = vpack.c.bf16 %v1651_v4, %v1651_v4 }
0x1715   :  { %1655 = vrot.lane.b32.xlu0 %v1653_v57, %s2524_s2 }
0x1728   :  { %v3117_v55 = vpop.f32.mrf.mxu2  ;;  %v3126_v37 = vpop.f32.mrf.mxu3 }
0x1787   :  { %v1656_v40 = vpop.permute.xlu0 %1655 }
0x1788   :  { %2232 = vmatmul.msk.bf16.vlgmr.msrb.gmra.mxu2 %vm384_vm10, %v1656_v40 }
0x180b   :  { %v1669_v21 = vpop.f32.mrf.mxu2 }
0x180c   :  { %v1673_v49 = vadd.f32 %v1669_v21, %v1495_v48 }
0x180e   :  { %2410 = vtanh.f32 %v1673_v49  ;;  %v2233_v45 = vmul.f32 -1.442695, %v1673_v49 }
0x1810   :  { %2412 = vpow2.f32 %v2233_v45  ;;  %v1433_v45 = vadd.f32 %v3111_v7, %v3065_v9 }
0x1813   :  { %v1671_v50 = vpop.f32.mrf.mxu2 }
0x1814   :  { %v2411_v52 = vpop.eup %2410 }
0x1815   :  { %1696 = vrot.lane.b32.xlu1 %v2411_v52, %s2523_s0 }
0x1816   :  { %v2413_v53 = vpop.eup %2412 }
0x1817   :  { %v1677_v54 = vadd.f32 1.0, %v2413_v53  ;;  %v1499_v53 = vadd.f32 %v3079_v18, %v1433_v45 }
0x1819   :  { %2414 = vrcp.f32 %v1677_v54  ;;  %v1689_v2 = vand.u32 2147483648, %v1677_v54  ;;  %vm1683_vm3 = vweird.f32 %v1677_v54  ;;  %v1687_v12 = vand.u32 2147483647, %v1677_v54 }
0x181b   :  { %v1690_v14 = vor.u32 1.1754944e-38, %v1689_v2  ;;  %vm1688_vm5 = vcmp.eq.f32.partialorder %v1687_v12, 8.507059e+37 }
0x181f   :  { %v2415_v58 = vpop.eup %2414 }
0x1820   :  { %v1679_v59 = vmul.f32 %v2415_v58, %v1677_v54  ;;  %vm1684_vm2 = vweird.f32 %v2415_v58 }
0x1821   :  { %vm1685_vm4 = vmor %vm1683_vm3, %vm1684_vm2 }
0x1822   :  { %v1680_v3 = vsub.f32 1.0, %v1679_v59 }
0x1824   :  { %v1681_v8 = vmul.f32 %v2415_v58, %v1680_v3 }
0x1826   :  { %v1682_v11 = vadd.f32 %v2415_v58, %v1681_v8 }
0x1828   :  { %v1686_v34 = vsel %vm1685_vm4, %v2415_v58, %v1682_v11 }
0x1829   :  { %v1691_v22 = vsel %vm1688_vm5, %v1690_v14, %v1686_v34 }
0x182a   :  { %v1693_v24 = vmul.f32 %v1691_v22, %v1645_v30 }
0x1887   :  { %v1697_v16 = vpop.permute.xlu1 %1696 }
0x1888   :  { %v1699_v23 = vmul.f32 %v1697_v16, %v1691_v22 }
0x188a   :  { %1701 = vrot.lane.b32.xlu2 %v1699_v23, %s2524_s2 }
0x18e4   :  { %v1702_v26 = vpop.permute.xlu2 %1701 }
0x18e5   :  { %v1704_v20 = vadd.f32 %v1702_v26, %v1693_v24 }
0x18e7   :  { %2416 = vtanh.f32 %v1704_v20 }
0x18ed   :  { %v2417_v61 = vpop.eup %2416 }
0x18ee   :  { %1707 = vrot.lane.b32.xlu0 %v2417_v61, %s2523_s0 }
0x1960   :  { %v1708_v31 = vpop.permute.xlu0 %1707 }
0x1961   :  { %v1710_v17 = vmul.f32 %v1708_v31, %v1691_v22 }
0x1963   :  { %v1712_v25 = vpack.c.bf16 %v1710_v17, %v1710_v17 }
0x1965   :  { %1714 = vrot.lane.b32.xlu1 %v1712_v25, %s2524_s2 }
0x19d7   :  { %v1715_v10 = vpop.permute.xlu1 %1714 }
0x19d8   :  { %2234 = vmatmul.msk.bf16.vlgmr.msrb.gmra.mxu3 %vm384_vm10, %v1715_v10 }
0x1a5b   :  { %v1728_v35 = vpop.f32.mrf.mxu3 }
0x1a5c   :  { %v1732_v6 = vadd.f32 %v1728_v35, %v1497_v32 }
0x1a5e   :  { %2418 = vtanh.f32 %v1732_v6  ;;  %v2235_v27 = vmul.f32 -1.442695, %v1732_v6 }
0x1a60   :  { %2420 = vpow2.f32 %v2235_v27 }
0x1a63   :  { %v1730_v33 = vpop.f32.mrf.mxu3 }
0x1a64   :  { %v2419_v15 = vpop.eup %2418  ;;  %v1436_v33 = vadd.f32 %v3113_v56, %v3067_v51 }
0x1a65   :  { %1755 = vrot.lane.b32.xlu2 %v2419_v15, %s2523_s0 }
0x1a66   :  { %v2421_v63 = vpop.eup %2420  ;;  %v1501_v15 = vadd.f32 %v3079_v18, %v1436_v33 }
0x1a67   :  { %v1736_v29 = vadd.f32 1.0, %v2421_v63 }
0x1a69   :  { %2422 = vrcp.f32 %v1736_v29  ;;  %v1748_v5 = vand.u32 2147483648, %v1736_v29  ;;  %vm1742_vm7 = vweird.f32 %v1736_v29  ;;  %v1746_v39 = vand.u32 2147483647, %v1736_v29 }
0x1a6b   :  { %v1749_v46 = vor.u32 1.1754944e-38, %v1748_v5  ;;  %vm1747_vm9 = vcmp.eq.f32.partialorder %v1746_v39, 8.507059e+37 }
0x1a6f   :  { %v2423_v28 = vpop.eup %2422 }
0x1a70   :  { %v1738_v38 = vmul.f32 %v2423_v28, %v1736_v29  ;;  %vm1743_vm6 = vweird.f32 %v2423_v28 }
0x1a71   :  { %vm1744_vm8 = vmor %vm1742_vm7, %vm1743_vm6 }
0x1a72   :  { %v1739_v62 = vsub.f32 1.0, %v1738_v38 }
0x1a74   :  { %v1740_v30 = vmul.f32 %v2423_v28, %v1739_v62 }
0x1a76   :  { %v1741_v0 = vadd.f32 %v2423_v28, %v1740_v30 }
0x1a78   :  { %v1745_v60 = vsel %vm1744_vm8, %v2423_v28, %v1741_v0 }
0x1a79   :  { %v1750_v57 = vsel %vm1747_vm9, %v1749_v46, %v1745_v60 }
0x1a7a   :  { %v1752_v42 = vmul.f32 %v1750_v57, %v1704_v20 }
0x1abf   :  { %v1756_v4 = vpop.permute.xlu2 %1755 }
0x1ac0   :  { %v1758_v40 = vmul.f32 %v1756_v4, %v1750_v57 }
0x1ac2   :  { %1760 = vrot.lane.b32.xlu0 %v1758_v40, %s2524_s2 }
0x1b34   :  { %v1761_v44 = vpop.permute.xlu0 %1760 }
0x1b35   :  { %v1763_v36 = vadd.f32 %v1761_v44, %v1752_v42 }
0x1b37   :  { %2424 = vtanh.f32 %v1763_v36 }
0x1b3d   :  { %v2425_v48 = vpop.eup %2424 }
0x1b3e   :  { %1766 = vrot.lane.b32.xlu1 %v2425_v48, %s2523_s0 }
0x1bb0   :  { %v1767_v21 = vpop.permute.xlu1 %1766 }
0x1bb1   :  { %v1769_v49 = vmul.f32 %v1767_v21, %v1750_v57 }
0x1bb3   :  { %v1771_v50 = vpack.c.bf16 %v1769_v49, %v1769_v49 }
0x1bb5   :  { %1773 = vrot.lane.b32.xlu2 %v1771_v50, %s2524_s2 }
0x1c0f   :  { %v1774_v52 = vpop.permute.xlu2 %1773 }
0x1c10   :  { %2236 = vmatmul.msk.bf16.vlgmr.msrb.gmra.mxu0 %vm384_vm10, %v1774_v52 }
0x1c8d   :  { %v1787_v54 = vpop.f32.mrf.mxu0 }
0x1c8e   :  { %v1791_v58 = vadd.f32 %v1787_v54, %v1499_v53  ;;  %v1439_v54 = vadd.f32 %v3115_v47, %v3069_v13 }
0x1c90   :  { %2426 = vtanh.f32 %v1791_v58  ;;  %v2237_v8 = vmul.f32 -1.442695, %v1791_v58  ;;  %v1503_v58 = vadd.f32 %v3079_v18, %v1439_v54 }
0x1c92   :  { %2428 = vpow2.f32 %v2237_v8 }
0x1c95   :  { %v1789_v59 = vpop.f32.mrf.mxu0 }
0x1c96   :  { %v2427_v3 = vpop.eup %2426 }
0x1c97   :  { %1814 = vrot.lane.b32.xlu0 %v2427_v3, %s2523_s0 }
0x1c98   :  { %v2429_v11 = vpop.eup %2428 }
0x1c99   :  { %v1795_v2 = vadd.f32 1.0, %v2429_v11 }
0x1c9b   :  { %2430 = vrcp.f32 %v1795_v2  ;;  %v1807_v9 = vand.u32 2147483648, %v1795_v2  ;;  %vm1801_vm13 = vweird.f32 %v1795_v2  ;;  %v1805_v7 = vand.u32 2147483647, %v1795_v2 }
0x1c9d   :  { %v1808_v24 = vor.u32 1.1754944e-38, %v1807_v9  ;;  %vm1806_vm15 = vcmp.eq.f32.partialorder %v1805_v7, 8.507059e+37 }
0x1ca1   :  { %v2431_v12 = vpop.eup %2430 }
0x1ca2   :  { %v1797_v34 = vmul.f32 %v2431_v12, %v1795_v2  ;;  %vm1802_vm12 = vweird.f32 %v2431_v12 }
0x1ca3   :  { %vm1803_vm14 = vmor %vm1801_vm13, %vm1802_vm12 }
0x1ca4   :  { %v1798_v14 = vsub.f32 1.0, %v1797_v34 }
0x1ca6   :  { %v1799_v16 = vmul.f32 %v2431_v12, %v1798_v14 }
0x1ca8   :  { %v1800_v22 = vadd.f32 %v2431_v12, %v1799_v16 }
0x1caa   :  { %v1804_v23 = vsel %vm1803_vm14, %v2431_v12, %v1800_v22 }
0x1cab   :  { %v1809_v20 = vsel %vm1806_vm15, %v1808_v24, %v1804_v23 }
0x1cac   :  { %v1811_v31 = vmul.f32 %v1809_v20, %v1763_v36 }
0x1d09   :  { %v1815_v26 = vpop.permute.xlu0 %1814 }
0x1d0a   :  { %v1817_v61 = vmul.f32 %v1815_v26, %v1809_v20 }
0x1d0c   :  { %1819 = vrot.lane.b32.xlu1 %v1817_v61, %s2524_s2 }
0x1d7e   :  { %v1820_v17 = vpop.permute.xlu1 %1819 }
0x1d7f   :  { %v1822_v25 = vadd.f32 %v1820_v17, %v1811_v31 }
0x1d81   :  { %2432 = vtanh.f32 %v1822_v25 }
0x1d87   :  { %v2433_v10 = vpop.eup %2432 }
0x1d88   :  { %1825 = vrot.lane.b32.xlu2 %v2433_v10, %s2523_s0 }
0x1de2   :  { %v1826_v19 = vpop.permute.xlu2 %1825 }
0x1de3   :  { %v1828_v32 = vmul.f32 %v1826_v19, %v1809_v20  ;;  %v1483_v19 = vadd.f32 %v3126_v37, %v3095_v1 }
0x1de5   :  { %v1830_v35 = vpack.c.bf16 %v1828_v32, %v1828_v32  ;;  %v1488_v32 = vperm.slane %v3076_v43, 1 }
0x1de7   :  { %1832 = vrot.lane.b32.xlu0 %v1830_v35, %s2524_s2  ;;  %v1506_v33 = vadd.f32 %v1488_v32, %v1483_v19 }
0x1e59   :  { %v1833_v6 = vpop.permute.xlu0 %1832 }
0x1e5a   :  { %2238 = vmatmul.msk.bf16.vlgmr.msrb.gmra.mxu1 %vm384_vm10, %v1833_v6 }
0x1ed7   :  { %v1846_v27 = vpop.f32.mrf.mxu1 }
0x1ed8   :  { %v1850_v63 = vadd.f32 %v1846_v27, %v1501_v15 }
0x1eda   :  { %2434 = vtanh.f32 %v1850_v63  ;;  %v2239_v38 = vmul.f32 -1.442695, %v1850_v63 }
0x1edc   :  { %2436 = vpow2.f32 %v2239_v38 }
0x1edf   :  { %v1848_v29 = vpop.f32.mrf.mxu1 }
0x1ee0   :  { %v2435_v28 = vpop.eup %2434  ;;  %v1442_v29 = vadd.f32 %v3117_v55, %v3071_v41 }
0x1ee1   :  { %1873 = vrot.lane.b32.xlu1 %v2435_v28, %s2523_s0 }
0x1ee2   :  { %v2437_v62 = vpop.eup %2436  ;;  %v1505_v1 = vadd.f32 %v3079_v18, %v1442_v29 }
0x1ee3   :  { %v1854_v30 = vadd.f32 1.0, %v2437_v62  ;;  %v2244_v62 = vmul.f32 -1.442695, %v1506_v33 }
0x1ee5   :  { %2438 = vrcp.f32 %v1854_v30  ;;  %v1866_v51 = vand.u32 2147483648, %v1854_v30  ;;  %vm1860_vm1 = vweird.f32 %v1854_v30  ;;  %v1864_v56 = vand.u32 2147483647, %v1854_v30 }
0x1ee7   :  { %v1867_v57 = vor.u32 1.1754944e-38, %v1866_v51  ;;  %vm1865_vm2 = vcmp.eq.f32.partialorder %v1864_v56, 8.507059e+37 }
0x1eeb   :  { %v2439_v0 = vpop.eup %2438 }
0x1eec   :  { %v1856_v5 = vmul.f32 %v2439_v0, %v1854_v30  ;;  %vm1861_vm0 = vweird.f32 %v2439_v0 }
0x1eed   :  { %vm1862_vm11 = vmor %vm1860_vm1, %vm1861_vm0  ;;  %vm2101_vm1 = vcmask 80896  }
0x1eee   :  { %v1857_v39 = vsub.f32 1.0, %v1856_v5 }
0x1ef0   :  { %v1858_v60 = vmul.f32 %v2439_v0, %v1857_v39 }
0x1ef2   :  { %v1859_v46 = vadd.f32 %v2439_v0, %v1858_v60 }
0x1ef4   :  { %v1863_v4 = vsel %vm1862_vm11, %v2439_v0, %v1859_v46 }
0x1ef5   :  { %v1868_v42 = vsel %vm1865_vm2, %v1867_v57, %v1863_v4 }
0x1ef6   :  { %v1870_v36 = vmul.f32 %v1868_v42, %v1822_v25 }
0x1f53   :  { %v1874_v40 = vpop.permute.xlu1 %1873 }
0x1f54   :  { %v1876_v44 = vmul.f32 %v1874_v40, %v1868_v42 }
0x1f56   :  { %1878 = vrot.lane.b32.xlu2 %v1876_v44, %s2524_s2 }
0x1fb0   :  { %v1879_v48 = vpop.permute.xlu2 %1878 }
0x1fb1   :  { %v1881_v21 = vadd.f32 %v1879_v48, %v1870_v36 }
0x1fb3   :  { %2440 = vtanh.f32 %v1881_v21 }
0x1fb9   :  { %v2441_v49 = vpop.eup %2440 }
0x1fba   :  { %1884 = vrot.lane.b32.xlu0 %v2441_v49, %s2523_s0 }
0x202c   :  { %v1885_v50 = vpop.permute.xlu0 %1884 }
0x202d   :  { %v1887_v52 = vmul.f32 %v1885_v50, %v1868_v42 }
0x202f   :  { %v1889_v45 = vpack.c.bf16 %v1887_v52, %v1887_v52 }
0x2031   :  { %1891 = vrot.lane.b32.xlu1 %v1889_v45, %s2524_s2 }
0x20a3   :  { %v1892_v53 = vpop.permute.xlu1 %1891 }
0x20a4   :  { %2240 = vmatmul.msk.bf16.vlgmr.msra.gmra.mxu2 %vm384_vm10, %v1892_v53 }
0x2127   :  { %v1905_v59 = vpop.f32.mrf.mxu2 }
0x2128   :  { %v1909_v3 = vadd.f32 %v1905_v59, %v1503_v58 }
0x212a   :  { %2442 = vtanh.f32 %v1909_v3  ;;  %v2241_v2 = vmul.f32 -1.442695, %v1909_v3 }
0x212c   :  { %2444 = vpow2.f32 %v2241_v2  ;;  %v2045_v2 = vld [vmem:[%s3215_s8 + $0x38] sm:$0xff] }
0x212d   :  { %2063 = vmatpush.msra.mxu0 %v2045_v2 }
0x212f   :  { %v1907_v8 = vpop.f32.mrf.mxu2 }
0x2130   :  { %v2443_v11 = vpop.eup %2442 }
0x2131   :  { %1932 = vrot.lane.b32.xlu2 %v2443_v11, %s2523_s0 }
0x2132   :  { %v2445_v12 = vpop.eup %2444 }
0x2133   :  { %v1913_v34 = vadd.f32 1.0, %v2445_v12  ;;  %v2044_v12 = vld [vmem:[%s3215_s8 + $0x30] sm:$0xff] }
0x2134   :  { %2064 = vmatpush.msra.mxu0 %v2044_v12 }
0x2135   :  { %2446 = vrcp.f32 %v1913_v34  ;;  %v1925_v13 = vand.u32 2147483648, %v1913_v34  ;;  %vm1919_vm4 = vweird.f32 %v1913_v34  ;;  %v1923_v47 = vand.u32 2147483647, %v1913_v34 }
0x2137   :  { %v1926_v24 = vor.u32 1.1754944e-38, %v1925_v13  ;;  %vm1924_vm6 = vcmp.eq.f32.partialorder %v1923_v47, 8.507059e+37 }
0x213b   :  { %v2447_v14 = vpop.eup %2446 }
0x213c   :  { %v1915_v16 = vmul.f32 %v2447_v14, %v1913_v34  ;;  %vm1920_vm3 = vweird.f32 %v2447_v14  ;;  %v2043_v34 = vld [vmem:[%s3215_s8 + $0x28] sm:$0xff] }
0x213d   :  { %vm1921_vm5 = vmor %vm1919_vm4, %vm1920_vm3  ;;  %2065 = vmatpush.msra.mxu0 %v2043_v34 }
0x213e   :  { %v1916_v22 = vsub.f32 1.0, %v1915_v16 }
0x2140   :  { %v1917_v9 = vmul.f32 %v2447_v14, %v1916_v22 }
0x2142   :  { %v1918_v7 = vadd.f32 %v2447_v14, %v1917_v9 }
0x2144   :  { %v1922_v23 = vsel %vm1921_vm5, %v2447_v14, %v1918_v7  ;;  %v2042_v14 = vld [vmem:[%s3215_s8 + $0x20] sm:$0xff] }
0x2145   :  { %v1927_v20 = vsel %vm1924_vm6, %v1926_v24, %v1922_v23  ;;  %2066 = vmatpush.msra.mxu0 %v2042_v14  ;;  %v2041_v23 = vld [vmem:[%s3215_s8 + $0x18] sm:$0xff] }
0x2146   :  { %v1929_v31 = vmul.f32 %v1927_v20, %v1881_v21  ;;  %2088 = vmatpush.msra.mxu1 %v2041_v23 }
0x218b   :  { %v1933_v26 = vpop.permute.xlu2 %1932 }
0x218c   :  { %v1935_v61 = vmul.f32 %v1933_v26, %v1927_v20 }
0x218e   :  { %1937 = vrot.lane.b32.xlu0 %v1935_v61, %s2524_s2  ;;  %v2040_v61 = vld [vmem:[%s3215_s8 + $0x10] sm:$0xff] }
0x218f   :  { %2089 = vmatpush.msra.mxu1 %v2040_v61 }
0x2200   :  { %v1938_v17 = vpop.permute.xlu0 %1937 }
0x2201   :  { %v3156_v25 = vadd.f32 %v1938_v17, %v1929_v31  ;;  %v2039_v31 = vld [vmem:[%s3215_s8 + $0x8] sm:$0xff]  ;;  %v2038_v17 = vld [vmem:[%s3215_s8] sm:$0xff] }
0x2202   :  { %2090 = vmatpush.msra.mxu1 %v2039_v31 }
0x2203   :  { %2448 = vtanh.f32 %v3156_v25 }
0x2204   :  { %2450 = vtanh.f32 %v1506_v33  ;;  %2091 = vmatpush.msra.mxu1 %v2038_v17 }
0x2209   :  { %v2449_v10 = vpop.eup %2448 }
0x220a   :  { %1943 = vrot.lane.b32.xlu1 %v2449_v10, %s2523_s0  ;;  %v2451_v27 = vpop.eup %2450  ;;  %v2265_v10 = vld [vmem:[%s3216_s9] ss:$0 sm:$0xff] }
0x227c   :  { %v1944_v35 = vpop.permute.xlu1 %1943 }
0x227d   :  { %v1946_v6 = vmul.f32 %v1944_v35, %v1927_v20 }
0x227f   :  { %v1948_v15 = vpack.c.bf16 %v1946_v6, %v1946_v6 }
0x2281   :  { %1950 = vrot.lane.b32.xlu2 %v1948_v15, %s2524_s2 }
0x2289   :  { %2028 = vrot.lane.b32.xlu2 %v2451_v27, %s2523_s0 }
0x22db   :  { %v1951_v63 = vpop.permute.xlu2 %1950 }
0x22dc   :  { %2242 = vmatmul.msk.bf16.vlgmr.msra.gmra.mxu3 %vm384_vm10, %v1951_v63 }
0x22e3   :  { %v2029_v52 = vpop.permute.xlu2 %2028 }
0x235f   :  { %v1964_v37 = vpop.f32.mrf.mxu3 }
0x2360   :  { %v1968_v43 = vadd.f32 %v1964_v37, %v1505_v1 }
0x2362   :  { %2452 = vtanh.f32 %v1968_v43  ;;  %v2243_v30 = vmul.f32 -1.442695, %v1968_v43 }
0x2363   :  { %2454 = vpow2.f32 %v2244_v62 }
0x2364   :  { %2456 = vpow2.f32 %v2243_v30 }
0x2367   :  { %v1966_v28 = vpop.f32.mrf.mxu3 }
0x2368   :  { %v2453_v38 = vpop.eup %2452 }
0x2369   :  { %1991 = vrot.lane.b32.xlu0 %v2453_v38, %s2523_s0  ;;  %v2455_v0 = vpop.eup %2454 }
0x236a   :  { %v2457_v5 = vpop.eup %2456  ;;  %v2010_v39 = vadd.f32 1.0, %v2455_v0 }
0x236b   :  { %v1972_v60 = vadd.f32 1.0, %v2457_v5 }
0x236c   :  { %2458 = vrcp.f32 %v2010_v39  ;;  %v2022_v42 = vand.u32 2147483648, %v2010_v39  ;;  %vm2016_vm9 = vweird.f32 %v2010_v39  ;;  %v2020_v36 = vand.u32 2147483647, %v2010_v39 }
0x236d   :  { %2460 = vrcp.f32 %v1972_v60  ;;  %v1984_v48 = vand.u32 2147483648, %v1972_v60  ;;  %vm1978_vm13 = vweird.f32 %v1972_v60  ;;  %v1982_v21 = vand.u32 2147483647, %v1972_v60 }
0x236e   :  { %v2023_v50 = vor.u32 1.1754944e-38, %v2022_v42  ;;  %vm2021_vm15 = vcmp.eq.f32.partialorder %v2020_v36, 8.507059e+37 }
0x236f   :  { %v1985_v53 = vor.u32 1.1754944e-38, %v1984_v48  ;;  %vm1983_vm0 = vcmp.eq.f32.partialorder %v1982_v21, 8.507059e+37 }
0x2372   :  { %v2459_v41 = vpop.eup %2458 }
0x2373   :  { %v2461_v55 = vpop.eup %2460  ;;  %v2012_v18 = vmul.f32 %v2459_v41, %v2010_v39  ;;  %vm2017_vm7 = vweird.f32 %v2459_v41 }
0x2374   :  { %v1974_v46 = vmul.f32 %v2461_v55, %v1972_v60  ;;  %vm1979_vm8 = vweird.f32 %v2461_v55  ;;  %vm2018_vm12 = vmor %vm2016_vm9, %vm2017_vm7 }
0x2375   :  { %v2013_v51 = vsub.f32 1.0, %v2012_v18  ;;  %vm1980_vm14 = vmor %vm1978_vm13, %vm1979_vm8 }
0x2376   :  { %v1975_v56 = vsub.f32 1.0, %v1974_v46 }
0x2377   :  { %v2014_v4 = vmul.f32 %v2459_v41, %v2013_v51 }
0x2378   :  { %v1976_v57 = vmul.f32 %v2461_v55, %v1975_v56 }
0x2379   :  { %v2015_v40 = vadd.f32 %v2459_v41, %v2014_v4 }
0x237a   :  { %v1977_v44 = vadd.f32 %v2461_v55, %v1976_v57 }
0x237b   :  { %v2019_v49 = vsel %vm2018_vm12, %v2459_v41, %v2015_v40 }
0x237c   :  { %v1981_v45 = vsel %vm1980_vm14, %v2461_v55, %v1977_v44  ;;  %v2024_v54 = vsel %vm2021_vm15, %v2023_v50, %v2019_v49 }
0x237d   :  { %v2031_v58 = vmul.f32 %v2029_v52, %v2024_v54  ;;  %v1986_v3 = vsel %vm1983_vm0, %v1985_v53, %v1981_v45 }
0x237e   :  { %v1988_v16 = vmul.f32 %v1986_v3, %v3156_v25 }
0x237f   :  { %2462 = vtanh.f32 %v2031_v58 }
0x2385   :  { %v2463_v11 = vpop.eup %2462 }
0x23db   :  { %v1992_v59 = vpop.permute.xlu0 %1991 }
0x23dc   :  { %v1994_v8 = vmul.f32 %v1992_v59, %v1986_v3 }
0x23de   :  { %1996 = vrot.lane.b32.xlu1 %v1994_v8, %s2524_s2 }
0x23e6   :  { %2034 = vrot.lane.b32.xlu1 %v2463_v11, %s2525_s6 }
0x2450   :  { %v1997_v22 = vpop.permute.xlu1 %1996 }
0x2451   :  { %v1999_v9 = vadd.f32 %v1997_v22, %v1988_v16 }
0x2453   :  { %2464 = vtanh.f32 %v1999_v9 }
0x2458   :  { %v2035_v7 = vpop.permute.xlu1 %2034 }
0x2459   :  { %v2465_v13 = vpop.eup %2464  ;;  %v2037_v47 = vmul.f32 %v2035_v7, %v2024_v54 }
0x245a   :  { %2002 = vrot.lane.b32.xlu0 %v2465_v13, %s2523_s0 }
0x245b   :  { %2047 = vrot.lane.b32.xlu2 %v2037_v47, %s2524_s2 }
0x24b5   :  { %v2048_v24 = vpop.permute.xlu2 %2047 }
0x24b6   :  { %2245 = vmatmul.msk.f32.vlgmr.msra.gmra.mxu0 %vm384_vm10, %v2048_v24 }
0x24cc   :  { %v2003_v26 = vpop.permute.xlu0 %2002 }
0x24cd   :  { %v2005_v20 = vmul.f32 %v2003_v26, %v1986_v3 }
0x24cf   :  { %2072 = vrot.lane.b32.xlu0 %v2005_v20, %s2524_s2 }
0x2533   :  { %v2068_v19 = vpop.f32.mrf.mxu0 }
0x2541   :  { %v2073_v25 = vpop.permute.xlu0 %2072 }
0x2542   :  { %2246 = vmatmul.msk.f32.vlgmr.msra.gmra.mxu1 %vm384_vm10, %v2073_v25 }
0x25bf   :  { %v2093_v32 = vpop.f32.mrf.mxu1 }
0x25c0   :  { %v2094_v35 = vadd.f32 %v2093_v32, %v2068_v19 }
0x25c2   :  { %v2100_v6 = vadd.f32 %v2265_v10, %v2094_v35 }
0x25c4   :  { %2102 = vst.msk [vmem:[%s3217_s10] sm:$0xff] %vm2101_vm1, %v2100_v6 }
0x25c5   :  { %2107 = vsyncpa [#allocation6], 1 }
0x25c6   :  { %2108 = vsyncpa [#allocation8], 1 }

</bundles_post_ra>
